<compile_context>
chip_gen: v7x
topology: tpu7x:2x2x1
jax: 0.10.0
libtpu: 0.0.40
codegen_flags: <defaults>
</compile_context>

<pallas_src>
import jax
import jax.numpy as jnp
from jax import lax
from jax.experimental import pallas as pl
from jax.experimental.pallas import tpu as pltpu


def _leaky(x):
    return jnp.where(x > 0, x, 0.01 * x)


def basic_block_kernel(x_ref, s1_ref, b1_ref, w1_ref, b2_ref, w2_ref,
                       o_ref, pad_ref, col_ref):
    """One image per grid step: LReLU(BN1(x)) -> conv1 -> LReLU(+b2) -> conv2 -> +x.

    x_ref  : (1, H, W, C)   f32 activations, NHWC
    s1_ref : (1, C)         folded BN1 scale
    b1_ref : (1, C)         folded BN1 bias
    w1_ref : (9*C, C)       bf16 conv1 weights, (kh,kw,ci)-major; BN2 scale folded in
    b2_ref : (1, C)         folded BN2 bias
    w2_ref : (9*C, C)       bf16 conv2 weights
    o_ref  : (1, H, W, C)   output
    pad_ref: (H+2, W+2, C)  bf16 scratch: zero halo + activation interior (reused)
    col_ref: (H, W, 9*C)    bf16 scratch: im2col patch buffer (reused)
    """
    _, H, W, C = x_ref.shape

    x = x_ref[0].astype(jnp.float32)                       # (H, W, C)

    # Zero only the 2-row / 2-col halo (interior is fully rewritten each conv).
    # Done per step so it stays correct when the grid axis is core-sharded.
    zrow = jnp.zeros((1, W + 2, C), pad_ref.dtype)
    zcol = jnp.zeros((H + 2, 1, C), pad_ref.dtype)
    pad_ref[0:1, :, :] = zrow
    pad_ref[H + 1:H + 2, :, :] = zrow
    pad_ref[:, 0:1, :] = zcol
    pad_ref[:, W + 1:W + 2, :] = zcol

    # ---- BN1 (folded affine) + LeakyReLU(0.01), f32 elementwise ----
    t = _leaky(x * s1_ref[...] + b1_ref[...])              # (H, W, C)

    def conv3x3(act_hwc, w_ref):
        # Stage activation inside the zero halo, gather the 9 taps into one
        # (H, W, 9*C) im2col buffer, then a single MXU matmul with K = 9*C.
        pad_ref[1:H + 1, 1:W + 1, :] = act_hwc.astype(pad_ref.dtype)
        for kh in range(3):
            for kw in range(3):
                tap = kh * 3 + kw
                col_ref[:, :, tap * C:(tap + 1) * C] = (
                    pad_ref[kh:kh + H, kw:kw + W, :])
            # (no reshape per tap: the collapse happens once below)
        patches = col_ref[...].reshape(H * W, 9 * C)        # bf16
        return jnp.dot(patches, w_ref[...],
                       preferred_element_type=jnp.float32)  # (H*W, C) f32

    # ---- conv1 (BN2 scale pre-folded into w1) -> +b2 -> LeakyReLU ----
    h1 = conv3x3(t, w1_ref)
    t2 = _leaky(h1 + b2_ref[...]).reshape(H, W, C)

    # ---- conv2 -> residual add (equalInOut=True path) ----
    h2 = conv3x3(t2, w2_ref)
    o_ref[0] = (x + h2.reshape(H, W, C)).astype(o_ref.dtype)


def basic_block_forward_nhwc(x, params, *, eps=1e-5):
    """NHWC fast path (preferred: no layout transposes around the kernel)."""
    (g1, be1, rm1, rv1, w1_oihw, g2, be2, rm2, rv2, w2_oihw) = params

    N, H, W, Cin = x.shape
    Cout = w1_oihw.shape[0]
    assert Cin == Cout, "only the equalInOut=True path is implemented"
    # TODO(synk): stride!=(1,1) / convShortcut / dropout / training-mode BN.

    # Fold eval-mode BN running stats: y = s * x + b
    s1 = g1 * lax.rsqrt(rv1 + eps)
    b1 = be1 - rm1 * s1
    s2 = g2 * lax.rsqrt(rv2 + eps)
    b2 = be2 - rm2 * s2

    # OIHW -> (kh, kw, ci, co) -> (9*Cin, Cout).  Fold BN2 scale into conv1's
    # output columns; bf16 matmul operands, f32 accumulation on the MXU.
    w1 = jnp.transpose(w1_oihw, (2, 3, 1, 0)).reshape(9 * Cin, Cout)
    w1 = (w1 * s2[None, :]).astype(jnp.bfloat16)
    w2 = jnp.transpose(w2_oihw, (2, 3, 1, 0)).reshape(9 * Cout, Cout)
    w2 = w2.astype(jnp.bfloat16)

    s1r = s1.reshape(1, Cin).astype(jnp.float32)
    b1r = b1.reshape(1, Cin).astype(jnp.float32)
    b2r = b2.reshape(1, Cout).astype(jnp.float32)

    flops = 2 * 2 * N * H * W * (9 * Cin) * Cout            # two 3x3 convs
    bytes_accessed = int(
        2 * x.size * x.dtype.itemsize                        # read x + write out
        + (w1.size + w2.size) * 2                            # bf16 weights
        + (s1r.size + b1r.size + b2r.size) * 4)

    grid_spec = pltpu.PrefetchScalarGridSpec(
        num_scalar_prefetch=0,
        grid=(N,),                           # one image per step, double-buffered
        in_specs=[
            pl.BlockSpec((1, H, W, Cin), lambda n: (n, 0, 0, 0)),
            pl.BlockSpec((1, Cin), lambda n: (0, 0)),
            pl.BlockSpec((1, Cin), lambda n: (0, 0)),
            pl.BlockSpec((9 * Cin, Cout), lambda n: (0, 0)),
            pl.BlockSpec((1, Cout), lambda n: (0, 0)),
            pl.BlockSpec((9 * Cout, Cout), lambda n: (0, 0)),
        ],
        out_specs=pl.BlockSpec((1, H, W, Cout), lambda n: (n, 0, 0, 0)),
        scratch_shapes=[
            pltpu.VMEM((H + 2, W + 2, Cin), jnp.bfloat16),   # shared padded buffer
            pltpu.VMEM((H, W, 9 * Cin), jnp.bfloat16),       # im2col patch buffer
        ],
    )

    return pl.pallas_call(
        basic_block_kernel,
        out_shape=jax.ShapeDtypeStruct((N, H, W, Cout), x.dtype),
        grid_spec=grid_spec,
        compiler_params=pltpu.CompilerParams(
            dimension_semantics=("parallel",),   # batch sharded across TCs on v7x
            vmem_limit_bytes=48 * 1024 * 1024,   # within v7x's 64 MiB / TC
        ),
        cost_estimate=pl.CostEstimate(
            flops=flops, transcendentals=0, bytes_accessed=bytes_accessed),
    )(x, s1r, b1r, w1, b2r, w2)


def basic_block_forward_nchw(x_nchw, params, *, eps=1e-5):
    """PyTorch-layout (NCHW) compatibility wrapper.

    Prefer basic_block_forward_nhwc with a channels-last model: these two
    transposes are extra full-tensor HBM round trips outside the kernel.
    """
    x = jnp.transpose(x_nchw, (0, 2, 3, 1))                  # NCHW -> NHWC
    out = basic_block_forward_nhwc(x, params, eps=eps)
    return jnp.transpose(out, (0, 3, 1, 2))                  # NHWC -> NCHW


def basic_block_reference_nchw(x, params, eps=1e-5):
    """Pure-JAX reference mirroring the torch module (eval-mode BN), NCHW."""
    (g1, be1, rm1, rv1, w1, g2, be2, rm2, rv2, w2) = params
    s1 = g1 * lax.rsqrt(rv1 + eps)
    b1 = be1 - rm1 * s1
    s2 = g2 * lax.rsqrt(rv2 + eps)
    b2 = be2 - rm2 * s2
    dn = ('NCHW', 'OIHW', 'NCHW')

    t = _leaky(x * s1[None, :, None, None] + b1[None, :, None, None])
    h1 = lax.conv_general_dilated(t, w1, (1, 1), [(1, 1), (1, 1)],
                                  dimension_numbers=dn)
    t2 = _leaky(h1 * s2[None, :, None, None] + b2[None, :, None, None])
    h2 = lax.conv_general_dilated(t2, w2, (1, 1), [(1, 1), (1, 1)],
                                  dimension_numbers=dn)
    return x + h2


def make_params(key, in_planes, out_planes):
    ks = jax.random.split(key, 10)
    g1 = jax.random.uniform(ks[0], (in_planes,), jnp.float32, 0.5, 1.5)
    be1 = 0.1 * jax.random.normal(ks[1], (in_planes,), jnp.float32)
    rm1 = 0.1 * jax.random.normal(ks[2], (in_planes,), jnp.float32)
    rv1 = jax.random.uniform(ks[3], (in_planes,), jnp.float32, 0.5, 1.5)
    w1 = 0.1 * jax.random.normal(ks[4], (out_planes, in_planes, 3, 3), jnp.float32)
    g2 = jax.random.uniform(ks[5], (out_planes,), jnp.float32, 0.5, 1.5)
    be2 = 0.1 * jax.random.normal(ks[6], (out_planes,), jnp.float32)
    rm2 = 0.1 * jax.random.normal(ks[7], (out_planes,), jnp.float32)
    rv2 = jax.random.uniform(ks[8], (out_planes,), jnp.float32, 0.5, 1.5)
    w2 = 0.1 * jax.random.normal(ks[9], (out_planes, out_planes, 3, 3), jnp.float32)
    return (g1, be1, rm1, rv1, w1, g2, be2, rm2, rv2, w2)


if __name__ == "__main__":
    key = jax.random.PRNGKey(0)
    kx, kp = jax.random.split(key)

    # BasicBlockTimeBest(in_planes=4, out_planes=4, stride=1, dropRate=0.0)
    N, C, H, W = 2, 4, 16, 16
    x = jax.random.normal(kx, (N, C, H, W), jnp.float32)
    params = make_params(kp, C, C)

    out = jax.block_until_ready(basic_block_forward_nchw(x, params))
    ref = jax.block_until_ready(basic_block_reference_nchw(x, params))

    assert out.shape == (N, C, H, W), out.shape
    err = float(jnp.max(jnp.abs(out - ref)))
    assert err < 1e-2, f"max abs err {err}"   # bf16 MXU operands, f32 accumulate

    print("KERNEL_OK")
</pallas_src>

<mosaic_0001>
module attributes {stable_mosaic.version = 11 : i64} {
  func.func @basic_block_kernel(%arg0: i32, %arg1: memref<1x16x16x4xf32, #tpu.memory_space<vmem>>, %arg2: memref<1x4xf32, #tpu.memory_space<vmem>>, %arg3: memref<1x4xf32, #tpu.memory_space<vmem>>, %arg4: memref<36x4xbf16, #tpu.memory_space<vmem>>, %arg5: memref<1x4xf32, #tpu.memory_space<vmem>>, %arg6: memref<36x4xbf16, #tpu.memory_space<vmem>>, %arg7: memref<1x16x16x4xf32, #tpu.memory_space<vmem>>, %arg8: memref<18x18x4xbf16, #tpu.memory_space<vmem>>, %arg9: memref<16x16x36xbf16, #tpu.memory_space<vmem>>) attributes {dimension_semantics = [#tpu.dimension_semantics<parallel>], iteration_bounds = array<i64: 2>, scalar_prefetch = 0 : i64, scratch_operands = 2 : i64, tpu.core_type = #tpu.core_type<tc>, window_params = [{transform_indices = @transform_0, window_bounds = array<i64: 1, 16, 16, 4>}, {pipeline_mode = #tpu.pipeline_mode<synchronous>, transform_indices = @transform_1, window_bounds = array<i64: 1, 4>}, {pipeline_mode = #tpu.pipeline_mode<synchronous>, transform_indices = @transform_2, window_bounds = array<i64: 1, 4>}, {pipeline_mode = #tpu.pipeline_mode<synchronous>, transform_indices = @transform_3, window_bounds = array<i64: 36, 4>}, {pipeline_mode = #tpu.pipeline_mode<synchronous>, transform_indices = @transform_4, window_bounds = array<i64: 1, 4>}, {pipeline_mode = #tpu.pipeline_mode<synchronous>, transform_indices = @transform_5, window_bounds = array<i64: 36, 4>}, {transform_indices = @transform_6, window_bounds = array<i64: 1, 16, 16, 4>}]} {
    %c0 = arith.constant 0 : index
    %c0_0 = arith.constant 0 : index
    %c0_1 = arith.constant 0 : index
    %c0_2 = arith.constant 0 : index
    %0 = vector.load %arg1[%c0, %c0_0, %c0_1, %c0_2] : memref<1x16x16x4xf32, #tpu.memory_space<vmem>>, vector<1x16x16x4xf32>
    %1 = vector.shape_cast %0 : vector<1x16x16x4xf32> to vector<16x16x4xf32>
    %cst = arith.constant 0.000000e+00 : bf16
    %2 = vector.broadcast %cst : bf16 to vector<1x18x4xbf16>
    %cst_3 = arith.constant 0.000000e+00 : bf16
    %3 = vector.broadcast %cst_3 : bf16 to vector<18x1x4xbf16>
    %c0_4 = arith.constant 0 : index
    %c0_5 = arith.constant 0 : index
    %c0_6 = arith.constant 0 : index
    %4 = vector.load %arg8[%c0_4, %c0_5, %c0_6] : memref<18x18x4xbf16, #tpu.memory_space<vmem>>, vector<1x18x4xbf16>
    tpu.vector_store %arg8[%c0_4, %c0_5, %c0_6], %2 {strides = array<i32>} : memref<18x18x4xbf16, #tpu.memory_space<vmem>>, vector<1x18x4xbf16>,
    %c17 = arith.constant 17 : index
    %c0_7 = arith.constant 0 : index
    %c0_8 = arith.constant 0 : index
    %5 = vector.load %arg8[%c17, %c0_7, %c0_8] : memref<18x18x4xbf16, #tpu.memory_space<vmem>>, vector<1x18x4xbf16>
    tpu.vector_store %arg8[%c17, %c0_7, %c0_8], %2 {strides = array<i32>} : memref<18x18x4xbf16, #tpu.memory_space<vmem>>, vector<1x18x4xbf16>,
    %c0_9 = arith.constant 0 : index
    %c0_10 = arith.constant 0 : index
    %c0_11 = arith.constant 0 : index
    %6 = vector.load %arg8[%c0_9, %c0_10, %c0_11] : memref<18x18x4xbf16, #tpu.memory_space<vmem>>, vector<18x1x4xbf16>
    tpu.vector_store %arg8[%c0_9, %c0_10, %c0_11], %3 {strides = array<i32>} : memref<18x18x4xbf16, #tpu.memory_space<vmem>>, vector<18x1x4xbf16>,
    %c0_12 = arith.constant 0 : index
    %c17_13 = arith.constant 17 : index
    %c0_14 = arith.constant 0 : index
    %7 = vector.load %arg8[%c0_12, %c17_13, %c0_14] : memref<18x18x4xbf16, #tpu.memory_space<vmem>>, vector<18x1x4xbf16>
    tpu.vector_store %arg8[%c0_12, %c17_13, %c0_14], %3 {strides = array<i32>} : memref<18x18x4xbf16, #tpu.memory_space<vmem>>, vector<18x1x4xbf16>,
    %c0_15 = arith.constant 0 : index
    %c0_16 = arith.constant 0 : index
    %8 = vector.load %arg2[%c0_15, %c0_16] : memref<1x4xf32, #tpu.memory_space<vmem>>, vector<1x4xf32>
    %9 = vector.shape_cast %8 : vector<1x4xf32> to vector<1x1x4xf32>
    %10 = vector.broadcast %9 : vector<1x1x4xf32> to vector<16x16x4xf32>
    %11 = arith.mulf %1, %10 : vector<16x16x4xf32>
    %c0_17 = arith.constant 0 : index
    %c0_18 = arith.constant 0 : index
    %12 = vector.load %arg3[%c0_17, %c0_18] : memref<1x4xf32, #tpu.memory_space<vmem>>, vector<1x4xf32>
    %13 = vector.shape_cast %12 : vector<1x4xf32> to vector<1x1x4xf32>
    %14 = vector.broadcast %13 : vector<1x1x4xf32> to vector<16x16x4xf32>
    %15 = arith.addf %11, %14 : vector<16x16x4xf32>
    %cst_19 = arith.constant 0.000000e+00 : f32
    %16 = vector.broadcast %cst_19 : f32 to vector<16x16x4xf32>
    %17 = arith.cmpf ogt, %15, %16 : vector<16x16x4xf32>
    %cst_20 = arith.constant 0.00999999977 : f32
    %18 = vector.broadcast %cst_20 : f32 to vector<16x16x4xf32>
    %19 = arith.mulf %18, %15 : vector<16x16x4xf32>
    %20 = arith.select %17, %15, %19 : vector<16x16x4xi1>, vector<16x16x4xf32>
    %21 = arith.truncf %20 : vector<16x16x4xf32> to vector<16x16x4xbf16>
    %c1 = arith.constant 1 : index
    %c1_21 = arith.constant 1 : index
    %c0_22 = arith.constant 0 : index
    %22 = vector.load %arg8[%c1, %c1_21, %c0_22] : memref<18x18x4xbf16, #tpu.memory_space<vmem>>, vector<16x16x4xbf16>
    tpu.vector_store %arg8[%c1, %c1_21, %c0_22], %21 {strides = array<i32>} : memref<18x18x4xbf16, #tpu.memory_space<vmem>>, vector<16x16x4xbf16>,
    %c0_23 = arith.constant 0 : index
    %c0_24 = arith.constant 0 : index
    %c0_25 = arith.constant 0 : index
    %23 = vector.load %arg8[%c0_23, %c0_24, %c0_25] : memref<18x18x4xbf16, #tpu.memory_space<vmem>>, vector<16x16x4xbf16>
    %c0_26 = arith.constant 0 : index
    %c0_27 = arith.constant 0 : index
    %c0_28 = arith.constant 0 : index
    %24 = vector.load %arg9[%c0_26, %c0_27, %c0_28] : memref<16x16x36xbf16, #tpu.memory_space<vmem>>, vector<16x16x4xbf16>
    tpu.vector_store %arg9[%c0_26, %c0_27, %c0_28], %23 {strides = array<i32>} : memref<16x16x36xbf16, #tpu.memory_space<vmem>>, vector<16x16x4xbf16>,
    %c0_29 = arith.constant 0 : index
    %c1_30 = arith.constant 1 : index
    %c0_31 = arith.constant 0 : index
    %25 = vector.load %arg8[%c0_29, %c1_30, %c0_31] : memref<18x18x4xbf16, #tpu.memory_space<vmem>>, vector<16x16x4xbf16>
    %c0_32 = arith.constant 0 : index
    %c0_33 = arith.constant 0 : index
    %c4 = arith.constant 4 : index
    %26 = vector.load %arg9[%c0_32, %c0_33, %c4] : memref<16x16x36xbf16, #tpu.memory_space<vmem>>, vector<16x16x4xbf16>
    tpu.vector_store %arg9[%c0_32, %c0_33, %c4], %25 {strides = array<i32>} : memref<16x16x36xbf16, #tpu.memory_space<vmem>>, vector<16x16x4xbf16>,
    %c0_34 = arith.constant 0 : index
    %c2 = arith.constant 2 : index
    %c0_35 = arith.constant 0 : index
    %27 = vector.load %arg8[%c0_34, %c2, %c0_35] : memref<18x18x4xbf16, #tpu.memory_space<vmem>>, vector<16x16x4xbf16>
    %c0_36 = arith.constant 0 : index
    %c0_37 = arith.constant 0 : index
    %c8 = arith.constant 8 : index
    %28 = vector.load %arg9[%c0_36, %c0_37, %c8] : memref<16x16x36xbf16, #tpu.memory_space<vmem>>, vector<16x16x4xbf16>
    tpu.vector_store %arg9[%c0_36, %c0_37, %c8], %27 {strides = array<i32>} : memref<16x16x36xbf16, #tpu.memory_space<vmem>>, vector<16x16x4xbf16>,
    %c1_38 = arith.constant 1 : index
    %c0_39 = arith.constant 0 : index
    %c0_40 = arith.constant 0 : index
    %29 = vector.load %arg8[%c1_38, %c0_39, %c0_40] : memref<18x18x4xbf16, #tpu.memory_space<vmem>>, vector<16x16x4xbf16>
    %c0_41 = arith.constant 0 : index
    %c0_42 = arith.constant 0 : index
    %c12 = arith.constant 12 : index
    %30 = vector.load %arg9[%c0_41, %c0_42, %c12] : memref<16x16x36xbf16, #tpu.memory_space<vmem>>, vector<16x16x4xbf16>
    tpu.vector_store %arg9[%c0_41, %c0_42, %c12], %29 {strides = array<i32>} : memref<16x16x36xbf16, #tpu.memory_space<vmem>>, vector<16x16x4xbf16>,
    %c1_43 = arith.constant 1 : index
    %c1_44 = arith.constant 1 : index
    %c0_45 = arith.constant 0 : index
    %31 = vector.load %arg8[%c1_43, %c1_44, %c0_45] : memref<18x18x4xbf16, #tpu.memory_space<vmem>>, vector<16x16x4xbf16>
    %c0_46 = arith.constant 0 : index
    %c0_47 = arith.constant 0 : index
    %c16 = arith.constant 16 : index
    %32 = vector.load %arg9[%c0_46, %c0_47, %c16] : memref<16x16x36xbf16, #tpu.memory_space<vmem>>, vector<16x16x4xbf16>
    tpu.vector_store %arg9[%c0_46, %c0_47, %c16], %31 {strides = array<i32>} : memref<16x16x36xbf16, #tpu.memory_space<vmem>>, vector<16x16x4xbf16>,
    %c1_48 = arith.constant 1 : index
    %c2_49 = arith.constant 2 : index
    %c0_50 = arith.constant 0 : index
    %33 = vector.load %arg8[%c1_48, %c2_49, %c0_50] : memref<18x18x4xbf16, #tpu.memory_space<vmem>>, vector<16x16x4xbf16>
    %c0_51 = arith.constant 0 : index
    %c0_52 = arith.constant 0 : index
    %c20 = arith.constant 20 : index
    %34 = vector.load %arg9[%c0_51, %c0_52, %c20] : memref<16x16x36xbf16, #tpu.memory_space<vmem>>, vector<16x16x4xbf16>
    tpu.vector_store %arg9[%c0_51, %c0_52, %c20], %33 {strides = array<i32>} : memref<16x16x36xbf16, #tpu.memory_space<vmem>>, vector<16x16x4xbf16>,
    %c2_53 = arith.constant 2 : index
    %c0_54 = arith.constant 0 : index
    %c0_55 = arith.constant 0 : index
    %35 = vector.load %arg8[%c2_53, %c0_54, %c0_55] : memref<18x18x4xbf16, #tpu.memory_space<vmem>>, vector<16x16x4xbf16>
    %c0_56 = arith.constant 0 : index
    %c0_57 = arith.constant 0 : index
    %c24 = arith.constant 24 : index
    %36 = vector.load %arg9[%c0_56, %c0_57, %c24] : memref<16x16x36xbf16, #tpu.memory_space<vmem>>, vector<16x16x4xbf16>
    tpu.vector_store %arg9[%c0_56, %c0_57, %c24], %35 {strides = array<i32>} : memref<16x16x36xbf16, #tpu.memory_space<vmem>>, vector<16x16x4xbf16>,
    %c2_58 = arith.constant 2 : index
    %c1_59 = arith.constant 1 : index
    %c0_60 = arith.constant 0 : index
    %37 = vector.load %arg8[%c2_58, %c1_59, %c0_60] : memref<18x18x4xbf16, #tpu.memory_space<vmem>>, vector<16x16x4xbf16>
    %c0_61 = arith.constant 0 : index
    %c0_62 = arith.constant 0 : index
    %c28 = arith.constant 28 : index
    %38 = vector.load %arg9[%c0_61, %c0_62, %c28] : memref<16x16x36xbf16, #tpu.memory_space<vmem>>, vector<16x16x4xbf16>
    tpu.vector_store %arg9[%c0_61, %c0_62, %c28], %37 {strides = array<i32>} : memref<16x16x36xbf16, #tpu.memory_space<vmem>>, vector<16x16x4xbf16>,
    %c2_63 = arith.constant 2 : index
    %c2_64 = arith.constant 2 : index
    %c0_65 = arith.constant 0 : index
    %39 = vector.load %arg8[%c2_63, %c2_64, %c0_65] : memref<18x18x4xbf16, #tpu.memory_space<vmem>>, vector<16x16x4xbf16>
    %c0_66 = arith.constant 0 : index
    %c0_67 = arith.constant 0 : index
    %c32 = arith.constant 32 : index
    %40 = vector.load %arg9[%c0_66, %c0_67, %c32] : memref<16x16x36xbf16, #tpu.memory_space<vmem>>, vector<16x16x4xbf16>
    tpu.vector_store %arg9[%c0_66, %c0_67, %c32], %39 {strides = array<i32>} : memref<16x16x36xbf16, #tpu.memory_space<vmem>>, vector<16x16x4xbf16>,
    %c0_68 = arith.constant 0 : index
    %c0_69 = arith.constant 0 : index
    %c0_70 = arith.constant 0 : index
    %41 = vector.load %arg9[%c0_68, %c0_69, %c0_70] : memref<16x16x36xbf16, #tpu.memory_space<vmem>>, vector<16x16x36xbf16>
    %42 = vector.shape_cast %41 : vector<16x16x36xbf16> to vector<256x36xbf16>
    %c0_71 = arith.constant 0 : index
    %c0_72 = arith.constant 0 : index
    %43 = vector.load %arg4[%c0_71, %c0_72] : memref<36x4xbf16, #tpu.memory_space<vmem>>, vector<36x4xbf16>
    %cst_73 = arith.constant dense<0.000000e+00> : vector<256x4xf32>
    %44 = tpu.matmul %42, %43, %cst_73 {dimension_numbers = #tpu.dot_dimension_numbers<[1], [0], [0], [1], [0, 0, 1, 1], [], []>} : vector<256x36xbf16>, vector<36x4xbf16>, vector<256x4xf32> -> vector<256x4xf32>
    %c0_74 = arith.constant 0 : index
    %c0_75 = arith.constant 0 : index
    %45 = vector.load %arg5[%c0_74, %c0_75] : memref<1x4xf32, #tpu.memory_space<vmem>>, vector<1x4xf32>
    %46 = vector.broadcast %45 : vector<1x4xf32> to vector<256x4xf32>
    %47 = arith.addf %44, %46 : vector<256x4xf32>
    %cst_76 = arith.constant 0.000000e+00 : f32
    %48 = vector.broadcast %cst_76 : f32 to vector<256x4xf32>
    %49 = arith.cmpf ogt, %47, %48 : vector<256x4xf32>
    %cst_77 = arith.constant 0.00999999977 : f32
    %50 = vector.broadcast %cst_77 : f32 to vector<256x4xf32>
    %51 = arith.mulf %50, %47 : vector<256x4xf32>
    %52 = arith.select %49, %47, %51 : vector<256x4xi1>, vector<256x4xf32>
    %53 = vector.shape_cast %52 : vector<256x4xf32> to vector<16x16x4xf32>
    %54 = arith.truncf %53 : vector<16x16x4xf32> to vector<16x16x4xbf16>
    %c1_78 = arith.constant 1 : index
    %c1_79 = arith.constant 1 : index
    %c0_80 = arith.constant 0 : index
    %55 = vector.load %arg8[%c1_78, %c1_79, %c0_80] : memref<18x18x4xbf16, #tpu.memory_space<vmem>>, vector<16x16x4xbf16>
    tpu.vector_store %arg8[%c1_78, %c1_79, %c0_80], %54 {strides = array<i32>} : memref<18x18x4xbf16, #tpu.memory_space<vmem>>, vector<16x16x4xbf16>,
    %c0_81 = arith.constant 0 : index
    %c0_82 = arith.constant 0 : index
    %c0_83 = arith.constant 0 : index
    %56 = vector.load %arg8[%c0_81, %c0_82, %c0_83] : memref<18x18x4xbf16, #tpu.memory_space<vmem>>, vector<16x16x4xbf16>
    %c0_84 = arith.constant 0 : index
    %c0_85 = arith.constant 0 : index
    %c0_86 = arith.constant 0 : index
    %57 = vector.load %arg9[%c0_84, %c0_85, %c0_86] : memref<16x16x36xbf16, #tpu.memory_space<vmem>>, vector<16x16x4xbf16>
    tpu.vector_store %arg9[%c0_84, %c0_85, %c0_86], %56 {strides = array<i32>} : memref<16x16x36xbf16, #tpu.memory_space<vmem>>, vector<16x16x4xbf16>,
    %c0_87 = arith.constant 0 : index
    %c1_88 = arith.constant 1 : index
    %c0_89 = arith.constant 0 : index
    %58 = vector.load %arg8[%c0_87, %c1_88, %c0_89] : memref<18x18x4xbf16, #tpu.memory_space<vmem>>, vector<16x16x4xbf16>
    %c0_90 = arith.constant 0 : index
    %c0_91 = arith.constant 0 : index
    %c4_92 = arith.constant 4 : index
    %59 = vector.load %arg9[%c0_90, %c0_91, %c4_92] : memref<16x16x36xbf16, #tpu.memory_space<vmem>>, vector<16x16x4xbf16>
    tpu.vector_store %arg9[%c0_90, %c0_91, %c4_92], %58 {strides = array<i32>} : memref<16x16x36xbf16, #tpu.memory_space<vmem>>, vector<16x16x4xbf16>,
    %c0_93 = arith.constant 0 : index
    %c2_94 = arith.constant 2 : index
    %c0_95 = arith.constant 0 : index
    %60 = vector.load %arg8[%c0_93, %c2_94, %c0_95] : memref<18x18x4xbf16, #tpu.memory_space<vmem>>, vector<16x16x4xbf16>
    %c0_96 = arith.constant 0 : index
    %c0_97 = arith.constant 0 : index
    %c8_98 = arith.constant 8 : index
    %61 = vector.load %arg9[%c0_96, %c0_97, %c8_98] : memref<16x16x36xbf16, #tpu.memory_space<vmem>>, vector<16x16x4xbf16>
    tpu.vector_store %arg9[%c0_96, %c0_97, %c8_98], %60 {strides = array<i32>} : memref<16x16x36xbf16, #tpu.memory_space<vmem>>, vector<16x16x4xbf16>,
    %c1_99 = arith.constant 1 : index
    %c0_100 = arith.constant 0 : index
    %c0_101 = arith.constant 0 : index
    %62 = vector.load %arg8[%c1_99, %c0_100, %c0_101] : memref<18x18x4xbf16, #tpu.memory_space<vmem>>, vector<16x16x4xbf16>
    %c0_102 = arith.constant 0 : index
    %c0_103 = arith.constant 0 : index
    %c12_104 = arith.constant 12 : index
    %63 = vector.load %arg9[%c0_102, %c0_103, %c12_104] : memref<16x16x36xbf16, #tpu.memory_space<vmem>>, vector<16x16x4xbf16>
    tpu.vector_store %arg9[%c0_102, %c0_103, %c12_104], %62 {strides = array<i32>} : memref<16x16x36xbf16, #tpu.memory_space<vmem>>, vector<16x16x4xbf16>,
    %c1_105 = arith.constant 1 : index
    %c1_106 = arith.constant 1 : index
    %c0_107 = arith.constant 0 : index
    %64 = vector.load %arg8[%c1_105, %c1_106, %c0_107] : memref<18x18x4xbf16, #tpu.memory_space<vmem>>, vector<16x16x4xbf16>
    %c0_108 = arith.constant 0 : index
    %c0_109 = arith.constant 0 : index
    %c16_110 = arith.constant 16 : index
    %65 = vector.load %arg9[%c0_108, %c0_109, %c16_110] : memref<16x16x36xbf16, #tpu.memory_space<vmem>>, vector<16x16x4xbf16>
    tpu.vector_store %arg9[%c0_108, %c0_109, %c16_110], %64 {strides = array<i32>} : memref<16x16x36xbf16, #tpu.memory_space<vmem>>, vector<16x16x4xbf16>,
    %c1_111 = arith.constant 1 : index
    %c2_112 = arith.constant 2 : index
    %c0_113 = arith.constant 0 : index
    %66 = vector.load %arg8[%c1_111, %c2_112, %c0_113] : memref<18x18x4xbf16, #tpu.memory_space<vmem>>, vector<16x16x4xbf16>
    %c0_114 = arith.constant 0 : index
    %c0_115 = arith.constant 0 : index
    %c20_116 = arith.constant 20 : index
    %67 = vector.load %arg9[%c0_114, %c0_115, %c20_116] : memref<16x16x36xbf16, #tpu.memory_space<vmem>>, vector<16x16x4xbf16>
    tpu.vector_store %arg9[%c0_114, %c0_115, %c20_116], %66 {strides = array<i32>} : memref<16x16x36xbf16, #tpu.memory_space<vmem>>, vector<16x16x4xbf16>,
    %c2_117 = arith.constant 2 : index
    %c0_118 = arith.constant 0 : index
    %c0_119 = arith.constant 0 : index
    %68 = vector.load %arg8[%c2_117, %c0_118, %c0_119] : memref<18x18x4xbf16, #tpu.memory_space<vmem>>, vector<16x16x4xbf16>
    %c0_120 = arith.constant 0 : index
    %c0_121 = arith.constant 0 : index
    %c24_122 = arith.constant 24 : index
    %69 = vector.load %arg9[%c0_120, %c0_121, %c24_122] : memref<16x16x36xbf16, #tpu.memory_space<vmem>>, vector<16x16x4xbf16>
    tpu.vector_store %arg9[%c0_120, %c0_121, %c24_122], %68 {strides = array<i32>} : memref<16x16x36xbf16, #tpu.memory_space<vmem>>, vector<16x16x4xbf16>,
    %c2_123 = arith.constant 2 : index
    %c1_124 = arith.constant 1 : index
    %c0_125 = arith.constant 0 : index
    %70 = vector.load %arg8[%c2_123, %c1_124, %c0_125] : memref<18x18x4xbf16, #tpu.memory_space<vmem>>, vector<16x16x4xbf16>
    %c0_126 = arith.constant 0 : index
    %c0_127 = arith.constant 0 : index
    %c28_128 = arith.constant 28 : index
    %71 = vector.load %arg9[%c0_126, %c0_127, %c28_128] : memref<16x16x36xbf16, #tpu.memory_space<vmem>>, vector<16x16x4xbf16>
    tpu.vector_store %arg9[%c0_126, %c0_127, %c28_128], %70 {strides = array<i32>} : memref<16x16x36xbf16, #tpu.memory_space<vmem>>, vector<16x16x4xbf16>,
    %c2_129 = arith.constant 2 : index
    %c2_130 = arith.constant 2 : index
    %c0_131 = arith.constant 0 : index
    %72 = vector.load %arg8[%c2_129, %c2_130, %c0_131] : memref<18x18x4xbf16, #tpu.memory_space<vmem>>, vector<16x16x4xbf16>
    %c0_132 = arith.constant 0 : index
    %c0_133 = arith.constant 0 : index
    %c32_134 = arith.constant 32 : index
    %73 = vector.load %arg9[%c0_132, %c0_133, %c32_134] : memref<16x16x36xbf16, #tpu.memory_space<vmem>>, vector<16x16x4xbf16>
    tpu.vector_store %arg9[%c0_132, %c0_133, %c32_134], %72 {strides = array<i32>} : memref<16x16x36xbf16, #tpu.memory_space<vmem>>, vector<16x16x4xbf16>,
    %c0_135 = arith.constant 0 : index
    %c0_136 = arith.constant 0 : index
    %c0_137 = arith.constant 0 : index
    %74 = vector.load %arg9[%c0_135, %c0_136, %c0_137] : memref<16x16x36xbf16, #tpu.memory_space<vmem>>, vector<16x16x36xbf16>
    %75 = vector.shape_cast %74 : vector<16x16x36xbf16> to vector<256x36xbf16>
    %c0_138 = arith.constant 0 : index
    %c0_139 = arith.constant 0 : index
    %76 = vector.load %arg6[%c0_138, %c0_139] : memref<36x4xbf16, #tpu.memory_space<vmem>>, vector<36x4xbf16>
    %cst_140 = arith.constant dense<0.000000e+00> : vector<256x4xf32>
    %77 = tpu.matmul %75, %76, %cst_140 {dimension_numbers = #tpu.dot_dimension_numbers<[1], [0], [0], [1], [0, 0, 1, 1], [], []>} : vector<256x36xbf16>, vector<36x4xbf16>, vector<256x4xf32> -> vector<256x4xf32>
    %78 = vector.shape_cast %77 : vector<256x4xf32> to vector<16x16x4xf32>
    %79 = arith.addf %1, %78 : vector<16x16x4xf32>
    %c0_141 = arith.constant 0 : index
    %c0_142 = arith.constant 0 : index
    %c0_143 = arith.constant 0 : index
    %c0_144 = arith.constant 0 : index
    %80 = vector.load %arg7[%c0_141, %c0_142, %c0_143, %c0_144] : memref<1x16x16x4xf32, #tpu.memory_space<vmem>>, vector<1x16x16x4xf32>
    %81 = vector.shape_cast %80 : vector<1x16x16x4xf32> to vector<16x16x4xf32>
    %82 = vector.shape_cast %79 : vector<16x16x4xf32> to vector<1x16x16x4xf32>
    tpu.vector_store %arg7[%c0_141, %c0_142, %c0_143, %c0_144], %82 {strides = array<i32>} : memref<1x16x16x4xf32, #tpu.memory_space<vmem>>, vector<1x16x16x4xf32>,
    return
  }
  func.func @transform_0(%arg0: i32) -> (i32, i32, i32, i32) {
    %c0_i32 = arith.constant 0 : i32
    %c0_i32_0 = arith.constant 0 : i32
    %c0_i32_1 = arith.constant 0 : i32
    %c0_i32_2 = arith.constant 0 : i32
    return %arg0, %c0_i32, %c0_i32_0, %c0_i32_1 : i32, i32, i32, i32
  }
  func.func @transform_1(%arg0: i32) -> (i32, i32) {
    %c0_i32 = arith.constant 0 : i32
    %c0_i32_0 = arith.constant 0 : i32
    %c0_i32_1 = arith.constant 0 : i32
    return %c0_i32, %c0_i32_0 : i32, i32
  }
  func.func @transform_2(%arg0: i32) -> (i32, i32) {
    %c0_i32 = arith.constant 0 : i32
    %c0_i32_0 = arith.constant 0 : i32
    %c0_i32_1 = arith.constant 0 : i32
    return %c0_i32, %c0_i32_0 : i32, i32
  }
  func.func @transform_3(%arg0: i32) -> (i32, i32) {
    %c0_i32 = arith.constant 0 : i32
    %c0_i32_0 = arith.constant 0 : i32
    %c0_i32_1 = arith.constant 0 : i32
    return %c0_i32, %c0_i32_0 : i32, i32
  }
  func.func @transform_4(%arg0: i32) -> (i32, i32) {
    %c0_i32 = arith.constant 0 : i32
    %c0_i32_0 = arith.constant 0 : i32
    %c0_i32_1 = arith.constant 0 : i32
    return %c0_i32, %c0_i32_0 : i32, i32
  }
  func.func @transform_5(%arg0: i32) -> (i32, i32) {
    %c0_i32 = arith.constant 0 : i32
    %c0_i32_0 = arith.constant 0 : i32
    %c0_i32_1 = arith.constant 0 : i32
    return %c0_i32, %c0_i32_0 : i32, i32
  }
  func.func @transform_6(%arg0: i32) -> (i32, i32, i32, i32) {
    %c0_i32 = arith.constant 0 : i32
    %c0_i32_0 = arith.constant 0 : i32
    %c0_i32_1 = arith.constant 0 : i32
    %c0_i32_2 = arith.constant 0 : i32
    return %arg0, %c0_i32, %c0_i32_0, %c0_i32_1 : i32, i32, i32, i32
  }
}

</mosaic_0001>

<bundles_post_ra>
// kernel: tpu_custom_call.1
= control target key start
LH: loop header
LB: loop body
LE: loop exit
PB: predicated region body
PF: predicated region fallthrough
CT: control target
= control target key end

     0   :  { %s9058_s21 = smov 0   ;;  %s10803_s0 = inlined_call_operand.vmem [shape: f32[2,16,16,4], index: 0, kind: input, shape index: {}]   ;;  %s10804_s1 = inlined_call_operand.vmem [shape: f32[1,4], index: 1, kind: input, shape index: {}]   ;;  %s10805_s2 = inlined_call_operand.vmem [shape: f32[1,4], index: 2, kind: input, shape index: {}]   ;;  %s10806_s3 = inlined_call_operand.vmem [shape: bf16[36,4], index: 3, kind: input, shape index: {}]   ;;  %s10807_s4 = inlined_call_operand.vmem [shape: f32[1,4], index: 4, kind: input, shape index: {}]   ;;  %s10808_s5 = inlined_call_operand.vmem [shape: bf16[36,4], index: 5, kind: input, shape index: {}]   ;;  %s10809_s6 = inlined_call_operand.vmem [shape: f32[2,16,16,4], index: 6, kind: output, shape index: {}]  }
   0x1 LB: > { %s7686_s22 = sadd.s32 4294967295, %s9012_s21   ;;  %p7690_p0 = scmp.ge.s32.totalorder %s9012_s21, 1  ;;  %s9012_s21 = sphi %s9058_s21, %s16_s21  }
   0x2   : > { %p212_p1 = scmp.lt.s32.totalorder %s9012_s21, 3 }
   0x4   : > { %p213_p2 = pnand %p7690_p0, %p212_p1 }
   0x5   : > { %vm10815_vm0 = vcmask (!%p213_p2), 27648   ;;  %vm288_vm1 = vcmask (!%p213_p2), 24576   ;;  %vm295_vm2 = vsmask.f32 (!%p213_p2), 256  ;;  %v9014_v0 = vmov (!%p213_p2), 0   ;;  %p242_p3 = scmp.lt.s32.totalorder (!%p213_p2), %s7686_s22, 1 }
   0x6   : > { %216 = sbr.rel (%p213_p2) target bundleno = 1107 (0x453), region = 44  ;;  %286 = vst.msk [vmem:[#allocation2] sm:$0xf] (!%p213_p2), %vm10815_vm0, %v9014_v0  ;;  %287 = vst.msk [vmem:[#allocation2 + $0x4] sm:$0xf] (!%p213_p2), %vm10815_vm0, %v9014_v0  ;;  %vm1869_vm6 = vcmask (!%p213_p2), 1046528  }
   0x7   : > { %289 = vst.msk [vmem:[#allocation2 + $0x8] sm:$0x1] (!%p213_p2), %vm288_vm1, %v9014_v0  ;;  %293 = vst.msk [vmem:[#allocation2 + $0xd4] sm:$0x1] (!%p213_p2), %vm288_vm1, %v9014_v0  ;;  %vm351_vm4 = vsmask.f32 (!%p213_p2), 7938 }
   0x8   : > { %291 = vst.msk [vmem:[#allocation2 + $0xcc] sm:$0xf] (!%p213_p2), %vm10815_vm0, %v9014_v0  ;;  %292 = vst.msk [vmem:[#allocation2 + $0xd0] sm:$0xf] (!%p213_p2), %vm10815_vm0, %v9014_v0  ;;  %v303_v2 = vld [vmem:[#allocation2 + $0x18] sm:$0x1] (!%p213_p2) }
   0x9   : > { %vm9074_vm3 = vmand (!%p213_p2), %vm288_vm1, %vm295_vm2  ;;  %v300_v4 = vld [vmem:[#allocation2 + $0xc] sm:$0x1] (!%p213_p2)  ;;  %v306_v5 = vld [vmem:[#allocation2 + $0x24] sm:$0x1] (!%p213_p2)  ;;  %vm677_vm7 = vsmask.f32 (!%p213_p2), 4368 }
   0xa   : > { %v304_v3 = vsel (!%p213_p2), %vm9074_vm3, 0, %v303_v2  ;;  %vm9084_vm5 = vmand (!%p213_p2), %vm288_vm1, %vm351_vm4  ;;  %v9091_v7 = vld [vmem:[%s10804_s1] ss:$0 sm:$0xff] (!%p213_p2)  ;;  %v301_v8 = vsel (!%p213_p2), %vm9074_vm3, 0, %v300_v4  ;;  %v307_v9 = vsel (!%p213_p2), %vm9074_vm3, 0, %v306_v5  ;;  %s9015_s7 = smov (!%p213_p2), 8  }
   0xb   : > { %305 = vst [vmem:[#allocation2 + $0x18] sm:$0x1] (!%p213_p2), %v304_v3  ;;  %v309_v10 = vld [vmem:[#allocation2 + $0x30] sm:$0x1] (!%p213_p2)  ;;  %v356_v11 = vld [vmem:[#allocation2 + $0x14] sm:$0x1] (!%p213_p2)  ;;  %vm9158_vm15 = vmand (!%p213_p2), %vm10815_vm0, %vm351_vm4 }
   0xc   : > { %302 = vst [vmem:[#allocation2 + $0xc] sm:$0x1] (!%p213_p2), %v301_v8  ;;  %308 = vst [vmem:[#allocation2 + $0x24] sm:$0x1] (!%p213_p2), %v307_v9  ;;  %v310_v12 = vsel (!%p213_p2), %vm9074_vm3, 0, %v309_v10  ;;  %v357_v13 = vsel (!%p213_p2), %vm9084_vm5, 0, %v356_v11 }
   0xd   : > { %s10991_s22 = smov (!%p242_p3, %s7686_s22), 1  ;;  %v359_v14 = vld [vmem:[#allocation2 + $0x20] sm:$0x1]  ;;  %311 = vst [vmem:[#allocation2 + $0x30] sm:$0x1] %v310_v12  ;;  %vm9165_vm1 = vmor %vm295_vm2, %vm677_vm7  ;;  %s9016_s8 = smov 4  }
   0xe   : > { %s8282_s25 = sshll.u32 %s10991_s22, 8  ;;  %v9112_v15 = vld [vmem:[%s10805_s2] ss:$0 sm:$0xff]  ;;  %358 = vst [vmem:[#allocation2 + $0x14] sm:$0x1] %v357_v13  ;;  %v360_v16 = vsel %vm9084_vm5, 0, %v359_v14 }
   0xf   : > { %s9107_s28 = scalar_lea.vmem %s10803_s0, %s8282_s25  ;;  %v362_v17 = vld [vmem:[#allocation2 + $0x2c] sm:$0x1]  ;;  %v365_v18 = vld [vmem:[#allocation2 + $0x38] sm:$0x1]  ;;  %v353_v19 = vld [vmem:[#allocation2 + $0x8] sm:$0x1] }
  0x10   : > { %361 = vst [vmem:[#allocation2 + $0x20] sm:$0x1] %v360_v16  ;;  %v354_v20 = vsel %vm9084_vm5, 0, %v353_v19  ;;  %v9118_v21 = vld [vmem:[#allocation2] sm:$0xfe]   ;;  %v255_v23 = vld [vmem:[%s9107_s28 + $0x10] sm:$0xff] }
  0x11   : > { %v297_v22 = vld [vmem:[#allocation2] sm:$0x1]  ;;  %355 = vst [vmem:[#allocation2 + $0x8] sm:$0x1] %v354_v20  ;;  %v256_v25 = vld [vmem:[%s9107_s28 + $0x18] sm:$0xff]  ;;  %v416_v26 = vmul.f32 %v9091_v7, %v255_v23  ;;  %v363_v28 = vsel %vm9084_vm5, 0, %v362_v17 }
  0x12   : > { %v298_v24 = vsel %vm9074_vm3, 0, %v297_v22  ;;  %v253_v27 = vld [vmem:[%s9107_s28] sm:$0xff]  ;;  %v1870_v29 = vrot.slane %v9118_v21, 1  ;;  %v417_v30 = vmul.f32 %v9091_v7, %v256_v25  ;;  %v254_v31 = vld [vmem:[%s9107_s28 + $0x8] sm:$0xff]  ;;  %364 = vst [vmem:[#allocation2 + $0x2c] sm:$0x1] %v363_v28 }
  0x13   : > { %299 = vst [vmem:[#allocation2] sm:$0x1] %v298_v24  ;;  %v414_v32 = vmul.f32 %v9091_v7, %v253_v27  ;;  %v257_v33 = vld [vmem:[%s9107_s28 + $0x20] sm:$0xff]  ;;  %v455_v34 = vadd.f32 %v9112_v15, %v416_v26  ;;  %v415_v35 = vmul.f32 %v9091_v7, %v254_v31  ;;  %v258_v36 = vld [vmem:[%s9107_s28 + $0x28] sm:$0xff]  ;;  %v259_v38 = vld [vmem:[%s9107_s28 + $0x30] sm:$0xff]  ;;  %v366_v39 = vsel %vm9084_vm5, 0, %v365_v18 }
  0x14   : > { %v418_v37 = vmul.f32 %v9091_v7, %v257_v33  ;;  %v456_v40 = vadd.f32 %v9112_v15, %v417_v30  ;;  %v419_v42 = vmul.f32 %v9091_v7, %v258_v36  ;;  %v9144_v43 = vmul.f32 %v9091_v7, %v259_v38  ;;  %367 = vst [vmem:[#allocation2 + $0x38] sm:$0x1] %v366_v39  ;;  %v1009_v16 = vld [vmem:[#allocation2 + $0x18] sm:$0xf]  ;;  %v1002_v28 = vld [vmem:[#allocation2 + $0xc] sm:$0xf] }
  0x15   : > { %v453_v41 = vadd.f32 %v9112_v15, %v414_v32  ;;  %vm487_vm8 = vcmp.gt.f32.partialorder %v455_v34, 0.0  ;;  %v519_v44 = vmul.f32 0.01, %v455_v34  ;;  %v454_v45 = vadd.f32 %v9112_v15, %v415_v35  ;;  %s9017_s9 = smov 12   ;;  %s9018_s10 = smov 24  }
  0x16   : > { %v9148_v46 = vadd.f32 %v9112_v15, %v418_v37  ;;  %vm1435_vm9 = vsmask.f32 7424  ;;  %vm488_vm10 = vcmp.gt.f32.partialorder %v456_v40, 0.0  ;;  %v520_v47 = vmul.f32 0.01, %v456_v40  ;;  %s9019_s11 = smov 20  }
  0x17   : > { %vm485_vm11 = vcmp.gt.f32.partialorder %v453_v41, 0.0  ;;  %v517_v48 = vmul.f32 0.01, %v453_v41  ;;  %v551_v49 = vsel %vm487_vm8, %v455_v34, %v519_v44  ;;  %vm486_vm12 = vcmp.gt.f32.partialorder %v454_v45, 0.0  ;;  %v1006_v34 = vld [vmem:[#allocation2 + $0x14] sm:$0x1] }
  0x18   : > { %v518_v50 = vmul.f32 0.01, %v454_v45  ;;  %v9151_v51 = vadd.f32 %v9112_v15, %v419_v42  ;;  %v8482_v52 = vld [vmem:[#allocation2 + $0x8] ss:$0 sps:$4 sm:$0x11]   ;;  %v552_v53 = vsel %vm488_vm10, %v456_v40, %v520_v47  ;;  %v8286_v54 = vpack.c.bf16 %v551_v49, %v551_v49  ;;  %s9020_s12 = smov 32  }
  0x19   : > { %v549_v55 = vsel %vm485_vm11, %v453_v41, %v517_v48  ;;  %vm489_vm13 = vcmp.gt.f32.partialorder %v9148_v46, 0.0  ;;  %v8287_v57 = vpack.c.bf16 %v552_v53, %v552_v53  ;;  %v1871_v60 = vrot.slane %v8482_v52, 1  ;;  %v8484_v61 = vld [vmem:[#allocation2 + $0x8] ss:$0 sps:$4 sm:$0x11]   ;;  %s9021_s13 = smov 16  }
  0x1a   : > { %v8483_v56 = vld [vmem:[#allocation2] sm:$0xff]   ;;  %v550_v58 = vsel %vm486_vm12, %v454_v45, %v518_v50  ;;  %v8284_v59 = vpack.c.bf16 %v549_v55, %v549_v55  ;;  %vm490_vm14 = vcmp.gt.f32.partialorder %v9151_v51, 0.0  ;;  %v697_v62 = vshrl.u32 %v8286_v54, 16  ;;  %v312_v45 = vld [vmem:[#allocation2 + $0x3c] sm:$0x1]  ;;  %s9022_s14 = smov 28  }
  0x1b   : > { %v700_v63 = vshll.u32 %v8286_v54, 16  ;;  %v8285_v0 = vpack.c.bf16 %v550_v58, %v550_v58  ;;  %v1437_v2 = vshrl.u32 %v8483_v56, 16  ;;  %v1439_v3 = vshll.u32 %v8483_v56, 16  ;;  %v1013_v35 = vld [vmem:[#allocation2 + $0x20] sm:$0x1] }
  0x1c   : > { %v705_v4 = vshrl.u32 %v8287_v57, 16  ;;  %v708_v5 = vshll.u32 %v8287_v57, 16  ;;  %v1872_v8 = vsel %vm1869_vm6, %v1870_v29, %v1871_v60  ;;  %v1444_v9 = vshll.u32 %v8484_v61, 16  ;;  %v260_v29 = vld [vmem:[%s9107_s28 + $0x38] sm:$0xff]  ;;  %v1016_v61 = vld [vmem:[#allocation2 + $0x24] sm:$0xf] }
  0x1d   : > { %v699_v10 = vrot.slane %v697_v62, 7  ;;  %v680_v11 = vshrl.u32 %v8284_v59, 16  ;;  %1918 = vrot.lane.b32.xlu1 %v1872_v8, %s9015_s7  ;;  %v1441_v13 = vrot.slane %v1439_v3, 1  ;;  %v683_v17 = vshll.u32 %v8284_v59, 16  ;;  %v1020_v3 = vld [vmem:[#allocation2 + $0x2c] sm:$0x1] }
  0x1e   : > { %v707_v14 = vrot.slane %v705_v4, 7  ;;  %v688_v18 = vshrl.u32 %v8285_v0, 16  ;;  %v1446_v19 = vrot.slane %v1444_v9, 1  ;;  %v691_v33 = vshll.u32 %v8285_v0, 16 }
  0x1f   : > { %v702_v21 = vor.u32 %v700_v63, %v699_v10  ;;  %v703_v22 = vrot.slane %v699_v10, 4  ;;  %v682_v23 = vrot.slane %v680_v11, 7  ;;  %v1442_v24 = vor.u32 %v1441_v13, %v1437_v2 }
  0x20   : > { %v710_v25 = vor.u32 %v708_v5, %v707_v14  ;;  %v712_v26 = vrot.slane %v707_v14, 4  ;;  %v690_v27 = vrot.slane %v688_v18, 7  ;;  %v521_v39 = vmul.f32 0.01, %v9148_v46 }
  0x21   : > { %v1010_v30 = vsel %vm9158_vm15, %v702_v21, %v1009_v16  ;;  %v685_v31 = vor.u32 %v683_v17, %v682_v23  ;;  %v686_v32 = vrot.slane %v682_v23, 4  ;;  %v1447_v36 = vsel %vm1435_vm9, %v1442_v24, %v1446_v19  ;;  %v1023_v19 = vld [vmem:[#allocation2 + $0x30] sm:$0xf] }
  0x22   : > { %v711_v37 = vsel %vm9165_vm1, %v703_v22, %v710_v25  ;;  %1011 = vst [vmem:[#allocation2 + $0x18] sm:$0xf] %v1010_v30  ;;  %v695_v38 = vrot.slane %v690_v27, 4  ;;  %1628 = vrot.lane.b32.xlu0 %v1447_v36, %s9016_s8  ;;  %v693_v40 = vor.u32 %v691_v33, %v690_v27  ;;  %v522_v42 = vmul.f32 0.01, %v9151_v51 }
  0x23   : > { %1012 = vst.msk [vmem:[#allocation2 + $0x1c] sm:$0xf] %vm10815_vm0, %v711_v37  ;;  %v1003_v41 = vsel %vm9158_vm15, %v685_v31, %v1002_v28  ;;  %v421_v44 = vmul.f32 %v9091_v7, %v260_v29  ;;  %v553_v47 = vsel %vm489_vm13, %v9148_v46, %v521_v39  ;;  %v459_v48 = vadd.f32 %v9112_v15, %v9144_v43 }
  0x24   : > { %1004 = vst [vmem:[#allocation2 + $0xc] sm:$0xf] %v1003_v41  ;;  %v1007_v49 = vsel %vm9074_vm3, %v695_v38, %v1006_v34  ;;  %v1014_v50 = vsel %vm9074_vm3, %v712_v26, %v1013_v35  ;;  %v694_v52 = vsel %vm9165_vm1, %v686_v32, %v693_v40  ;;  %v554_v53 = vsel %vm490_vm14, %v9151_v51, %v522_v42  ;;  %v1027_v26 = vld [vmem:[#allocation2 + $0x38] sm:$0x1] }
  0x25   : > { %v8288_v54 = vpack.c.bf16 %v553_v47, %v553_v47  ;;  %v460_v55 = vadd.f32 %v9112_v15, %v421_v44  ;;  %1008 = vst [vmem:[#allocation2 + $0x14] sm:$0x1] %v1007_v49  ;;  %1015 = vst [vmem:[#allocation2 + $0x20] sm:$0x1] %v1014_v50  ;;  %v8289_v43 = vpack.c.bf16 %v554_v53, %v554_v53  ;;  %vm491_vm2 = vcmp.gt.f32.partialorder %v459_v48, 0.0 }
  0x26   : > { %1005 = vst.msk [vmem:[#allocation2 + $0x10] sm:$0xf] %vm10815_vm0, %v694_v52  ;;  %v523_v46 = vmul.f32 0.01, %v459_v48  ;;  %v313_v56 = vsel %vm9074_vm3, 0, %v312_v45 }
  0x27   : > { %v714_v57 = vshrl.u32 %v8288_v54, 16  ;;  %v717_v58 = vshll.u32 %v8288_v54, 16  ;;  %vm492_vm4 = vcmp.gt.f32.partialorder %v460_v55, 0.0  ;;  %v524_v59 = vmul.f32 0.01, %v460_v55 }
  0x28   : > { %314 = vst [vmem:[#allocation2 + $0x3c] sm:$0x1] %v313_v56  ;;  %v722_v60 = vshrl.u32 %v8289_v43, 16  ;;  %v725_v51 = vshll.u32 %v8289_v43, 16  ;;  %v555_v62 = vsel %vm491_vm2, %v459_v48, %v523_v46 }
  0x29   : > { %v716_v63 = vrot.slane %v714_v57, 7  ;;  %v556_v0 = vsel %vm492_vm4, %v460_v55, %v524_v59  ;;  %v8290_v2 = vpack.c.bf16 %v555_v62, %v555_v62  ;;  %vm10814_vm4 = vcmask 31744  }
  0x2a   : > { %v8485_v4 = vld [vmem:[#allocation2 + $0x18] sm:$0xff]   ;;  %v724_v5 = vrot.slane %v722_v60, 7  ;;  %v8291_v8 = vpack.c.bf16 %v556_v0, %v556_v0 }
  0x2b   : > { %v719_v9 = vor.u32 %v717_v58, %v716_v63  ;;  %v720_v10 = vrot.slane %v716_v63, 4  ;;  %v731_v11 = vshrl.u32 %v8290_v2, 16  ;;  %v734_v13 = vshll.u32 %v8290_v2, 16  ;;  %2097 = vrot.lane.b32.xlu1 %v8485_v4, %s9017_s9  ;;  %v9201_v21 = vld [vmem:[#allocation2 + $0x18] sm:$0xff]  }
  0x2c   : > { %v727_v14 = vor.u32 %v725_v51, %v724_v5  ;;  %v729_v16 = vrot.slane %v724_v5, 4  ;;  %v739_v17 = vshrl.u32 %v8291_v8, 16  ;;  %v742_v18 = vshll.u32 %v8291_v8, 16  ;;  %v8488_v24 = vld [vmem:[#allocation2 + $0x18] sm:$0xff]  }
  0x2d   : > { %v8486_v22 = vld [vmem:[#allocation2 + $0xc] sm:$0xff]   ;;  %v1017_v23 = vsel %vm9158_vm15, %v719_v9, %v1016_v61  ;;  %v733_v25 = vrot.slane %v731_v11, 7  ;;  %v2349_v31 = vshrl.u32 %v9201_v21, 16  ;;  %v8492_v34 = vld [vmem:[#allocation2 + $0x14] ss:$0 sps:$4 sm:$0x11]  }
  0x2e   : > { %v728_v27 = vsel %vm9165_vm1, %v720_v10, %v727_v14  ;;  %1018 = vst [vmem:[#allocation2 + $0x24] sm:$0xf] %v1017_v23  ;;  %v741_v28 = vrot.slane %v739_v17, 7  ;;  %v8491_v29 = vld [vmem:[#allocation2 + $0xc] sm:$0xfe]   ;;  %v1021_v30 = vsel %vm9074_vm3, %v729_v16, %v1020_v3  ;;  %2095 = vrot.lane.b32.xlu0 %v8486_v22, %s9017_s9  ;;  %v2770_v39 = vrot.slane %v8492_v34, 1 }
  0x2f   : > { %1019 = vst.msk [vmem:[#allocation2 + $0x28] sm:$0xf] %vm10815_vm0, %v728_v27  ;;  %v736_v32 = vor.u32 %v734_v13, %v733_v25  ;;  %v737_v33 = vrot.slane %v733_v25, 4  ;;  %1022 = vst [vmem:[#allocation2 + $0x2c] sm:$0x1] %v1021_v30  ;;  %v2769_v37 = vrot.slane %v8491_v29, 1 }
  0x30   : > { %v744_v35 = vor.u32 %v742_v18, %v741_v28  ;;  %v746_v36 = vrot.slane %v741_v28, 4  ;;  %v8493_v40 = vld [vmem:[#allocation2 + $0xc] sm:$0xfe]   ;;  %v8494_v41 = vld [vmem:[#allocation2 + $0x14] ss:$0 sps:$4 sm:$0x11]  }
  0x31   : > { %v1024_v38 = vsel %vm9158_vm15, %v736_v32, %v1023_v19  ;;  %v1873_v45 = vrot.slane %v8493_v40, 1  ;;  %v1874_v47 = vrot.slane %v8494_v41, 1  ;;  %v8495_v48 = vld [vmem:[#allocation2 + $0x18] sm:$0xfe]   ;;  %v2351_v50 = vshll.u32 %v9201_v21, 16  ;;  %v8509_v53 = vld [vmem:[#allocation2 + $0xc] sm:$0xff]  }
  0x32   : > { %v745_v42 = vsel %vm9165_vm1, %v737_v33, %v744_v35  ;;  %1025 = vst [vmem:[#allocation2 + $0x30] sm:$0xf] %v1024_v38  ;;  %v1028_v44 = vsel %vm9074_vm3, %v746_v36, %v1027_v26  ;;  %2995 = vrot.lane.b32.xlu0 %v8488_v24, %s9018_s10  ;;  %v8496_v49 = vld [vmem:[#allocation2 + $0x20] ss:$0 sps:$4 sm:$0x11]   ;;  %v3669_v52 = vrot.slane %v8495_v48, 1  ;;  %v2771_v61 = vsel %vm1869_vm6, %v2769_v37, %v2770_v39 }
  0x33   : > { %1026 = vst.msk [vmem:[#allocation2 + $0x34] sm:$0xf] %vm10815_vm0, %v745_v42  ;;  %1029 = vst [vmem:[#allocation2 + $0x38] sm:$0x1] %v1028_v44  ;;  %v3670_v55 = vrot.slane %v8496_v49, 1  ;;  %v2353_v56 = vrot.slane %v2351_v50, 1  ;;  %v1875_v3 = vsel %vm1869_vm6, %v1873_v45, %v1874_v47 }
  0x34   : > { %v8497_v46 = vld [vmem:[#allocation2 + $0x18] sm:$0xfe]   ;;  %v8498_v57 = vld [vmem:[#allocation2 + $0x20] ss:$0 sps:$4 sm:$0x11]   ;;  %v1449_v60 = vshrl.u32 %v8509_v53, 16 }
  0x35   : > { %v2772_v59 = vrot.slane %v8497_v46, 1  ;;  %v2773_v62 = vrot.slane %v8498_v57, 1  ;;  %v3671_v9 = vsel %vm1869_vm6, %v3669_v52, %v3670_v55  ;;  %v8503_v14 = vld [vmem:[#allocation2 + $0x18] sm:$0xfe]   ;;  %v1451_v16 = vshll.u32 %v8509_v53, 16  ;;  %v8513_v47 = vld [vmem:[#allocation2 + $0xc] sm:$0xff]  }
  0x36   : > { %v8487_v54 = vld [vmem:[#allocation2 + $0x24] sm:$0xff]   ;;  %v8500_v0 = vld [vmem:[#allocation2 + $0x2c] ss:$0 sps:$4 sm:$0x11]   ;;  %v1876_v22 = vrot.slane %v8503_v14, 1  ;;  %v2354_v30 = vor.u32 %v2353_v56, %v2349_v31  ;;  %v8511_v39 = vld [vmem:[#allocation2 + $0x18] sm:$0xff]  }
  0x37   : > { %v8490_v43 = vld [vmem:[#allocation2 + $0x24] sm:$0xff]   ;;  %2997 = vrot.lane.b32.xlu1 %v8487_v54, %s9018_s10  ;;  %v3673_v5 = vrot.slane %v8500_v0, 1  ;;  %v8502_v10 = vld [vmem:[#allocation2 + $0x2c] ss:$0 sps:$4 sm:$0x11]   ;;  %v2774_v19 = vsel %vm1869_vm6, %v2772_v59, %v2773_v62  ;;  %v1453_v33 = vrot.slane %v1451_v16, 1 }
  0x38   : > { %v8507_v58 = vld [vmem:[#allocation2 + $0x24] sm:$0xff]   ;;  %2099 = vrot.lane.b32.xlu0 %v8490_v43, %s9017_s9  ;;  %v1880_v17 = vrot.slane %v8502_v10, 1  ;;  %v8504_v18 = vld [vmem:[#allocation2 + $0x20] ss:$0 sps:$4 sm:$0x11]   ;;  %v1461_v44 = vshrl.u32 %v8511_v39, 16 }
  0x39   : > { %v8499_v63 = vld [vmem:[#allocation2 + $0x24] sm:$0xfe]   ;;  %v3249_v2 = vshrl.u32 %v8507_v58, 16  ;;  %v3251_v11 = vshll.u32 %v8507_v58, 16  ;;  %v1877_v25 = vrot.slane %v8504_v18, 1  ;;  %v1454_v37 = vor.u32 %v1453_v33, %v1449_v60 }
  0x3a   : > { %v8489_v51 = vld [vmem:[#allocation2 + $0x30] sm:$0xff]   ;;  %v3672_v4 = vrot.slane %v8499_v63, 1  ;;  %v8501_v8 = vld [vmem:[#allocation2 + $0x24] sm:$0xfe]   ;;  %v1463_v45 = vshll.u32 %v8511_v39, 16  ;;  %v2337_v53 = vshrl.u32 %v8513_v47, 16 }
  0x3b   : > { %2101 = vrot.lane.b32.xlu1 %v8489_v51, %s9017_s9  ;;  %v1879_v13 = vrot.slane %v8501_v8, 1  ;;  %v3253_v23 = vrot.slane %v3251_v11, 1  ;;  %v8506_v26 = vld [vmem:[#allocation2 + $0x20] ss:$0 sps:$4 sm:$0x11]   ;;  %v1878_v34 = vsel %vm1869_vm6, %v1876_v22, %v1877_v25  ;;  %v2339_v54 = vshll.u32 %v8513_v47, 16 }
  0x3c   : > { %2817 = vrot.lane.b32.xlu0 %v2771_v61, %s9019_s11  ;;  %v3674_v24 = vsel %vm1869_vm6, %v3672_v4, %v3673_v5  ;;  %v2356_v27 = vshll.u32 %v8506_v26, 16  ;;  %v8508_v28 = vld [vmem:[#allocation2 + $0x2c] ss:$0 sps:$4 sm:$0x11]   ;;  %v1465_v52 = vrot.slane %v1463_v45, 1  ;;  %v8515_v55 = vld [vmem:[#allocation2 + $0x24] sm:$0xff]  }
  0x3d   : > { %v1881_v29 = vsel %vm1869_vm6, %v1879_v13, %v1880_v17  ;;  %v8510_v32 = vld [vmem:[#allocation2 + $0x14] ss:$0 sps:$4 sm:$0x11]   ;;  %v3256_v36 = vshll.u32 %v8508_v28, 16  ;;  %v3254_v40 = vor.u32 %v3253_v23, %v3249_v2  ;;  %v261_v43 = vld [vmem:[%s9107_s28 + $0x40] sm:$0xff]  ;;  %v2341_v59 = vrot.slane %v2339_v54, 1 }
  0x3e   : > { %v2358_v35 = vrot.slane %v2356_v27, 1  ;;  %v1456_v38 = vshll.u32 %v8510_v32, 16  ;;  %v8512_v42 = vld [vmem:[#allocation2 + $0x20] ss:$0 sps:$4 sm:$0x11]   ;;  %v1466_v58 = vor.u32 %v1465_v52, %v1461_v44  ;;  %v1473_v51 = vshrl.u32 %v8515_v55, 16 }
  0x3f   : > { %1920 = vrot.lane.b32.xlu1 %v1875_v3, %s9015_s7  ;;  %v3258_v41 = vrot.slane %v3256_v36, 1  ;;  %v1468_v48 = vshll.u32 %v8512_v42, 16  ;;  %v8514_v49 = vld [vmem:[#allocation2 + $0x14] ss:$0 sps:$4 sm:$0x11]   ;;  %v1475_v61 = vshll.u32 %v8515_v55, 16  ;;  %v2342_v2 = vor.u32 %v2341_v59, %v2337_v53 }
  0x40   : > { %3717 = vrot.lane.b32.xlu0 %v3671_v9, %s9020_s12  ;;  %v2359_v21 = vsel %vm1435_vm9, %v2354_v30, %v2358_v35  ;;  %v1458_v31 = vrot.slane %v1456_v38, 1  ;;  %v2344_v57 = vshll.u32 %v8514_v49, 16  ;;  %v8516_v60 = vld [vmem:[#allocation2 + $0x2c] ss:$0 sps:$4 sm:$0x11]   ;;  %v8517_v63 = vld [vmem:[#allocation2 + $0x18] sm:$0xff]   ;;  %v422_v13 = vmul.f32 %v9091_v7, %v261_v43 }
  0x41   : > { %v3259_v46 = vsel %vm1435_vm9, %v3254_v40, %v3258_v41  ;;  %v1470_v56 = vrot.slane %v1468_v48, 1  ;;  %v262_v0 = vld [vmem:[%s9107_s28 + $0x48] sm:$0xff]  ;;  %v1477_v3 = vrot.slane %v1475_v61, 1  ;;  %v1480_v4 = vshll.u32 %v8516_v60, 16  ;;  %v8521_v26 = vld [vmem:[#allocation2 + $0x30] sm:$0xff]  }
  0x42   : > { %v1459_v50 = vsel %vm1435_vm9, %v1454_v37, %v1458_v31  ;;  %v2346_v62 = vrot.slane %v2344_v57, 1  ;;  %v8518_v5 = vld [vmem:[#allocation2 + $0x20] ss:$0 sps:$4 sm:$0x11]   ;;  %v8519_v8 = vld [vmem:[#allocation2 + $0x24] sm:$0xff]   ;;  %v3237_v10 = vshrl.u32 %v8517_v63, 16  ;;  %v423_v27 = vmul.f32 %v9091_v7, %v262_v0 }
  0x43   : > { %2819 = vrot.lane.b32.xlu1 %v2774_v19, %s9019_s11  ;;  %v1471_v9 = vsel %vm1435_vm9, %v1466_v58, %v1470_v56  ;;  %v3239_v11 = vshll.u32 %v8517_v63, 16  ;;  %v1478_v16 = vor.u32 %v1477_v3, %v1473_v51  ;;  %v1482_v17 = vrot.slane %v1480_v4, 1  ;;  %v8520_v22 = vld [vmem:[#allocation2 + $0x2c] ss:$0 sps:$4 sm:$0x11]   ;;  %v263_v54 = vld [vmem:[%s9107_s28 + $0x50] sm:$0xff] }
  0x44   : > { %3719 = vrot.lane.b32.xlu0 %v3674_v24, %s9020_s12  ;;  %v2347_v14 = vsel %vm1435_vm9, %v2342_v2, %v2346_v62  ;;  %v3244_v18 = vshll.u32 %v8518_v5, 16  ;;  %v2361_v23 = vshrl.u32 %v8519_v8, 16  ;;  %v2363_v24 = vshll.u32 %v8519_v8, 16  ;;  %v8522_v32 = vld [vmem:[#allocation2 + $0x38] ss:$0 sps:$4 sm:$0x11]  }
  0x45   : > { %v3241_v19 = vrot.slane %v3239_v11, 1  ;;  %v2368_v30 = vshll.u32 %v8520_v22, 16  ;;  %v1483_v33 = vsel %vm1435_vm9, %v1478_v16, %v1482_v17  ;;  %v2375_v35 = vshll.u32 %v8521_v26, 16  ;;  %v8523_v41 = vld [vmem:[#allocation2 + $0x24] sm:$0xfe]   ;;  %v264_v56 = vld [vmem:[%s9107_s28 + $0x58] sm:$0xff] }
  0x46   : > { %v3246_v25 = vrot.slane %v3244_v18, 1  ;;  %v461_v36 = vadd.f32 %v9112_v15, %v422_v13  ;;  %v2380_v40 = vshll.u32 %v8522_v32, 16  ;;  %v462_v31 = vadd.f32 %v9112_v15, %v423_v27  ;;  %v8526_v52 = vld [vmem:[#allocation2 + $0x38] ss:$0 sps:$4 sm:$0x11]   ;;  %v8529_v51 = vld [vmem:[#allocation2 + $0x30] sm:$0xff]  }
  0x47   : > { %1924 = vrot.lane.b32.xlu1 %v1881_v29, %s9015_s7  ;;  %v3242_v28 = vor.u32 %v3241_v19, %v3237_v10  ;;  %v2365_v29 = vrot.slane %v2363_v24, 1  ;;  %v2370_v39 = vrot.slane %v2368_v30, 1  ;;  %v2377_v42 = vrot.slane %v2375_v35, 1  ;;  %v368_v53 = vld [vmem:[#allocation2 + $0x44] sm:$0x1]  ;;  %v8527_v63 = vld [vmem:[#allocation2 + $0x30] sm:$0xff]  }
  0x48   : > { %1922 = vrot.lane.b32.xlu0 %v1878_v34, %s9015_s7  ;;  %v2373_v34 = vshrl.u32 %v8521_v26, 16  ;;  %v2382_v45 = vrot.slane %v2380_v40, 1  ;;  %v2775_v47 = vrot.slane %v8523_v41, 1  ;;  %vm493_vm7 = vcmp.gt.f32.partialorder %v461_v36, 0.0  ;;  %v8533_v11 = vld [vmem:[#allocation2 + $0x30] sm:$0xfe]  }
  0x49   : > { %v3247_v37 = vsel %vm1435_vm9, %v3242_v28, %v3246_v25  ;;  %v2366_v38 = vor.u32 %v2365_v29, %v2361_v23  ;;  %vm494_vm8 = vcmp.gt.f32.partialorder %v462_v31, 0.0  ;;  %v525_v58 = vmul.f32 0.01, %v461_v36  ;;  %v8530_v61 = vld [vmem:[#allocation2 + $0x38] ss:$0 sps:$4 sm:$0x11]  }
  0x4a   : > { %v2378_v48 = vor.u32 %v2377_v42, %v2373_v34  ;;  %v526_v59 = vmul.f32 0.01, %v462_v31  ;;  %v424_v62 = vmul.f32 %v9091_v7, %v263_v54  ;;  %v369_v3 = vsel %vm9084_vm5, 0, %v368_v53  ;;  %v315_v13 = vld [vmem:[#allocation2 + $0x48] sm:$0x1]  ;;  %v9276_v27 = vld [vmem:[#allocation2 + $0x30] sm:$0xff]  }
  0x4b   : > { %2530 = vrot.lane.b32.xlu1 %v2359_v21, %s9021_s13  ;;  %v8524_v21 = vld [vmem:[#allocation2 + $0x2c] ss:$0 sps:$4 sm:$0x11]   ;;  %v2371_v44 = vsel %vm1435_vm9, %v2366_v38, %v2370_v39  ;;  %v557_v0 = vsel %vm493_vm7, %v461_v36, %v525_v58  ;;  %v425_v4 = vmul.f32 %v9091_v7, %v264_v56  ;;  %v3263_v10 = vshll.u32 %v8529_v51, 16  ;;  %370 = vst [vmem:[#allocation2 + $0x44] sm:$0x1] %v369_v3 }
  0x4c   : > { %1630 = vrot.lane.b32.xlu0 %v1459_v50, %s9016_s8  ;;  %v2776_v49 = vrot.slane %v8524_v21, 1  ;;  %v8525_v50 = vld [vmem:[#allocation2 + $0x30] sm:$0xfe]   ;;  %v2383_v55 = vsel %vm1435_vm9, %v2378_v48, %v2382_v45  ;;  %v558_v2 = vsel %vm494_vm8, %v462_v31, %v526_v59  ;;  %v8292_v5 = vpack.c.bf16 %v557_v0, %v557_v0  ;;  %v8534_v17 = vld [vmem:[#allocation2 + $0x38] ss:$0 sps:$4 sm:$0x11]  }
  0x4d   : > { %v2778_v43 = vrot.slane %v8525_v50, 1  ;;  %v8293_v8 = vpack.c.bf16 %v558_v2, %v558_v2  ;;  %v3268_v16 = vshll.u32 %v8530_v61, 16  ;;  %v1030_v24 = vld [vmem:[#allocation2 + $0x3c] sm:$0xf]  ;;  %v3265_v25 = vrot.slane %v3263_v10, 1  ;;  %v266_v29 = vld [vmem:[%s9107_s28 + $0x68] sm:$0xff] }
  0x4e   : > { %v2777_v57 = vsel %vm1869_vm6, %v2775_v47, %v2776_v49  ;;  %v748_v18 = vshrl.u32 %v8292_v5, 16  ;;  %v751_v19 = vshll.u32 %v8292_v5, 16  ;;  %v463_v28 = vadd.f32 %v9112_v15, %v424_v62  ;;  %v8536_v34 = vld [vmem:[#allocation2 + $0x38] ss:$0 sps:$4 sm:$0x11]  }
  0x4f   : > { %3430 = vrot.lane.b32.xlu1 %v3259_v46, %s9022_s14  ;;  %v2779_v46 = vrot.slane %v8526_v52, 1  ;;  %v756_v22 = vshrl.u32 %v8293_v8, 16  ;;  %v759_v23 = vshll.u32 %v8293_v8, 16  ;;  %v3270_v26 = vrot.slane %v3268_v16, 1  ;;  %v371_v31 = vld [vmem:[#allocation2 + $0x50] sm:$0x1] }
  0x50   : > { %2528 = vrot.lane.b32.xlu0 %v2347_v14, %s9021_s13  ;;  %v265_v14 = vld [vmem:[%s9107_s28 + $0x60] sm:$0xff]  ;;  %v750_v30 = vrot.slane %v748_v18, 7  ;;  %v464_v35 = vadd.f32 %v9112_v15, %v425_v4  ;;  %v316_v38 = vsel %vm9074_vm3, 0, %v315_v13  ;;  %v1487_v47 = vshll.u32 %v9276_v27, 16  ;;  %v318_v49 = vld [vmem:[#allocation2 + $0x54] sm:$0x1] }
  0x51   : > { %v2780_v60 = vsel %vm1869_vm6, %v2778_v43, %v2779_v46  ;;  %v758_v32 = vrot.slane %v756_v22, 7  ;;  %v426_v39 = vmul.f32 %v9091_v7, %v265_v14  ;;  %317 = vst [vmem:[#allocation2 + $0x48] sm:$0x1] %v316_v38  ;;  %v1492_v48 = vshll.u32 %v8536_v34, 16  ;;  %v374_v43 = vld [vmem:[#allocation2 + $0x5c] sm:$0x1] }
  0x52   : > { %v753_v40 = vor.u32 %v751_v19, %v750_v30  ;;  %v754_v41 = vrot.slane %v750_v30, 4  ;;  %v1034_v45 = vld [vmem:[#allocation2 + $0x44] sm:$0x1]  ;;  %v427_v50 = vmul.f32 %v9091_v7, %v266_v29  ;;  %vm495_vm10 = vcmp.gt.f32.partialorder %v463_v28, 0.0 }
  0x53   : > { %1632 = vrot.lane.b32.xlu1 %v1471_v9, %s9016_s8  ;;  %v3261_v9 = vshrl.u32 %v8529_v51, 16  ;;  %v761_v42 = vor.u32 %v759_v23, %v758_v32  ;;  %v763_v21 = vrot.slane %v758_v32, 4  ;;  %v9299_v46 = vld [vmem:[#allocation2 + $0x38] ss:$0 sps:$4 sm:$0x11]   ;;  %vm496_vm11 = vcmp.gt.f32.partialorder %v464_v35, 0.0 }
  0x54   : > { %3428 = vrot.lane.b32.xlu0 %v3247_v37, %s9022_s14  ;;  %v3676_v37 = vrot.slane %v8534_v17, 1  ;;  %v1031_v53 = vsel %vm9158_vm15, %v753_v40, %v1030_v24  ;;  %v527_v56 = vmul.f32 0.01, %v463_v28  ;;  %v372_v58 = vsel %vm9084_vm5, 0, %v371_v31  ;;  %v321_v51 = vld [vmem:[#allocation2 + $0x60] sm:$0x1] }
  0x55   : > { %v3266_v36 = vor.u32 %v3265_v25, %v3261_v9  ;;  %v762_v52 = vsel %vm9165_vm1, %v754_v41, %v761_v42  ;;  %v1035_v54 = vsel %vm9074_vm3, %v763_v21, %v1034_v45  ;;  %1032 = vst [vmem:[#allocation2 + $0x3c] sm:$0xf] %v1031_v53  ;;  %v319_v59 = vsel %vm9074_vm3, 0, %v318_v49  ;;  %373 = vst [vmem:[#allocation2 + $0x50] sm:$0x1] %v372_v58 }
  0x56   : > { %1033 = vst.msk [vmem:[#allocation2 + $0x40] sm:$0xf] %vm10815_vm0, %v762_v52  ;;  %1036 = vst [vmem:[#allocation2 + $0x44] sm:$0x1] %v1035_v54  ;;  %v1485_v61 = vshrl.u32 %v9276_v27, 16  ;;  %v559_v62 = vsel %vm495_vm10, %v463_v28, %v527_v56  ;;  %v1489_v0 = vrot.slane %v1487_v47, 1 }
  0x57   : > { %1634 = vrot.lane.b32.xlu1 %v1483_v33, %s9016_s8  ;;  %v3675_v33 = vrot.slane %v8533_v11, 1  ;;  %320 = vst [vmem:[#allocation2 + $0x54] sm:$0x1] %v319_v59  ;;  %v8294_v4 = vpack.c.bf16 %v559_v62, %v559_v62  ;;  %v1494_v5 = vrot.slane %v1492_v48, 1  ;;  %v375_v9 = vsel %vm9084_vm5, 0, %v374_v43  ;;  %v267_v47 = vld [vmem:[%s9107_s28 + $0x70] sm:$0xff] }
  0x58   : > { %2532 = vrot.lane.b32.xlu0 %v2371_v44, %s9021_s13  ;;  %v3271_v44 = vsel %vm1435_vm9, %v3266_v36, %v3270_v26  ;;  %v322_v10 = vsel %vm9074_vm3, 0, %v321_v51  ;;  %v1883_v11 = vrot.slane %v9299_v46, 1  ;;  %376 = vst [vmem:[#allocation2 + $0x5c] sm:$0x1] %v375_v9  ;;  %v1037_v17 = vld [vmem:[#allocation2 + $0x48] sm:$0xf] }
  0x59   : > { %v3677_v7 = vsel %vm1869_vm6, %v3675_v33, %v3676_v37  ;;  %v765_v13 = vshrl.u32 %v8294_v4, 16  ;;  %323 = vst [vmem:[#allocation2 + $0x60] sm:$0x1] %v322_v10  ;;  %v1490_v33 = vor.u32 %v1489_v0, %v1485_v61  ;;  %v268_v48 = vld [vmem:[%s9107_s28 + $0x78] sm:$0xff]  ;;  %vm10810_vm7 = vcmask 64544  }
  0x5b   : > { %2534 = vrot.lane.b32.xlu1 %v2383_v55, %s9021_s13  ;;  %v9295_v55 = vld [vmem:[#allocation2 + $0x30] sm:$0xfe]   ;;  %v767_v22 = vrot.slane %v765_v13, 7  ;;  %v1495_v54 = vsel %vm1435_vm9, %v1490_v33, %v1494_v5 }
  0x5c   : > { %2821 = vrot.lane.b32.xlu0 %v2777_v57, %s9019_s11  ;;  %v528_v57 = vmul.f32 0.01, %v464_v35  ;;  %v1882_v2 = vrot.slane %v9295_v55, 1 }
  0x5d   : > { %v8528_v19 = vld [vmem:[#allocation2 + $0x3c] sm:$0xff]   ;;  %v8532_v24 = vld [vmem:[#allocation2 + $0x44] ss:$0 sps:$4 sm:$0x11]   ;;  %v771_v21 = vrot.slane %v767_v22, 4 }
  0x5e   : > { %v560_v3 = vsel %vm496_vm11, %v464_v35, %v528_v57  ;;  %v8531_v23 = vld [vmem:[#allocation2 + $0x3c] sm:$0xff]   ;;  %v3280_v29 = vshll.u32 %v8532_v24, 16  ;;  %v8538_v30 = vld [vmem:[#allocation2 + $0x44] ss:$0 sps:$4 sm:$0x11]   ;;  %v1884_v55 = vsel %vm1869_vm6, %v1882_v2, %v1883_v11  ;;  %vm10811_vm11 = vcmask 97344  }
  0x5f   : > { %2823 = vrot.lane.b32.xlu1 %v2780_v60, %s9019_s11  ;;  %v465_v60 = vadd.f32 %v9112_v15, %v426_v39  ;;  %v8295_v8 = vpack.c.bf16 %v560_v3, %v560_v3  ;;  %v8537_v26 = vld [vmem:[#allocation2 + $0x3c] sm:$0xfe]   ;;  %v3273_v27 = vshrl.u32 %v8531_v23, 16  ;;  %v3275_v28 = vshll.u32 %v8531_v23, 16  ;;  %v1041_v3 = vld [vmem:[#allocation2 + $0x50] sm:$0x1] }
  0x60   : > { %2999 = vrot.lane.b32.xlu0 %v8527_v63, %s9018_s10  ;;  %v9308_v63 = vadd.f32 %v9112_v15, %v427_v50  ;;  %v768_v15 = vshll.u32 %v8294_v4, 16  ;;  %v3678_v34 = vrot.slane %v8537_v26, 1  ;;  %v8539_v35 = vld [vmem:[#allocation2 + $0x3c] sm:$0xff]   ;;  %v3282_v37 = vrot.slane %v3280_v29, 1 }
  0x61   : > { %v529_v14 = vmul.f32 0.01, %v465_v60  ;;  %v773_v16 = vshrl.u32 %v8295_v8, 16  ;;  %vm497_vm12 = vcmp.gt.f32.partialorder %v465_v60, 0.0  ;;  %v3277_v36 = vrot.slane %v3275_v28, 1  ;;  %v8545_v57 = vld [vmem:[#allocation2 + $0x3c] sm:$0xff]  }
  0x62   : > { %v530_v18 = vmul.f32 0.01, %v9308_v63  ;;  %vm498_vm13 = vcmp.gt.f32.partialorder %v9308_v63, 0.0  ;;  %v770_v25 = vor.u32 %v768_v15, %v767_v22  ;;  %v3679_v38 = vrot.slane %v8538_v30, 1  ;;  %v8543_v52 = vld [vmem:[#allocation2 + $0x3c] sm:$0xfe]  }
  0x63   : > { %3001 = vrot.lane.b32.xlu1 %v8528_v19, %s9018_s10  ;;  %v776_v39 = vshll.u32 %v8295_v8, 16  ;;  %v8540_v40 = vld [vmem:[#allocation2 + $0x44] ss:$0 sps:$4 sm:$0x11]   ;;  %v1497_v41 = vshrl.u32 %v8539_v35, 16  ;;  %v1499_v42 = vshll.u32 %v8539_v35, 16  ;;  %v3278_v31 = vor.u32 %v3277_v36, %v3273_v27 }
  0x64   : > { %3432 = vrot.lane.b32.xlu0 %v3271_v44, %s9022_s14  ;;  %v1038_v32 = vsel %vm9158_vm15, %v770_v25, %v1037_v17  ;;  %v3680_v44 = vsel %vm1869_vm6, %v3678_v34, %v3679_v38  ;;  %v561_v45 = vsel %vm497_vm12, %v465_v60, %v529_v14  ;;  %v1504_v50 = vshll.u32 %v8540_v40, 16  ;;  %v8544_v43 = vld [vmem:[#allocation2 + $0x44] ss:$0 sps:$4 sm:$0x11]   ;;  %v8547_v0 = vld [vmem:[#allocation2 + $0x3c] sm:$0xff]  }
  0x65   : > { %1039 = vst [vmem:[#allocation2 + $0x48] sm:$0xf] %v1038_v32  ;;  %v1501_v49 = vrot.slane %v1499_v42, 1  ;;  %v3283_v53 = vsel %vm1435_vm9, %v3278_v31, %v3282_v37  ;;  %v1885_v56 = vrot.slane %v8543_v52, 1  ;;  %v562_v58 = vsel %vm498_vm13, %v9308_v63, %v530_v18  ;;  %v9338_v4 = vld [vmem:[%s10804_s1] ss:$0 sm:$0xff] }
  0x66   : > { %v1506_v46 = vrot.slane %v1504_v50, 1  ;;  %v8296_v59 = vpack.c.bf16 %v561_v45, %v561_v45  ;;  %v1886_v51 = vrot.slane %v8544_v43, 1  ;;  %v8548_v2 = vld [vmem:[#allocation2 + $0x44] ss:$0 sps:$4 sm:$0x11]   ;;  %v428_v5 = vmul.f32 %v9338_v4, %v267_v47 }
  0x67   : > { %3434 = vrot.lane.b32.xlu1 %v3283_v53, %s9022_s14  ;;  %v1502_v60 = vor.u32 %v1501_v49, %v1497_v41  ;;  %v429_v8 = vmul.f32 %v9338_v4, %v268_v48  ;;  %v8297_v10 = vpack.c.bf16 %v562_v58, %v562_v58  ;;  %v2385_v11 = vshrl.u32 %v8547_v0, 16  ;;  %v8551_v17 = vld [vmem:[#allocation2 + $0x3c] sm:$0xfe]   ;;  %v8552_v18 = vld [vmem:[#allocation2 + $0x44] ss:$0 sps:$4 sm:$0x11]  }
  0x68   : > { %3721 = vrot.lane.b32.xlu0 %v3677_v7, %s9020_s12  ;;  %v775_v7 = vrot.slane %v773_v16, 7  ;;  %v2387_v13 = vshll.u32 %v8547_v0, 16  ;;  %v2392_v15 = vshll.u32 %v8548_v2, 16  ;;  %v782_v14 = vshrl.u32 %v8296_v59, 16  ;;  %v9353_v24 = vld [vmem:[%s10805_s2] ss:$0 sm:$0xff] }
  0x69   : > { %v1507_v16 = vsel %vm1435_vm9, %v1502_v60, %v1506_v46  ;;  %v785_v19 = vshll.u32 %v8296_v59, 16  ;;  %v9356_v25 = vadd.f32 %v9353_v24, %v428_v5  ;;  %v9359_v26 = vadd.f32 %v9353_v24, %v429_v8  ;;  %v1044_v30 = vld [vmem:[#allocation2 + $0x54] sm:$0xf]  ;;  %v1048_v35 = vld [vmem:[#allocation2 + $0x5c] sm:$0x1] }
  0x6a   : > { %v778_v61 = vor.u32 %v776_v39, %v775_v7  ;;  %v780_v62 = vrot.slane %v775_v7, 4  ;;  %v2389_v22 = vrot.slane %v2387_v13, 1  ;;  %v2394_v23 = vrot.slane %v2392_v15, 1 }
  0x6b   : > { %1636 = vrot.lane.b32.xlu1 %v1495_v54, %s9016_s8  ;;  %v2781_v27 = vrot.slane %v8551_v17, 1  ;;  %v784_v28 = vrot.slane %v782_v14, 7  ;;  %v790_v29 = vshrl.u32 %v8297_v10, 16  ;;  %v2782_v33 = vrot.slane %v8552_v18, 1 }
  0x6c   : > { %3723 = vrot.lane.b32.xlu0 %v3680_v44, %s9020_s12  ;;  %v779_v63 = vsel %vm9165_vm1, %v771_v21, %v778_v61  ;;  %v1042_v9 = vsel %vm9074_vm3, %v780_v62, %v1041_v3  ;;  %v2390_v32 = vor.u32 %v2389_v22, %v2385_v11  ;;  %v793_v34 = vshll.u32 %v8297_v10, 16 }
  0x6d   : > { %1040 = vst.msk [vmem:[#allocation2 + $0x4c] sm:$0xf] %vm10815_vm0, %v779_v63  ;;  %1043 = vst [vmem:[#allocation2 + $0x50] sm:$0x1] %v1042_v9  ;;  %v1887_v36 = vsel %vm1869_vm6, %v1885_v56, %v1886_v51  ;;  %v787_v37 = vor.u32 %v785_v19, %v784_v28  ;;  %v788_v38 = vrot.slane %v784_v28, 4  ;;  %v792_v39 = vrot.slane %v790_v29, 7 }
  0x6e   : > { %v2395_v40 = vsel %vm1435_vm9, %v2390_v32, %v2394_v23  ;;  %v531_v41 = vmul.f32 0.01, %v9356_v25  ;;  %v9366_v42 = vmul.f32 0.01, %v9359_v26  ;;  %v2783_v49 = vsel %vm1869_vm6, %v2781_v27, %v2782_v33 }
  0x6f   : > { %1638 = vrot.lane.b32.xlu1 %v1507_v16, %s9016_s8  ;;  %v795_v31 = vor.u32 %v793_v34, %v792_v39  ;;  %v797_v44 = vrot.slane %v792_v39, 4  ;;  %v1045_v45 = vsel %vm9158_vm15, %v787_v37, %v1044_v30  ;;  %vm499_vm14 = vcmp.gt.f32.partialorder %v9356_v25, 0.0 }
  0x70   : > { %1926 = vrot.lane.b32.xlu0 %v1884_v55, %s9015_s7  ;;  %1046 = vst [vmem:[#allocation2 + $0x54] sm:$0xf] %v1045_v45  ;;  %vm500_vm2 = vcmp.gt.f32.partialorder %v9359_v26, 0.0  ;;  %v563_v27 = vsel %vm499_vm14, %v9356_v25, %v531_v41  ;;  %v269_v45 = vld [vmem:[%s9107_s28 + $0x80] sm:$0xff]  ;;  %vm10812_vm12 = vcmask 130144   ;;  %vm2576_vm13 = vcmask 162944  }
  0x71   : > { %v796_v52 = vsel %vm9165_vm1, %v788_v38, %v795_v31  ;;  %v1049_v53 = vsel %vm9074_vm3, %v797_v44, %v1048_v35  ;;  %v8298_v41 = vpack.c.bf16 %v563_v27, %v563_v27 }
  0x72   : > { %1047 = vst.msk [vmem:[#allocation2 + $0x58] sm:$0xf] %vm10815_vm0, %v796_v52  ;;  %1050 = vst [vmem:[#allocation2 + $0x5c] sm:$0x1] %v1049_v53 }
  0x73   : > { %1928 = vrot.lane.b32.xlu1 %v1887_v36, %s9015_s7 }
  0x74   : > { %2103 = vrot.lane.b32.xlu0 %v8545_v57, %s9017_s9  ;;  %v8546_v21 = vld [vmem:[#allocation2 + $0x48] sm:$0xff]   ;;  %v8550_v48 = vld [vmem:[#allocation2 + $0x50] ss:$0 sps:$4 sm:$0x11]  }
  0x75   : > { %v8549_v47 = vld [vmem:[#allocation2 + $0x48] sm:$0xff]   ;;  %v2404_v43 = vshll.u32 %v8550_v48, 16  ;;  %v8554_v7 = vld [vmem:[#allocation2 + $0x50] ss:$0 sps:$4 sm:$0x11]  }
  0x76   : > { %v8553_v50 = vld [vmem:[#allocation2 + $0x48] sm:$0xfe]   ;;  %v2397_v54 = vshrl.u32 %v8549_v47, 16  ;;  %v2399_v55 = vshll.u32 %v8549_v47, 16  ;;  %v2785_v59 = vrot.slane %v8554_v7, 1 }
  0x77   : > { %v2784_v46 = vrot.slane %v8553_v50, 1  ;;  %v8555_v56 = vld [vmem:[#allocation2 + $0x48] sm:$0xff]   ;;  %2105 = vrot.lane.b32.xlu1 %v8546_v21, %s9017_s9  ;;  %v2406_v58 = vrot.slane %v2404_v43, 1  ;;  %v8558_v51 = vld [vmem:[#allocation2 + $0x50] ss:$0 sps:$4 sm:$0x11]  }
  0x78   : > { %2536 = vrot.lane.b32.xlu0 %v2395_v40, %s9021_s13  ;;  %v2401_v57 = vrot.slane %v2399_v55, 1  ;;  %v8557_v60 = vld [vmem:[#allocation2 + $0x48] sm:$0xff]   ;;  %v3292_v5 = vshll.u32 %v8558_v51, 16  ;;  %v8562_v9 = vld [vmem:[#allocation2 + $0x50] ss:$0 sps:$4 sm:$0x11]   ;;  %v564_v40 = vsel %vm500_vm2, %v9359_v26, %v9366_v42 }
  0x79   : > { %v8563_v61 = vld [vmem:[#allocation2 + $0x48] sm:$0xff]   ;;  %v3285_v0 = vshrl.u32 %v8557_v60, 16  ;;  %v3287_v2 = vshll.u32 %v8557_v60, 16  ;;  %v2786_v14 = vsel %vm1869_vm6, %v2784_v46, %v2785_v59  ;;  %v8559_v17 = vld [vmem:[#allocation2 + $0x54] sm:$0xff]   ;;  %v3682_v22 = vrot.slane %v8562_v9, 1  ;;  %v8583_v9 = vld [vmem:[#allocation2] sm:$0xff]  }
  0x7a   : > { %v2402_v62 = vor.u32 %v2401_v57, %v2397_v54  ;;  %v8561_v3 = vld [vmem:[#allocation2 + $0x48] sm:$0xfe]   ;;  %v1509_v10 = vshrl.u32 %v8563_v61, 16  ;;  %v1511_v11 = vshll.u32 %v8563_v61, 16  ;;  %v3294_v13 = vrot.slane %v3292_v5, 1  ;;  %v8556_v19 = vld [vmem:[#allocation2 + $0x54] sm:$0xff]  }
  0x7b   : > { %v3289_v63 = vrot.slane %v3287_v2, 1  ;;  %v3681_v15 = vrot.slane %v8561_v3, 1  ;;  %v8560_v18 = vld [vmem:[#allocation2 + $0x5c] ss:$0 sps:$4 sm:$0x11]   ;;  %v3297_v29 = vshrl.u32 %v8559_v17, 16  ;;  %v8299_v43 = vpack.c.bf16 %v564_v40, %v564_v40 }
  0x7c   : > { %2825 = vrot.lane.b32.xlu0 %v2783_v49, %s9019_s11  ;;  %v2407_v8 = vsel %vm1435_vm9, %v2402_v62, %v2406_v58  ;;  %v1513_v23 = vrot.slane %v1511_v11, 1  ;;  %v3299_v30 = vshll.u32 %v8559_v17, 16  ;;  %v3304_v32 = vshll.u32 %v8560_v18, 16  ;;  %v8564_v33 = vld [vmem:[#allocation2 + $0x50] ss:$0 sps:$4 sm:$0x11]  }
  0x7d   : > { %2538 = vrot.lane.b32.xlu1 %v2407_v8, %s9021_s13  ;;  %v3290_v16 = vor.u32 %v3289_v63, %v3285_v0  ;;  %v3683_v36 = vsel %vm1869_vm6, %v3681_v15, %v3682_v22  ;;  %v1516_v37 = vshll.u32 %v8564_v33, 16  ;;  %v8565_v38 = vld [vmem:[#allocation2 + $0x54] sm:$0xfe]   ;;  %v8566_v25 = vld [vmem:[#allocation2 + $0x5c] ss:$0 sps:$4 sm:$0x11]   ;;  %v430_v0 = vmul.f32 %v9338_v4, %v269_v45 }
  0x7e   : > { %v3301_v34 = vrot.slane %v3299_v30, 1  ;;  %v3306_v35 = vrot.slane %v3304_v32, 1  ;;  %v8567_v39 = vld [vmem:[#allocation2 + $0x54] sm:$0xff]   ;;  %v3684_v44 = vrot.slane %v8565_v38, 1  ;;  %v270_v47 = vld [vmem:[%s9107_s28 + $0x88] sm:$0xff]  ;;  %v3685_v48 = vrot.slane %v8566_v25, 1 }
  0x7f   : > { %v3295_v28 = vsel %vm1435_vm9, %v3290_v16, %v3294_v13  ;;  %v1518_v31 = vrot.slane %v1516_v37, 1  ;;  %v8568_v49 = vld [vmem:[#allocation2 + $0x5c] ss:$0 sps:$4 sm:$0x11]   ;;  %v1521_v50 = vshrl.u32 %v8567_v39, 16  ;;  %v1523_v52 = vshll.u32 %v8567_v39, 16 }
  0x80   : > { %3003 = vrot.lane.b32.xlu0 %v8555_v56, %s9018_s10  ;;  %v3302_v21 = vor.u32 %v3301_v34, %v3297_v29  ;;  %v1514_v54 = vor.u32 %v1513_v23, %v1509_v10  ;;  %v8569_v55 = vld [vmem:[#allocation2 + $0x48] sm:$0xfe]   ;;  %v3686_v26 = vsel %vm1869_vm6, %v3684_v44, %v3685_v48  ;;  %v1528_v7 = vshll.u32 %v8568_v49, 16  ;;  %v8570_v46 = vld [vmem:[#allocation2 + $0x50] ss:$0 sps:$4 sm:$0x11]  }
  0x81   : > { %2827 = vrot.lane.b32.xlu1 %v2786_v14, %s9019_s11  ;;  %v1525_v42 = vrot.slane %v1523_v52, 1  ;;  %v799_v56 = vshrl.u32 %v8298_v41, 16  ;;  %v1888_v57 = vrot.slane %v8569_v55, 1  ;;  %v802_v58 = vshll.u32 %v8298_v41, 16  ;;  %v377_v59 = vld [vmem:[#allocation2 + $0x68] sm:$0x1] }
  0x82   : > { %v3307_v53 = vsel %vm1435_vm9, %v3302_v21, %v3306_v35  ;;  %v1530_v60 = vrot.slane %v1528_v7, 1  ;;  %v1889_v51 = vrot.slane %v8570_v46, 1  ;;  %v8571_v61 = vld [vmem:[#allocation2 + $0x54] sm:$0xfe]   ;;  %v431_v2 = vmul.f32 %v9338_v4, %v270_v47  ;;  %v8612_v10 = vld [vmem:[#allocation2 + $0xc] sm:$0xff]   ;;  %v8618_v25 = vld [vmem:[%s10806_s3] sm:$0xff]  }
  0x83   : > { %v1519_v3 = vsel %vm1435_vm9, %v1514_v54, %v1518_v31  ;;  %v1526_v5 = vor.u32 %v1525_v42, %v1521_v50  ;;  %v8572_v8 = vld [vmem:[#allocation2 + $0x5c] ss:$0 sps:$4 sm:$0x11]   ;;  %v801_v63 = vrot.slane %v799_v56, 7  ;;  %v1891_v15 = vrot.slane %v8571_v61, 1  ;;  %v8573_v14 = vld [vmem:[#allocation2 + $0x54] sm:$0xff]   ;;  %8386 = vmatprep.subr.bf16.mxu0 %v8618_v25 }
  0x84   : > { %3436 = vrot.lane.b32.xlu0 %v3295_v28, %s9022_s14  ;;  %v8615_v11 = vld [vmem:[#allocation2 + $0x18] sm:$0xff]   ;;  %v1890_v13 = vsel %vm1869_vm6, %v1888_v57, %v1889_v51  ;;  %v807_v16 = vshrl.u32 %v8299_v43, 16  ;;  %v1051_v17 = vld [vmem:[#allocation2 + $0x60] sm:$0xf]  ;;  %v1892_v18 = vrot.slane %v8572_v8, 1  ;;  %v810_v23 = vshll.u32 %v8299_v43, 16  ;;  %8387 = vmatpush3.bf16.msra.mxu0 %v8618_v25 }
  0x85   : > { %3005 = vrot.lane.b32.xlu1 %v8556_v19, %s9018_s10  ;;  %v804_v19 = vor.u32 %v802_v58, %v801_v63  ;;  %v805_v22 = vrot.slane %v801_v63, 4  ;;  %v8575_v27 = vld [vmem:[#allocation2 + $0x54] sm:$0xff]   ;;  %v324_v29 = vld [vmem:[#allocation2 + $0x6c] sm:$0x1]  ;;  %v378_v32 = vsel %vm9084_vm5, 0, %v377_v59  ;;  %v469_v33 = vadd.f32 %v9353_v24, %v430_v0  ;;  %1243 = vst.msk [vmem:[#allocation3] sm:$0xff] %vm10814_vm4, %v8583_v9 }
  0x86   : > { %v9411_v30 = vrot.slane %v807_v16, 7  ;;  %v470_v34 = vadd.f32 %v9353_v24, %v431_v2  ;;  %v1531_v35 = vsel %vm1435_vm9, %v1526_v5, %v1530_v60  ;;  %v8576_v37 = vld [vmem:[#allocation2 + $0x5c] ss:$0 sps:$4 sm:$0x11]   ;;  %v2409_v38 = vshrl.u32 %v8575_v27, 16  ;;  %1244 = vst.msk [vmem:[#allocation3 + $0x8] sm:$0xff] %vm10814_vm4, %v8612_v10 }
  0x87   : > { %v2411_v39 = vshll.u32 %v8575_v27, 16  ;;  %379 = vst [vmem:[#allocation2 + $0x68] sm:$0x1] %v378_v32  ;;  %v380_v31 = vld [vmem:[#allocation2 + $0x74] sm:$0x1]  ;;  %v1893_v45 = vsel %vm1869_vm6, %v1891_v15, %v1892_v18  ;;  %v2416_v48 = vshll.u32 %v8576_v37, 16 }
  0x88   : > { %3725 = vrot.lane.b32.xlu0 %v3683_v36, %s9020_s12  ;;  %v1052_v36 = vsel %vm9158_vm15, %v804_v19, %v1051_v17  ;;  %v812_v40 = vor.u32 %v810_v23, %v9411_v30  ;;  %v814_v41 = vrot.slane %v9411_v30, 4  ;;  %v327_v44 = vld [vmem:[#allocation2 + $0x78] sm:$0x1]  ;;  %1245 = vst.msk [vmem:[#allocation3 + $0x10] sm:$0xff] %vm10814_vm4, %v8615_v11  ;;  %vm501_vm8 = vcmp.gt.f32.partialorder %v469_v33, 0.0  ;;  %v8621_v42 = vld [vmem:[#allocation2 + $0x24] sm:$0xff]  }
  0x89   : > { %3438 = vrot.lane.b32.xlu1 %v3307_v53, %s9022_s14  ;;  %1053 = vst [vmem:[#allocation2 + $0x60] sm:$0xf] %v1052_v36  ;;  %v2413_v47 = vrot.slane %v2411_v39, 1  ;;  %v8579_v49 = vld [vmem:[#allocation2 + $0x54] sm:$0xfe]   ;;  %v325_v53 = vsel %vm9074_vm3, 0, %v324_v29 }
  0x8a   : > { %v813_v50 = vsel %vm9165_vm1, %v805_v22, %v812_v40  ;;  %v8580_v52 = vld [vmem:[#allocation2 + $0x5c] ss:$0 sps:$4 sm:$0x11]   ;;  %v2418_v55 = vrot.slane %v2416_v48, 1  ;;  %v2787_v43 = vrot.slane %v8579_v49, 1  ;;  %vm502_vm10 = vcmp.gt.f32.partialorder %v470_v34, 0.0 }
  0x8b   : > { %1054 = vst.msk [vmem:[#allocation2 + $0x64] sm:$0xf] %vm10815_vm0, %v813_v50  ;;  %v2414_v54 = vor.u32 %v2413_v47, %v2409_v38  ;;  %326 = vst [vmem:[#allocation2 + $0x6c] sm:$0x1] %v325_v53  ;;  %v2788_v7 = vrot.slane %v8580_v52, 1  ;;  %v381_v59 = vsel %vm9084_vm5, 0, %v380_v31 }
  0x8c   : > { %3727 = vrot.lane.b32.xlu0 %v3686_v26, %s9020_s12  ;;  %v533_v46 = vmul.f32 0.01, %v469_v33  ;;  %v534_v56 = vmul.f32 0.01, %v470_v34  ;;  %v328_v60 = vsel %vm9074_vm3, 0, %v327_v44  ;;  %1246 = vst.msk [vmem:[#allocation3 + $0x18] sm:$0xff] %vm10814_vm4, %v8621_v42 }
  0x8d   : > { %1640 = vrot.lane.b32.xlu1 %v1519_v3, %s9016_s8  ;;  %v2419_v58 = vsel %vm1435_vm9, %v2414_v54, %v2418_v55  ;;  %v8624_v51 = vld [vmem:[%s10806_s3 + $0x8] sm:$0xff]   ;;  %382 = vst [vmem:[#allocation2 + $0x74] sm:$0x1] %v381_v59  ;;  %329 = vst [vmem:[#allocation2 + $0x78] sm:$0x1] %v328_v60  ;;  %v2789_v3 = vsel %vm1869_vm6, %v2787_v43, %v2788_v7  ;;  %v271_v39 = vld [vmem:[%s9107_s28 + $0x90] sm:$0xff] }
  0x8e   : > { %v1055_v61 = vld [vmem:[#allocation2 + $0x68] sm:$0x1]  ;;  %v566_v0 = vsel %vm502_vm10, %v470_v34, %v534_v56  ;;  %8388 = vmatprep.subr.bf16.mxu0 %v8624_v51  ;;  %v383_v52 = vld [vmem:[#allocation2 + $0x80] sm:$0x1]  ;;  %v272_v60 = vld [vmem:[%s9107_s28 + $0x98] sm:$0xff]  ;;  %vm2865_vm2 = vcmask 195744  }
  0x8f   : > { %v1919_v28 = vpop.permute.xlu1 %1918  ;;  %v1056_v2 = vsel %vm9074_vm3, %v814_v41, %v1055_v61  ;;  %v8301_v8 = vpack.c.bf16 %v566_v0, %v566_v0  ;;  %8389 = vmatpush3.bf16.msra.mxu0 %v8624_v51  ;;  %vm3043_vm10 = vcmask 228544  }
  0x90   : > { %1930 = vrot.lane.b32.xlu0 %v1890_v13, %s9015_s7  ;;  %1057 = vst [vmem:[#allocation2 + $0x68] sm:$0x1] %v1056_v2 }
  0x91   : > { %1642 = vrot.lane.b32.xlu1 %v1531_v35, %s9016_s8  ;;  %v824_v10 = vshrl.u32 %v8301_v8, 16  ;;  %v827_v15 = vshll.u32 %v8301_v8, 16 }
  0x92   : > { %v8574_v13 = vld [vmem:[#allocation2 + $0x60] sm:$0xff]   ;;  %v1058_v23 = vld [vmem:[#allocation2 + $0x6c] sm:$0xf] }
  0x93   : > { %v8577_v16 = vld [vmem:[#allocation2 + $0x60] sm:$0xff]   ;;  %v826_v22 = vrot.slane %v824_v10, 7 }
  0x94   : > { %v1629_v62 = vpop.permute.xlu0 %1628  ;;  %2107 = vrot.lane.b32.xlu0 %v8573_v14, %s9017_s9  ;;  %v8581_v17 = vld [vmem:[#allocation2 + $0x60] sm:$0xfe]   ;;  %v2421_v27 = vshrl.u32 %v8577_v16, 16  ;;  %v1062_v37 = vld [vmem:[#allocation2 + $0x74] sm:$0x1] }
  0x95   : > { %1677 = vst.msk [vmem:[#allocation3] sm:$0xff] %vm10810_vm7, %v1629_v62  ;;  %1932 = vrot.lane.b32.xlu1 %v1893_v45, %s9015_s7  ;;  %v565_v62 = vsel %vm501_vm8, %v469_v33, %v533_v46  ;;  %v8584_v19 = vld [vmem:[#allocation2 + $0x60] sm:$0xff]   ;;  %v2790_v29 = vrot.slane %v8581_v17, 1  ;;  %v829_v35 = vor.u32 %v827_v15, %v826_v22  ;;  %v831_v36 = vrot.slane %v826_v22, 4 }
  0x96   : > { %1967 = vst.msk [vmem:[#allocation3] sm:$0xff] %vm10811_vm11, %v1919_v28  ;;  %v8300_v5 = vpack.c.bf16 %v565_v62, %v565_v62  ;;  %v2423_v28 = vshll.u32 %v8577_v16, 16  ;;  %v8586_v32 = vld [vmem:[#allocation2 + $0x60] sm:$0xff]  }
  0x97   : > { %v8578_v25 = vld [vmem:[#allocation2 + $0x68] ss:$0 sps:$4 sm:$0x11]   ;;  %v3309_v44 = vshrl.u32 %v8586_v32, 16  ;;  %v1063_v45 = vsel %vm9074_vm3, %v831_v36, %v1062_v37  ;;  %v3311_v54 = vshll.u32 %v8586_v32, 16  ;;  %v8592_v56 = vld [vmem:[#allocation2 + $0x60] sm:$0xff]  }
  0x98   : > { %2540 = vrot.lane.b32.xlu0 %v2419_v58, %s9021_s13  ;;  %v816_v63 = vshrl.u32 %v8300_v5, 16  ;;  %v819_v9 = vshll.u32 %v8300_v5, 16  ;;  %v2425_v40 = vrot.slane %v2423_v28, 1  ;;  %v2428_v48 = vshll.u32 %v8578_v25, 16  ;;  %1064 = vst [vmem:[#allocation2 + $0x74] sm:$0x1] %v1063_v45 }
  0x99   : > { %2109 = vrot.lane.b32.xlu1 %v8574_v13, %s9017_s9  ;;  %v8587_v49 = vld [vmem:[#allocation2 + $0x68] ss:$0 sps:$4 sm:$0x11]   ;;  %v8590_v55 = vld [vmem:[#allocation2 + $0x60] sm:$0xfe]   ;;  %v432_v58 = vmul.f32 %v9338_v4, %v271_v39  ;;  %v3313_v59 = vrot.slane %v3311_v54, 1 }
  0x9a   : > { %v818_v18 = vrot.slane %v816_v63, 7  ;;  %v2426_v47 = vor.u32 %v2425_v40, %v2421_v27  ;;  %v2430_v42 = vrot.slane %v2428_v48, 1  ;;  %v3316_v7 = vshll.u32 %v8587_v49, 16  ;;  %v8591_v46 = vld [vmem:[#allocation2 + $0x68] ss:$0 sps:$4 sm:$0x11]  }
  0x9b   : > { %v3687_v62 = vrot.slane %v8590_v55, 1  ;;  %v3688_v0 = vrot.slane %v8591_v46, 1  ;;  %v8593_v2 = vld [vmem:[#allocation2 + $0x68] ss:$0 sps:$4 sm:$0x11]   ;;  %v3314_v5 = vor.u32 %v3313_v59, %v3309_v44  ;;  %v1535_v8 = vshll.u32 %v8592_v56, 16 }
  0x9c   : > { %2829 = vrot.lane.b32.xlu0 %v2789_v3, %s9019_s11  ;;  %v821_v30 = vor.u32 %v819_v9, %v818_v18  ;;  %v822_v34 = vrot.slane %v818_v18, 4  ;;  %v2431_v51 = vsel %vm1435_vm9, %v2426_v47, %v2430_v42  ;;  %v3318_v61 = vrot.slane %v3316_v7, 1  ;;  %v273_v45 = vld [vmem:[%s9107_s28 + $0xa0] sm:$0xff]  ;;  %v274_v47 = vld [vmem:[%s9107_s28 + $0xa8] sm:$0xff]  ;;  %v275_v55 = vld [vmem:[%s9107_s28 + $0xb0] sm:$0xff] }
  0x9d   : > { %v9437_v26 = vpop.permute.xlu1 %2097  ;;  %2542 = vrot.lane.b32.xlu1 %v2431_v51, %s9021_s13  ;;  %v384_v9 = vsel %vm9084_vm5, 0, %v383_v52  ;;  %v1533_v13 = vshrl.u32 %v8592_v56, 16  ;;  %v1540_v15 = vshll.u32 %v8593_v2, 16  ;;  %v9494_v16 = vadd.f32 %v9353_v24, %v432_v58  ;;  %v8598_v59 = vld [vmem:[#allocation2 + $0x60] sm:$0xfe]  }
  0x9e   : > { %v1059_v41 = vsel %vm9158_vm15, %v821_v30, %v1058_v23  ;;  %v830_v31 = vsel %vm9165_vm1, %v822_v34, %v829_v35  ;;  %385 = vst [vmem:[#allocation2 + $0x80] sm:$0x1] %v384_v9  ;;  %v3319_v18 = vsel %vm1435_vm9, %v3314_v5, %v3318_v61  ;;  %v433_v23 = vmul.f32 %v9338_v4, %v272_v60  ;;  %v8599_v60 = vld [vmem:[#allocation2 + $0x68] ss:$0 sps:$4 sm:$0x11]  }
  0x9f   : > { %1060 = vst [vmem:[#allocation2 + $0x6c] sm:$0xf] %v1059_v41  ;;  %1061 = vst.msk [vmem:[#allocation2 + $0x70] sm:$0xf] %vm10815_vm0, %v830_v31  ;;  %v3689_v28 = vsel %vm1869_vm6, %v3687_v62, %v3688_v0  ;;  %v1542_v37 = vrot.slane %v1540_v15, 1  ;;  %vm503_vm14 = vcmp.gt.f32.partialorder %v9494_v16, 0.0 }
  0xa0   : > { %v2096_v21 = vpop.permute.xlu0 %2095  ;;  %3007 = vrot.lane.b32.xlu0 %v8584_v19, %s9018_s10  ;;  %v8589_v22 = vld [vmem:[#allocation2 + $0x74] ss:$0 sps:$4 sm:$0x11]   ;;  %v472_v31 = vadd.f32 %v9353_v24, %v433_v23  ;;  %v1894_v0 = vrot.slane %v8598_v59, 1  ;;  %v1895_v2 = vrot.slane %v8599_v60, 1 }
  0xa1   : > { %2144 = vst.msk [vmem:[#allocation3] sm:$0xff] %vm10812_vm12, %v2096_v21  ;;  %v8582_v21 = vld [vmem:[#allocation2 + $0x68] ss:$0 sps:$4 sm:$0x11]   ;;  %v3328_v36 = vshll.u32 %v8589_v22, 16 }
  0xa2   : > { %v2791_v53 = vrot.slane %v8582_v21, 1  ;;  %v8595_v25 = vld [vmem:[#allocation2 + $0x74] ss:$0 sps:$4 sm:$0x11]   ;;  %vm504_vm8 = vcmp.gt.f32.partialorder %v472_v31, 0.0 }
  0xa3   : > { %v3330_v21 = vrot.slane %v3328_v36, 1  ;;  %v3691_v49 = vrot.slane %v8595_v25, 1  ;;  %v8597_v46 = vld [vmem:[#allocation2 + $0x74] ss:$0 sps:$4 sm:$0x11]  }
  0xa4   : > { %v9439_v57 = vpop.permute.xlu0 %2995  ;;  %v2792_v10 = vsel %vm1869_vm6, %v2790_v29, %v2791_v53  ;;  %3440 = vrot.lane.b32.xlu0 %v3319_v18, %s9022_s14  ;;  %v1537_v29 = vrot.slane %v1535_v8, 1  ;;  %v1552_v61 = vshll.u32 %v8597_v46, 16  ;;  %v435_v8 = vmul.f32 %v9338_v4, %v274_v47  ;;  %v8601_v15 = vld [vmem:[#allocation2 + $0x74] ss:$0 sps:$4 sm:$0x11]  }
  0xa5   : > { %2831 = vrot.lane.b32.xlu1 %v2792_v10, %s9019_s11  ;;  %v1896_v18 = vsel %vm1869_vm6, %v1894_v0, %v1895_v2  ;;  %v535_v22 = vmul.f32 0.01, %v9494_v16  ;;  %v8605_v25 = vld [vmem:[#allocation2 + $0x74] ss:$0 sps:$4 sm:$0x11]  }
  0xa6   : > { %v8585_v17 = vld [vmem:[#allocation2 + $0x6c] sm:$0xff]   ;;  %v1538_v7 = vor.u32 %v1537_v29, %v1533_v13  ;;  %v1554_v13 = vrot.slane %v1552_v61, 1 }
  0xa7   : > { %v8588_v19 = vld [vmem:[#allocation2 + $0x6c] sm:$0xff]  }
  0xa8   : > { %v8596_v30 = vld [vmem:[#allocation2 + $0x6c] sm:$0xff]   ;;  %v3321_v34 = vshrl.u32 %v8588_v19, 16  ;;  %v3323_v35 = vshll.u32 %v8588_v19, 16  ;;  %3729 = vrot.lane.b32.xlu0 %v3689_v28, %s9020_s12  ;;  %v1543_v9 = vsel %vm1435_vm9, %v1538_v7, %v1542_v37  ;;  %v1898_v28 = vrot.slane %v8601_v15, 1 }
  0xa9   : > { %v9459_v11 = vpop.permute.xlu1 %2997  ;;  %v8594_v39 = vld [vmem:[#allocation2 + $0x6c] sm:$0xfe]   ;;  %v1545_v40 = vshrl.u32 %v8596_v30, 16  ;;  %3009 = vrot.lane.b32.xlu1 %v8585_v17, %s9018_s10  ;;  %v1547_v52 = vshll.u32 %v8596_v30, 16  ;;  %v436_v17 = vmul.f32 %v9338_v4, %v275_v55  ;;  %v536_v30 = vmul.f32 0.01, %v472_v31 }
  0xaa   : > { %v9462_v14 = vpop.permute.xlu0 %2099  ;;  %v3325_v41 = vrot.slane %v3323_v35, 1  ;;  %v3690_v48 = vrot.slane %v8594_v39, 1  ;;  %v9511_v53 = vld [vmem:[#allocation2 + $0x6c] sm:$0xff]   ;;  %v567_v35 = vsel %vm503_vm14, %v9494_v16, %v535_v22  ;;  %v330_v16 = vld [vmem:[#allocation2 + $0x84] sm:$0x1]  ;;  %vm3476_vm14 = vcmask 261344  }
  0xab   : > { %v1549_v58 = vrot.slane %v1547_v52, 1  ;;  %v8600_v5 = vld [vmem:[#allocation2 + $0x6c] sm:$0xfe]   ;;  %v2435_v23 = vshll.u32 %v9511_v53, 16  ;;  %v8302_v39 = vpack.c.bf16 %v567_v35, %v567_v35  ;;  %v276_v52 = vld [vmem:[%s9107_s28 + $0xb8] sm:$0xff] }
  0xac   : > { %v3326_v42 = vor.u32 %v3325_v41, %v3321_v34  ;;  %v3692_v56 = vsel %vm1869_vm6, %v3690_v48, %v3691_v49  ;;  %v1897_v19 = vrot.slane %v8600_v5, 1  ;;  %v8602_v29 = vld [vmem:[#allocation2 + $0x6c] sm:$0xff]   ;;  %v2433_v34 = vshrl.u32 %v9511_v53, 16  ;;  %v1065_v55 = vld [vmem:[#allocation2 + $0x78] sm:$0xf] }
  0xad   : > { %v9465_v33 = vpop.permute.xlu1 %2101  ;;  %3731 = vrot.lane.b32.xlu0 %v3692_v56, %s9020_s12  ;;  %v1550_v10 = vor.u32 %v1549_v58, %v1545_v40  ;;  %v2437_v40 = vrot.slane %v2435_v23, 1  ;;  %v2440_v48 = vshll.u32 %v8605_v25, 16  ;;  %v1069_v56 = vld [vmem:[#allocation2 + $0x80] sm:$0x1]  ;;  %v333_v0 = vld [vmem:[#allocation2 + $0x90] sm:$0x1] }
  0xae   : > { %v9468_v38 = vpop.permute.xlu0 %2817  ;;  %v3331_v51 = vsel %vm1435_vm9, %v3326_v42, %v3330_v21  ;;  %v9558_v21 = vadd.f32 %v9353_v24, %v435_v8  ;;  %v8609_v42 = vld [vmem:[#allocation2 + $0x74] ss:$0 sps:$4 sm:$0x11]  }
  0xaf   : > { %3442 = vrot.lane.b32.xlu1 %v3331_v51, %s9022_s14  ;;  %v1555_v37 = vsel %vm1435_vm9, %v1550_v10, %v1554_v13  ;;  %v2438_v47 = vor.u32 %v2437_v40, %v2433_v34  ;;  %v2442_v46 = vrot.slane %v2440_v48, 1  ;;  %v2794_v60 = vrot.slane %v8609_v42, 1  ;;  %v389_v13 = vld [vmem:[#allocation2 + $0x98] sm:$0x1]  ;;  %v8642_v22 = vld [vmem:[#allocation2 + $0x30] sm:$0xff]  }
  0xb0   : > { %1247 = vst.msk [vmem:[#allocation3 + $0x20] sm:$0xff] %vm10814_vm4, %v8642_v22  ;;  %v390_v25 = vsel %vm9084_vm5, 0, %v389_v13 }
  0xb1   : > { %v9478_v50 = vpop.permute.xlu1 %1920  ;;  %1934 = vrot.lane.b32.xlu0 %v1896_v18, %s9015_s7  ;;  %391 = vst [vmem:[#allocation2 + $0x98] sm:$0x1] %v390_v25 }
  0xb2   : > { %v9480_v43 = vpop.permute.xlu0 %3717 }
  0xb3   : > { %1644 = vrot.lane.b32.xlu1 %v1543_v9, %s9016_s8  ;;  %v538_v9 = vmul.f32 0.01, %v9558_v21 }
  0xb5   : > { %v9485_v3 = vpop.permute.xlu1 %2819  ;;  %2111 = vrot.lane.b32.xlu0 %v8602_v29, %s9017_s9 }
  0xb6   : > { %v9488_v63 = vpop.permute.xlu0 %3719 }
  0xb7   : > { %1646 = vrot.lane.b32.xlu1 %v1555_v37, %s9016_s8 }
  0xb9   : > { %v9499_v27 = vpop.permute.xlu1 %1924 }
  0xba   : > { %v9503_v32 = vpop.permute.xlu0 %1922 }
  0xbd   : > { %v2531_v44 = vpop.permute.xlu1 %2530 }
  0xbe   : > { %v1631_v54 = vpop.permute.xlu0 %1630 }
  0xbf   : > { %1678 = vst.msk [vmem:[#allocation3 + $0x8] sm:$0xff] %vm10810_vm7, %v1631_v54 }
  0xc0   : > { %1968 = vst.msk [vmem:[#allocation3 + $0x8] sm:$0xff] %vm10811_vm11, %v9478_v50  ;;  %v434_v50 = vmul.f32 %v9338_v4, %v273_v45  ;;  %v836_v45 = vshll.u32 %v8302_v39, 16 }
  0xc1   : > { %v9520_v62 = vpop.permute.xlu1 %3430  ;;  %2145 = vst.msk [vmem:[#allocation3 + $0x8] sm:$0xff] %vm10812_vm12, %v9437_v26 }
  0xc2   : > { %2578 = vst.msk [vmem:[#allocation3 + $0x8] sm:$0xff] %vm2576_vm13, %v2531_v44  ;;  %v2529_v26 = vpop.permute.xlu0 %2528  ;;  %v9547_v36 = vadd.f32 %v9353_v24, %v434_v50  ;;  %v833_v44 = vshrl.u32 %v8302_v39, 16  ;;  %v8629_v50 = vld [vmem:[%s10806_s3 + $0x10] ss:$0 sps:$4 sm:$0x33]  }
  0xc3   : > { %2867 = vst.msk [vmem:[#allocation3 + $0x8] sm:$0xff] %vm2865_vm2, %v9485_v3 }
  0xc4   : > { %2577 = vst.msk [vmem:[#allocation3] sm:$0xff] %vm2576_vm13, %v2529_v26  ;;  %v835_v7 = vrot.slane %v833_v44, 7  ;;  %v336_v44 = vld [vmem:[#allocation2 + $0x9c] sm:$0x1] }
  0xc5   : > { %v1633_v3 = vpop.permute.xlu1 %1632  ;;  %2866 = vst.msk [vmem:[#allocation3] sm:$0xff] %vm2865_vm2, %v9468_v38  ;;  %v568_v38 = vsel %vm504_vm8, %v472_v31, %v536_v30  ;;  %v9563_v31 = vadd.f32 %v9353_v24, %v436_v17  ;;  %v437_v24 = vmul.f32 %v9338_v4, %v276_v52  ;;  %vm10816_vm8 = vcmask 294144  }
  0xc6   : > { %3045 = vst.msk [vmem:[#allocation3 + $0x8] sm:$0xff] %vm3043_vm10, %v9459_v11  ;;  %3044 = vst.msk [vmem:[#allocation3] sm:$0xff] %vm3043_vm10, %v9439_v57  ;;  %v1899_v11 = vsel %vm1869_vm6, %v1897_v19, %v1898_v28  ;;  %v8303_v41 = vpack.c.bf16 %v568_v38, %v568_v38  ;;  %v3429_v57 = vpop.permute.xlu0 %3428  ;;  %v331_v4 = vsel %vm9074_vm3, 0, %v330_v16  ;;  %v839_v61 = vrot.slane %v835_v7, 4 }
  0xc7   : > { %1679 = vst.msk [vmem:[#allocation3 + $0x10] sm:$0xff] %vm10810_vm7, %v1633_v3  ;;  %332 = vst [vmem:[#allocation2 + $0x84] sm:$0x1] %v331_v4  ;;  %1936 = vrot.lane.b32.xlu1 %v1899_v11, %s9015_s7  ;;  %v334_v30 = vsel %vm9074_vm3, 0, %v333_v0  ;;  %v9621_v3 = vld [vmem:[%s10805_s2] ss:$0 sm:$0xff] }
  0xc8   : > { %1969 = vst.msk [vmem:[#allocation3 + $0x10] sm:$0xff] %vm10811_vm11, %v9503_v32  ;;  %v8608_v32 = vld [vmem:[#allocation2 + $0x6c] sm:$0xfe]   ;;  %v841_v53 = vshrl.u32 %v8303_v41, 16  ;;  %v844_v54 = vshll.u32 %v8303_v41, 16  ;;  %v9624_v35 = vadd.f32 %v9621_v3, %v437_v24 }
  0xc9   : > { %2146 = vst.msk [vmem:[#allocation3 + $0x10] sm:$0xff] %vm10812_vm12, %v9462_v14  ;;  %v1635_v49 = vpop.permute.xlu1 %1634  ;;  %v386_v14 = vld [vmem:[#allocation2 + $0x8c] sm:$0x1]  ;;  %v2793_v58 = vrot.slane %v8608_v32, 1  ;;  %335 = vst [vmem:[#allocation2 + $0x90] sm:$0x1] %v334_v30 }
  0xca   : > { %1680 = vst.msk [vmem:[#allocation3 + $0x18] sm:$0xff] %vm10810_vm7, %v1635_v49  ;;  %v843_v59 = vrot.slane %v841_v53, 7  ;;  %vm505_vm7 = vcmp.gt.f32.partialorder %v9547_v36, 0.0  ;;  %v2533_v51 = vpop.permute.xlu0 %2532  ;;  %v387_v10 = vsel %vm9084_vm5, 0, %v386_v14  ;;  %v9636_v32 = vmul.f32 0.01, %v9624_v35 }
  0xcb   : > { %3478 = vst.msk [vmem:[#allocation3 + $0x8] sm:$0xff] %vm3476_vm14, %v9520_v62  ;;  %3477 = vst.msk [vmem:[#allocation3] sm:$0xff] %vm3476_vm14, %v3429_v57  ;;  %v2443_v62 = vsel %vm1435_vm9, %v2438_v47, %v2442_v46  ;;  %v539_v57 = vmul.f32 0.01, %v9563_v31  ;;  %v337_v49 = vsel %vm9074_vm3, 0, %v336_v44 }
  0xcc   : > { %1970 = vst.msk [vmem:[#allocation3 + $0x18] sm:$0xff] %vm10811_vm11, %v9499_v27  ;;  %v838_v27 = vor.u32 %v836_v45, %v835_v7  ;;  %vm506_vm11 = vcmp.gt.f32.partialorder %v9558_v21, 0.0  ;;  %v846_v2 = vor.u32 %v844_v54, %v843_v59  ;;  %v848_v5 = vrot.slane %v843_v59, 4  ;;  %2544 = vrot.lane.b32.xlu0 %v2443_v62, %s9021_s13  ;;  %388 = vst [vmem:[#allocation2 + $0x8c] sm:$0x1] %v387_v10  ;;  %v8672_v45 = vld [vmem:[#allocation2 + $0x48] sm:$0xff]  }
  0xcd   : > { %3767 = vst.msk [vmem:[#allocation3 + $0x8] sm:$0xff] %vm10816_vm8, %v9488_v63  ;;  %3766 = vst.msk [vmem:[#allocation3] sm:$0xff] %vm10816_vm8, %v9480_v43  ;;  %v2535_v63 = vpop.permute.xlu1 %2534  ;;  %v537_v43 = vmul.f32 0.01, %v9547_v36  ;;  %v570_v23 = vsel %vm506_vm11, %v9558_v21, %v538_v9  ;;  %vm507_vm11 = vcmp.gt.f32.partialorder %v9563_v31, 0.0 }
  0xce   : > { %2147 = vst.msk [vmem:[#allocation3 + $0x18] sm:$0xff] %vm10812_vm12, %v9465_v33  ;;  %v2795_v33 = vsel %vm1869_vm6, %v2793_v58, %v2794_v60  ;;  %v1066_v8 = vsel %vm9158_vm15, %v838_v27, %v1065_v55  ;;  %vm10813_vm12 = vcmask 1041408   ;;  %v847_v15 = vsel %vm9165_vm1, %v839_v61, %v846_v2  ;;  %v2822_v19 = vpop.permute.xlu0 %2821  ;;  %v1072_v48 = vld [vmem:[#allocation2 + $0x84] sm:$0xf]  ;;  %338 = vst [vmem:[#allocation2 + $0x9c] sm:$0x1] %v337_v49 }
  0xcf   : > { %2579 = vst.msk [vmem:[#allocation3 + $0x10] sm:$0xff] %vm2576_vm13, %v2533_v51  ;;  %2580 = vst.msk [vmem:[#allocation3 + $0x18] sm:$0xff] %vm2576_vm13, %v2535_v63  ;;  %v1070_v26 = vsel %vm9074_vm3, %v848_v5, %v1069_v56  ;;  %v569_v17 = vsel %vm505_vm7, %v9547_v36, %v537_v43  ;;  %8462 = vmatprep.subr.msk.bf16.mxu0 %vm10813_vm12, %v8629_v50  ;;  %v3876_v18 = vsel %vm10813_vm12, %v8629_v50, 0  ;;  %vm3825_vm7 = vcmask 293888   ;;  %v8647_v36 = vld [vmem:[#allocation2 + $0x3c] sm:$0xff]  }
  0xd0   : > { %1067 = vst [vmem:[#allocation2 + $0x78] sm:$0xf] %v1066_v8  ;;  %1068 = vst.msk [vmem:[#allocation2 + $0x7c] sm:$0xf] %vm10815_vm0, %v847_v15  ;;  %v8304_v28 = vpack.c.bf16 %v569_v17, %v569_v17  ;;  %8391 = vmatpush3.bf16.msra.mxu0 %v3876_v18  ;;  %2833 = vrot.lane.b32.xlu0 %v2795_v33, %s9019_s11  ;;  %v8305_v34 = vpack.c.bf16 %v570_v23, %v570_v23  ;;  %vm10826_vm12 = vcmask 97344  }
  0xd1   : > { %1071 = vst [vmem:[#allocation2 + $0x80] sm:$0x1] %v1070_v26  ;;  %2868 = vst.msk [vmem:[#allocation3 + $0x10] sm:$0xff] %vm2865_vm2, %v2822_v19  ;;  %v2824_v29 = vpop.permute.xlu1 %2823  ;;  %v571_v46 = vsel %vm507_vm11, %v9563_v31, %v539_v57  ;;  %vm508_vm11 = vcmp.gt.f32.partialorder %v9624_v35, 0.0 }
  0xd2   : > { %2869 = vst.msk [vmem:[#allocation3 + $0x18] sm:$0xff] %vm2865_vm2, %v2824_v29  ;;  %v850_v37 = vshrl.u32 %v8304_v28, 16  ;;  %v853_v38 = vshll.u32 %v8304_v28, 16  ;;  %v858_v40 = vshrl.u32 %v8305_v34, 16  ;;  %v861_v16 = vshll.u32 %v8305_v34, 16  ;;  %v3000_v41 = vpop.permute.xlu0 %2999 }
  0xd3   : > { %1248 = vst.msk [vmem:[#allocation3 + $0x28] sm:$0xff] %vm10814_vm4, %v8647_v36  ;;  %1249 = vst.msk [vmem:[#allocation3 + $0x30] sm:$0xff] %vm10814_vm4, %v8672_v45  ;;  %v9651_v61 = vpack.c.bf16 %v571_v46, %v571_v46  ;;  %v1076_v8 = vld [vmem:[#allocation2 + $0x8c] sm:$0x1]  ;;  %vm10827_vm4 = vcmask 130144  }
  0xd4   : > { %v3782_v39 = vld [vmem:[#allocation3] sm:$0xff]  ;;  %v3783_v11 = vld [vmem:[#allocation3 + $0x8] sm:$0xff]  ;;  %v852_v21 = vrot.slane %v850_v37, 7  ;;  %3046 = vst.msk [vmem:[#allocation3 + $0x10] sm:$0xff] %vm3043_vm10, %v3000_v41  ;;  %v860_v47 = vrot.slane %v858_v40, 7  ;;  %v278_v46 = vld [vmem:[%s9107_s28 + $0xc8] sm:$0xff] }
  0xd5   : > { %8392 = vmatprep.mubr.msk.bf16.mxu0 %vm3825_vm7, %v3782_v39  ;;  %v867_v18 = vshrl.u32 %v9651_v61, 16  ;;  %v3002_v23 = vpop.permute.xlu1 %3001 }
  0xd6   : > { %8393 = vmatmul.mubr.msk.bf16.vlgmr.msra.gmra.mrb[0].mxu0 %vm3825_vm7, %v3783_v11  ;;  %v855_v52 = vor.u32 %v853_v38, %v852_v21  ;;  %v856_v54 = vrot.slane %v852_v21, 4  ;;  %v863_v55 = vor.u32 %v861_v16, %v860_v47  ;;  %v3433_v42 = vpop.permute.xlu0 %3432  ;;  %v865_v2 = vrot.slane %v860_v47, 4  ;;  %3047 = vst.msk [vmem:[#allocation3 + $0x18] sm:$0xff] %vm3043_vm10, %v3002_v23 }
  0xd7   : > { %v8603_v53 = vld [vmem:[#allocation2 + $0x78] sm:$0xff]   ;;  %3479 = vst.msk [vmem:[#allocation3 + $0x10] sm:$0xff] %vm3476_vm14, %v3433_v42 }
  0xd8   : > { %v8606_v14 = vld [vmem:[#allocation2 + $0x78] sm:$0xff]   ;;  %v8607_v24 = vld [vmem:[#allocation2 + $0x80] ss:$0 sps:$4 sm:$0x11]   ;;  %v1073_v7 = vsel %vm9158_vm15, %v855_v52, %v1072_v48  ;;  %2113 = vrot.lane.b32.xlu1 %v8603_v53, %s9017_s9  ;;  %v864_v58 = vsel %vm9165_vm1, %v856_v54, %v863_v55  ;;  %v1077_v15 = vsel %vm9074_vm3, %v865_v2, %v1076_v8 }
  0xd9   : > { %v8610_v56 = vld [vmem:[#allocation2 + $0x78] sm:$0xfe]   ;;  %1074 = vst [vmem:[#allocation2 + $0x84] sm:$0xf] %v1073_v7  ;;  %v2445_v59 = vshrl.u32 %v8606_v14, 16  ;;  %v2447_v60 = vshll.u32 %v8606_v14, 16  ;;  %v572_v7 = vsel %vm508_vm11, %v9624_v35, %v9636_v32 }
  0xda   : > { %v2452_v4 = vshll.u32 %v8607_v24, 16  ;;  %v8611_v51 = vld [vmem:[#allocation2 + $0x80] ss:$0 sps:$4 sm:$0x11]   ;;  %1075 = vst.msk [vmem:[#allocation2 + $0x88] sm:$0xf] %vm10815_vm0, %v864_v58  ;;  %v3722_v62 = vpop.permute.xlu0 %3721 }
  0xdb   : > { %v8613_v27 = vld [vmem:[#allocation2 + $0x78] sm:$0xff]   ;;  %v2449_v31 = vrot.slane %v2447_v60, 1  ;;  %v2796_v0 = vrot.slane %v8610_v56, 1  ;;  %3768 = vst.msk [vmem:[#allocation3 + $0x10] sm:$0xff] %vm10816_vm8, %v3722_v62  ;;  %v2797_v5 = vrot.slane %v8611_v51, 1  ;;  %v277_v52 = vld [vmem:[%s9107_s28 + $0xc0] sm:$0xff]  ;;  %v3435_v60 = vpop.permute.xlu1 %3434 }
  0xdc   : > { %v2454_v63 = vrot.slane %v2452_v4, 1  ;;  %3011 = vrot.lane.b32.xlu0 %v8613_v27, %s9018_s10  ;;  %v8616_v33 = vld [vmem:[#allocation2 + $0x78] sm:$0xff]   ;;  %v8617_v50 = vld [vmem:[#allocation2 + $0x80] ss:$0 sps:$4 sm:$0x11]   ;;  %3480 = vst.msk [vmem:[#allocation3 + $0x18] sm:$0xff] %vm3476_vm14, %v3435_v60 }
  0xdd   : > { %v2450_v43 = vor.u32 %v2449_v31, %v2445_v59  ;;  %v8625_v9 = vld [vmem:[#allocation2 + $0x78] sm:$0xff]   ;;  %v3333_v10 = vshrl.u32 %v8616_v33, 16  ;;  %v3335_v13 = vshll.u32 %v8616_v33, 16  ;;  %v3340_v17 = vshll.u32 %v8617_v50, 16  ;;  %1078 = vst [vmem:[#allocation2 + $0x8c] sm:$0x1] %v1077_v15 }
  0xde   : > { %v1557_v22 = vshrl.u32 %v8625_v9, 16  ;;  %v2798_v28 = vsel %vm1869_vm6, %v2796_v0, %v2797_v5  ;;  %v8622_v34 = vld [vmem:[#allocation2 + $0x78] sm:$0xfe]   ;;  %v8623_v38 = vld [vmem:[#allocation2 + $0x80] ss:$0 sps:$4 sm:$0x11]   ;;  %v3724_v54 = vpop.permute.xlu0 %3723 }
  0xdf   : > { %v2455_v26 = vsel %vm1435_vm9, %v2450_v43, %v2454_v63  ;;  %v3337_v19 = vrot.slane %v3335_v13, 1  ;;  %v3342_v29 = vrot.slane %v3340_v17, 1  ;;  %v1559_v39 = vshll.u32 %v8625_v9, 16  ;;  %v8626_v57 = vld [vmem:[#allocation2 + $0x80] ss:$0 sps:$4 sm:$0x11]  }
  0xe0   : > { %2546 = vrot.lane.b32.xlu1 %v2455_v26, %s9021_s13  ;;  %v3693_v16 = vrot.slane %v8622_v34, 1  ;;  %v3694_v21 = vrot.slane %v8623_v38, 1  ;;  %v1564_v49 = vshll.u32 %v8626_v57, 16  ;;  %v8307_v63 = vpack.c.bf16 %v572_v7, %v572_v7  ;;  %3769 = vst.msk [vmem:[#allocation3 + $0x18] sm:$0xff] %vm10816_vm8, %v3724_v54  ;;  %v9682_v35 = vld [vmem:[%s10804_s1] ss:$0 sm:$0xff]  ;;  %v1637_v26 = vpop.permute.xlu1 %1636 }
  0xe1   : > { %v8619_v30 = vld [vmem:[#allocation2 + $0x84] sm:$0xff]   ;;  %v3338_v37 = vor.u32 %v3337_v19, %v3333_v10  ;;  %v1561_v45 = vrot.slane %v1559_v39, 1  ;;  %v9676_v0 = vrot.slane %v867_v18, 7  ;;  %v438_v32 = vmul.f32 %v9682_v35, %v277_v52  ;;  %v279_v5 = vld [vmem:[%s9107_s28 + $0xd0] sm:$0xff]  ;;  %v8632_v8 = vld [vmem:[#allocation2 + $0x78] sm:$0xfe]  }
  0xe2   : > { %v8614_v36 = vld [vmem:[#allocation2 + $0x84] sm:$0xff]   ;;  %v3345_v25 = vshrl.u32 %v8619_v30, 16  ;;  %v3347_v40 = vshll.u32 %v8619_v30, 16  ;;  %v3695_v48 = vsel %vm1869_vm6, %v3693_v16, %v3694_v21  ;;  %v1566_v14 = vrot.slane %v1564_v49, 1  ;;  %v1927_v2 = vpop.permute.xlu0 %1926  ;;  %v1083_v52 = vld [vmem:[#allocation2 + $0x98] sm:$0x1] }
  0xe3   : > { %v8630_v11 = vld [vmem:[#allocation2 + $0x84] sm:$0xff]   ;;  %v3343_v41 = vsel %vm1435_vm9, %v3338_v37, %v3342_v29  ;;  %v1562_v56 = vor.u32 %v1561_v45, %v1557_v22  ;;  %v870_v9 = vshll.u32 %v9651_v61, 16  ;;  %v8633_v13 = vld [vmem:[#allocation2 + $0x80] ss:$0 sps:$4 sm:$0x11]   ;;  %v873_v15 = vrot.slane %v9676_v0, 4 }
  0xe4   : > { %2835 = vrot.lane.b32.xlu1 %v2798_v28, %s9019_s11  ;;  %3444 = vrot.lane.b32.xlu0 %v3343_v41, %s9022_s14  ;;  %v3349_v44 = vrot.slane %v3347_v40, 1  ;;  %v8620_v47 = vld [vmem:[#allocation2 + $0x8c] ss:$0 sps:$4 sm:$0x11]   ;;  %v8627_v53 = vld [vmem:[#allocation2 + $0x84] sm:$0xfe]   ;;  %v439_v17 = vmul.f32 %v9682_v35, %v278_v46  ;;  %v9697_v30 = vadd.f32 %v9621_v3, %v438_v32  ;;  %v440_v39 = vmul.f32 %v9682_v35, %v279_v5  ;;  %v1639_v41 = vpop.permute.xlu1 %1638 }
  0xe5   : > { %v3352_v42 = vshll.u32 %v8620_v47, 16  ;;  %v8628_v24 = vld [vmem:[#allocation2 + $0x8c] ss:$0 sps:$4 sm:$0x11]   ;;  %v3696_v58 = vrot.slane %v8627_v53, 1  ;;  %v1571_v59 = vshll.u32 %v8630_v11, 16  ;;  %v1567_v10 = vsel %vm1435_vm9, %v1562_v56, %v1566_v14 }
  0xe6   : > { %v3350_v55 = vor.u32 %v3349_v44, %v3345_v25  ;;  %v3697_v51 = vrot.slane %v8628_v24, 1  ;;  %v8631_v27 = vld [vmem:[#allocation2 + $0x8c] ss:$0 sps:$4 sm:$0x11]   ;;  %v1569_v62 = vshrl.u32 %v8630_v11, 16  ;;  %v1900_v22 = vrot.slane %v8632_v8, 1  ;;  %v2104_v34 = vpop.permute.xlu0 %2103 }
  0xe7   : > { %v3354_v4 = vrot.slane %v3352_v42, 1  ;;  %v1573_v31 = vrot.slane %v1571_v59, 1  ;;  %v1576_v50 = vshll.u32 %v8631_v27, 16  ;;  %v872_v23 = vor.u32 %v870_v9, %v9676_v0  ;;  %v8634_v28 = vld [vmem:[#allocation2 + $0x84] sm:$0xfe]  }
  0xe8   : > { %3013 = vrot.lane.b32.xlu1 %v8614_v36, %s9018_s10  ;;  %3733 = vrot.lane.b32.xlu0 %v3695_v48, %s9020_s12  ;;  %v3698_v43 = vsel %vm1869_vm6, %v3696_v58, %v3697_v51  ;;  %vm10825_vm11 = vcmask 64544   ;;  %v1901_v61 = vrot.slane %v8633_v13, 1  ;;  %v8635_v29 = vld [vmem:[#allocation2 + $0x8c] ss:$0 sps:$4 sm:$0x11]   ;;  %v8636_v36 = vld [vmem:[#allocation2 + $0x84] sm:$0xff]   ;;  %v478_v21 = vadd.f32 %v9621_v3, %v439_v17  ;;  %v1929_v56 = vpop.permute.xlu1 %1928 }
  0xe9   : > { %v3355_v33 = vsel %vm1435_vm9, %v3350_v55, %v3354_v4  ;;  %v1574_v18 = vor.u32 %v1573_v31, %v1569_v62  ;;  %v1578_v19 = vrot.slane %v1576_v50, 1  ;;  %1681 = vst.msk [vmem:[#allocation3 + $0x20] sm:$0xff] %vm10825_vm11, %v1637_v26  ;;  %v875_v37 = vshrl.u32 %v8307_v63, 16  ;;  %v1079_v11 = vld [vmem:[#allocation2 + $0x90] sm:$0xf]  ;;  %v8638_v47 = vld [vmem:[#allocation2 + $0x84] sm:$0xff]  }
  0xea   : > { %1971 = vst.msk [vmem:[#allocation3 + $0x20] sm:$0xff] %vm10826_vm12, %v1927_v2  ;;  %v878_v38 = vshll.u32 %v8307_v63, 16  ;;  %v1902_v25 = vsel %vm1869_vm6, %v1900_v22, %v1901_v61  ;;  %v1903_v40 = vrot.slane %v8634_v28, 1  ;;  %v1904_v16 = vrot.slane %v8635_v29, 1  ;;  %v392_v48 = vld [vmem:[#allocation2 + $0xa4] sm:$0x1]  ;;  %v2537_v7 = vpop.permute.xlu0 %2536 }
  0xeb   : > { %2148 = vst.msk [vmem:[#allocation3 + $0x20] sm:$0xff] %vm10827_vm4, %v2104_v34  ;;  %v1579_v57 = vsel %vm1435_vm9, %v1574_v18, %v1578_v19  ;;  %v877_v44 = vrot.slane %v875_v37, 7  ;;  %v1080_v45 = vsel %vm9158_vm15, %v872_v23, %v1079_v11  ;;  %vm10828_vm4 = vmmov %vm10825_vm11  ;;  %v8639_v49 = vld [vmem:[#allocation2 + $0x8c] ss:$0 sps:$4 sm:$0x11]   ;;  %vm509_vm12 = vcmp.gt.f32.partialorder %v9697_v30, 0.0 }
  0xec   : > { %3446 = vrot.lane.b32.xlu1 %v3355_v33, %s9022_s14  ;;  %3735 = vrot.lane.b32.xlu0 %v3698_v43, %s9020_s12  ;;  %1682 = vst.msk [vmem:[#allocation3 + $0x28] sm:$0xff] %vm10828_vm4, %v1639_v41  ;;  %1081 = vst [vmem:[#allocation2 + $0x90] sm:$0xf] %v1080_v45  ;;  %v339_v53 = vld [vmem:[#allocation2 + $0xa8] sm:$0x1]  ;;  %v2457_v42 = vshrl.u32 %v8638_v47, 16  ;;  %v9715_v58 = vadd.f32 %v9621_v3, %v440_v39  ;;  %v1905_v59 = vsel %vm1869_vm6, %v1903_v40, %v1904_v16  ;;  %v2106_v13 = vpop.permute.xlu1 %2105 }
  0xed   : > { %v880_v54 = vor.u32 %v878_v38, %v877_v44  ;;  %v882_v55 = vrot.slane %v877_v44, 4  ;;  %v2459_v14 = vshll.u32 %v8638_v47, 16  ;;  %v3784_v24 = vld [vmem:[#allocation3 + $0x10] sm:$0xff]  ;;  %v2464_v46 = vshll.u32 %v8639_v49, 16  ;;  %2581 = vst.msk [vmem:[#allocation3 + $0x20] sm:$0xff] %vm2576_vm13, %v2537_v7  ;;  %v3785_v43 = vld [vmem:[#allocation3 + $0x18] sm:$0xff] }
  0xee   : > { %vm510_vm11 = vcmp.gt.f32.partialorder %v478_v21, 0.0  ;;  %8396 = vmatprep.mubr.msk.bf16.mxu0 %vm3825_vm7, %v3784_v24  ;;  %v8643_v27 = vld [vmem:[#allocation2 + $0x84] sm:$0xfe]   ;;  %v8644_v62 = vld [vmem:[#allocation2 + $0x8c] ss:$0 sps:$4 sm:$0x11]   ;;  %v2826_v50 = vpop.permute.xlu0 %2825 }
  0xef   : > { %v881_v60 = vsel %vm9165_vm1, %v873_v15, %v880_v54  ;;  %v2461_v4 = vrot.slane %v2459_v14, 1  ;;  %v1084_v51 = vsel %vm9074_vm3, %v882_v55, %v1083_v52  ;;  %vm10829_vm4 = vcmask 97344   ;;  %8397 = vmatmul.mubr.msk.bf16.gmra.mrb[4].mxu0 %vm3825_vm7, %v3785_v43  ;;  %2870 = vst.msk [vmem:[#allocation3 + $0x20] sm:$0xff] %vm2865_vm2, %v2826_v50  ;;  %v280_v61 = vld [vmem:[%s9107_s28 + $0xd8] sm:$0xff] }
  0xf0   : > { %1648 = vrot.lane.b32.xlu1 %v1567_v10, %s9016_s8  ;;  %1938 = vrot.lane.b32.xlu0 %v1902_v25, %s9015_s7  ;;  %1972 = vst.msk [vmem:[#allocation3 + $0x28] sm:$0xff] %vm10829_vm4, %v1929_v56  ;;  %v2466_v31 = vrot.slane %v2464_v46, 1  ;;  %1085 = vst [vmem:[#allocation2 + $0x98] sm:$0x1] %v1084_v51  ;;  %v541_v63 = vmul.f32 0.01, %v9697_v30  ;;  %v2539_v38 = vpop.permute.xlu1 %2538  ;;  %v441_v11 = vmul.f32 %v9682_v35, %v280_v61 }
  0xf1   : > { %1082 = vst.msk [vmem:[#allocation2 + $0x94] sm:$0xf] %vm10815_vm0, %v881_v60  ;;  %v542_v0 = vmul.f32 0.01, %v478_v21  ;;  %v393_v32 = vsel %vm9084_vm5, 0, %v392_v48  ;;  %v2462_v2 = vor.u32 %v2461_v4, %v2457_v42  ;;  %v2799_v5 = vrot.slane %v8643_v27, 1 }
  0xf2   : > { %v2800_v33 = vrot.slane %v8644_v62, 1  ;;  %394 = vst [vmem:[#allocation2 + $0xa4] sm:$0x1] %v393_v32  ;;  %v340_v8 = vsel %vm9074_vm3, 0, %v339_v53  ;;  %v573_v9 = vsel %vm509_vm12, %v9697_v30, %v541_v63  ;;  %vm10830_vm4 = vcmask 130144   ;;  %v3004_v23 = vpop.permute.xlu0 %3003 }
  0xf3   : > { %v574_v10 = vsel %vm510_vm11, %v478_v21, %v542_v0  ;;  %341 = vst [vmem:[#allocation2 + $0xa8] sm:$0x1] %v340_v8  ;;  %v2467_v15 = vsel %vm1435_vm9, %v2462_v2, %v2466_v31  ;;  %v8308_v26 = vpack.c.bf16 %v573_v9, %v573_v9  ;;  %2149 = vst.msk [vmem:[#allocation3 + $0x28] sm:$0xff] %vm10830_vm4, %v2106_v13  ;;  %vm511_vm12 = vcmp.gt.f32.partialorder %v9715_v58, 0.0  ;;  %v1086_v30 = vld [vmem:[#allocation2 + $0x9c] sm:$0xf] }
  0xf4   : > { %1650 = vrot.lane.b32.xlu1 %v1579_v57, %s9016_s8  ;;  %2115 = vrot.lane.b32.xlu0 %v8636_v36, %s9017_s9  ;;  %v8309_v17 = vpack.c.bf16 %v574_v10, %v574_v10  ;;  %v2801_v18 = vsel %vm1869_vm6, %v2799_v5, %v2800_v33  ;;  %3048 = vst.msk [vmem:[#allocation3 + $0x20] sm:$0xff] %vm3043_vm10, %v3004_v23  ;;  %v543_v34 = vmul.f32 0.01, %v9715_v58  ;;  %v2828_v53 = vpop.permute.xlu1 %2827  ;;  %vm10831_vm4 = vcmask 64544  }
  0xf5   : > { %v884_v19 = vshrl.u32 %v8308_v26, 16  ;;  %v887_v22 = vshll.u32 %v8308_v26, 16  ;;  %2582 = vst.msk [vmem:[#allocation3 + $0x28] sm:$0xff] %vm2576_vm13, %v2539_v38 }
  0xf6   : > { %v892_v28 = vshrl.u32 %v8309_v17, 16  ;;  %v895_v29 = vshll.u32 %v8309_v17, 16  ;;  %v3437_v54 = vpop.permute.xlu0 %3436  ;;  %2871 = vst.msk [vmem:[#allocation3 + $0x28] sm:$0xff] %vm2865_vm2, %v2828_v53  ;;  %v575_v5 = vsel %vm511_vm12, %v9715_v58, %v543_v34  ;;  %vm10832_vm12 = vcmask 97344  }
  0xf7   : > { %v886_v37 = vrot.slane %v884_v19, 7  ;;  %v8641_v25 = vld [vmem:[#allocation2 + $0x98] ss:$0 sps:$4 sm:$0x11]   ;;  %3481 = vst.msk [vmem:[#allocation3 + $0x20] sm:$0xff] %vm3476_vm14, %v3437_v54 }
  0xf8   : > { %1940 = vrot.lane.b32.xlu1 %v1905_v59, %s9015_s7  ;;  %2548 = vrot.lane.b32.xlu0 %v2467_v15, %s9021_s13  ;;  %v8637_v36 = vld [vmem:[#allocation2 + $0x90] sm:$0xff]   ;;  %v2476_v57 = vshll.u32 %v8641_v25, 16  ;;  %v8646_v44 = vld [vmem:[#allocation2 + $0x98] ss:$0 sps:$4 sm:$0x11]   ;;  %v894_v49 = vrot.slane %v892_v28, 7  ;;  %v480_v59 = vadd.f32 %v9621_v3, %v441_v11  ;;  %v3006_v2 = vpop.permute.xlu1 %3005 }
  0xf9   : > { %v8640_v39 = vld [vmem:[#allocation2 + $0x90] sm:$0xff]   ;;  %v889_v16 = vor.u32 %v887_v22, %v886_v37  ;;  %v890_v48 = vrot.slane %v886_v37, 4  ;;  %v2803_v14 = vrot.slane %v8646_v44, 1  ;;  %v8651_v56 = vld [vmem:[#allocation2 + $0x98] ss:$0 sps:$4 sm:$0x11]  }
  0xfa   : > { %v8645_v40 = vld [vmem:[#allocation2 + $0x90] sm:$0xfe]   ;;  %v2469_v41 = vshrl.u32 %v8640_v39, 16  ;;  %v2471_v21 = vshll.u32 %v8640_v39, 16  ;;  %v2478_v42 = vrot.slane %v2476_v57, 1  ;;  %v897_v7 = vor.u32 %v895_v29, %v894_v49  ;;  %v3726_v33 = vpop.permute.xlu0 %3725  ;;  %3049 = vst.msk [vmem:[#allocation3 + $0x28] sm:$0xff] %vm3043_vm10, %v3006_v2 }
  0xfb   : > { %v2802_v45 = vrot.slane %v8645_v40, 1  ;;  %v8648_v47 = vld [vmem:[#allocation2 + $0x90] sm:$0xff]   ;;  %v1087_v52 = vsel %vm9158_vm15, %v889_v16, %v1086_v30  ;;  %v899_v46 = vrot.slane %v894_v49, 4  ;;  %v1090_v27 = vld [vmem:[#allocation2 + $0xa4] sm:$0x1]  ;;  %v3364_v31 = vshll.u32 %v8651_v56, 16 }
  0xfc   : > { %2837 = vrot.lane.b32.xlu0 %v2801_v18, %s9019_s11  ;;  %2117 = vrot.lane.b32.xlu1 %v8637_v36, %s9017_s9  ;;  %v2473_v55 = vrot.slane %v2471_v21, 1  ;;  %1088 = vst [vmem:[#allocation2 + $0x9c] sm:$0xf] %v1087_v52  ;;  %v8650_v24 = vld [vmem:[#allocation2 + $0x90] sm:$0xff]   ;;  %v898_v62 = vsel %vm9165_vm1, %v890_v48, %v897_v7  ;;  %3770 = vst.msk [vmem:[#allocation3 + $0x20] sm:$0xff] %vm10816_vm8, %v3726_v33  ;;  %vm512_vm11 = vcmp.gt.f32.partialorder %v480_v59, 0.0  ;;  %v3439_v22 = vpop.permute.xlu1 %3438 }
  0xfd   : > { %v3357_v4 = vshrl.u32 %v8650_v24, 16  ;;  %v3359_v51 = vshll.u32 %v8650_v24, 16  ;;  %v1091_v63 = vsel %vm9074_vm3, %v899_v46, %v1090_v27  ;;  %v8654_v0 = vld [vmem:[#allocation2 + $0x90] sm:$0xfe]   ;;  %1089 = vst.msk [vmem:[#allocation2 + $0xa0] sm:$0xf] %vm10815_vm0, %v898_v62  ;;  %v2804_v58 = vsel %vm1869_vm6, %v2802_v45, %v2803_v14 }
  0xfe   : > { %v2474_v60 = vor.u32 %v2473_v55, %v2469_v41  ;;  %v8656_v32 = vld [vmem:[#allocation2 + $0x90] sm:$0xff]   ;;  %1092 = vst [vmem:[#allocation2 + $0xa4] sm:$0x1] %v1091_v63  ;;  %v8655_v8 = vld [vmem:[#allocation2 + $0x98] ss:$0 sps:$4 sm:$0x11]   ;;  %v8310_v18 = vpack.c.bf16 %v575_v5, %v575_v5  ;;  %v3728_v23 = vpop.permute.xlu0 %3727 }
  0xff   : > { %v3361_v50 = vrot.slane %v3359_v51, 1  ;;  %v3366_v9 = vrot.slane %v3364_v31, 1  ;;  %v3699_v10 = vrot.slane %v8654_v0, 1  ;;  %v1583_v13 = vshll.u32 %v8656_v32, 16  ;;  %3482 = vst.msk [vmem:[#allocation3 + $0x28] sm:$0xff] %vm3476_vm14, %v3439_v22 }
 0x100   : > { %3015 = vrot.lane.b32.xlu0 %v8648_v47, %s9018_s10  ;;  %v2479_v43 = vsel %vm1435_vm9, %v2474_v60, %v2478_v42  ;;  %v3700_v26 = vrot.slane %v8655_v8, 1  ;;  %v8657_v17 = vld [vmem:[#allocation2 + $0x98] ss:$0 sps:$4 sm:$0x11]   ;;  %v544_v19 = vmul.f32 0.01, %v480_v59  ;;  %v1641_v16 = vpop.permute.xlu1 %1640 }
 0x101   : > { %2550 = vrot.lane.b32.xlu1 %v2479_v43, %s9021_s13  ;;  %v3362_v15 = vor.u32 %v3361_v50, %v3357_v4  ;;  %v1581_v28 = vshrl.u32 %v8656_v32, 16  ;;  %v1585_v29 = vrot.slane %v1583_v13, 1  ;;  %v8662_v30 = vld [vmem:[#allocation2 + $0x90] sm:$0xfe]   ;;  %3771 = vst.msk [vmem:[#allocation3 + $0x28] sm:$0xff] %vm10816_vm8, %v3728_v23  ;;  %v1588_v36 = vshll.u32 %v8657_v17, 16 }
 0x102   : > { %v3701_v34 = vsel %vm1869_vm6, %v3699_v10, %v3700_v26  ;;  %v901_v37 = vshrl.u32 %v8310_v18, 16  ;;  %v904_v38 = vshll.u32 %v8310_v18, 16  ;;  %v8663_v25 = vld [vmem:[#allocation2 + $0x98] ss:$0 sps:$4 sm:$0x11]   ;;  %v1906_v40 = vrot.slane %v8662_v30, 1  ;;  %v1931_v11 = vpop.permute.xlu0 %1930 }
 0x103   : > { %v3367_v61 = vsel %vm1435_vm9, %v3362_v15, %v3366_v9  ;;  %v576_v57 = vsel %vm512_vm11, %v480_v59, %v544_v19  ;;  %1683 = vst.msk [vmem:[#allocation3 + $0x30] sm:$0xff] %vm10831_vm4, %v1641_v16  ;;  %v1586_v7 = vor.u32 %v1585_v29, %v1581_v28  ;;  %vm10833_vm11 = vcmask 130144   ;;  %v395_v5 = vld [vmem:[#allocation2 + $0xb0] sm:$0x1]  ;;  %v1093_v10 = vld [vmem:[#allocation2 + $0xa8] sm:$0xf] }
 0x104   : > { %3448 = vrot.lane.b32.xlu0 %v3367_v61, %s9022_s14  ;;  %v8649_v39 = vld [vmem:[#allocation2 + $0x9c] sm:$0xff]   ;;  %1973 = vst.msk [vmem:[#allocation3 + $0x30] sm:$0xff] %vm10832_vm12, %v1931_v11  ;;  %v8311_v54 = vpack.c.bf16 %v576_v57, %v576_v57  ;;  %v9779_v55 = vpop.permute.xlu1 %1642  ;;  %v1590_v59 = vrot.slane %v1588_v36, 1  ;;  %v1907_v51 = vrot.slane %v8663_v25, 1  ;;  %v903_v0 = vrot.slane %v901_v37, 7 }
 0x105   : > { %2839 = vrot.lane.b32.xlu1 %v2804_v58, %s9019_s11  ;;  %v8652_v41 = vld [vmem:[#allocation2 + $0x9c] sm:$0xff]   ;;  %v8653_v21 = vld [vmem:[#allocation2 + $0xa4] ss:$0 sps:$4 sm:$0x11]   ;;  %vm10834_vm4 = vcmask 31744   ;;  %vm10835_vm12 = vcmask 64544  }
 0x106   : > { %v8658_v44 = vld [vmem:[#allocation2 + $0x9c] sm:$0xfe]   ;;  %v3369_v45 = vshrl.u32 %v8652_v41, 16  ;;  %v3371_v47 = vshll.u32 %v8652_v41, 16  ;;  %v3376_v48 = vshll.u32 %v8653_v21, 16  ;;  %v2108_v42 = vpop.permute.xlu0 %2107  ;;  %v1908_v8 = vsel %vm1869_vm6, %v1906_v40, %v1907_v51 }
 0x107   : > { %v8659_v49 = vld [vmem:[#allocation2 + $0xa4] ss:$0 sps:$4 sm:$0x11]   ;;  %v3702_v52 = vrot.slane %v8658_v44, 1  ;;  %v8660_v53 = vld [vmem:[#allocation2 + $0x9c] sm:$0xff]   ;;  %2150 = vst.msk [vmem:[#allocation3 + $0x30] sm:$0xff] %vm10833_vm11, %v2108_v42  ;;  %v906_v9 = vor.u32 %v904_v38, %v903_v0  ;;  %v1591_v19 = vsel %vm1435_vm9, %v1586_v7, %v1590_v59 }
 0x108   : > { %3737 = vrot.lane.b32.xlu0 %v3701_v34, %s9020_s12  ;;  %v3373_v14 = vrot.slane %v3371_v47, 1  ;;  %v3378_v24 = vrot.slane %v3376_v48, 1  ;;  %v3703_v46 = vrot.slane %v8659_v49, 1  ;;  %v8661_v56 = vld [vmem:[#allocation2 + $0xa4] ss:$0 sps:$4 sm:$0x11]   ;;  %v1933_v13 = vpop.permute.xlu1 %1932 }
 0x109   : > { %3017 = vrot.lane.b32.xlu1 %v8649_v39, %s9018_s10  ;;  %v1593_v60 = vshrl.u32 %v8660_v53, 16  ;;  %v1595_v4 = vshll.u32 %v8660_v53, 16  ;;  %v1600_v31 = vshll.u32 %v8661_v56, 16  ;;  %v9783_v63 = vld [vmem:[#allocation2 + $0x9c] sm:$0xfe]   ;;  %v907_v26 = vrot.slane %v903_v0, 4 }
 0x10a   : > { %v3374_v27 = vor.u32 %v3373_v14, %v3369_v45  ;;  %v3704_v62 = vsel %vm1869_vm6, %v3702_v52, %v3703_v46  ;;  %v9786_v2 = vld [vmem:[#allocation2 + $0xa4] ss:$0 sps:$4 sm:$0x11]   ;;  %v2541_v33 = vpop.permute.xlu0 %2540  ;;  %v1909_v58 = vrot.slane %v9783_v63, 1  ;;  %v8666_v15 = vld [vmem:[#allocation2 + $0x9c] sm:$0xff]   ;;  %v909_v17 = vshrl.u32 %v8311_v54, 16 }
 0x10b   : > { %v1597_v32 = vrot.slane %v1595_v4, 1  ;;  %v1602_v50 = vrot.slane %v1600_v31, 1  ;;  %2583 = vst.msk [vmem:[#allocation3 + $0x30] sm:$0xff] %vm2576_vm13, %v2541_v33  ;;  %v8668_v18 = vld [vmem:[#allocation2 + $0x9c] sm:$0xff]   ;;  %v912_v23 = vshll.u32 %v8311_v54, 16  ;;  %v1094_v61 = vsel %vm9158_vm15, %v906_v9, %v1093_v10  ;;  %v8677_v39 = vld [vmem:[#allocation2 + $0x54] sm:$0xff]  }
 0x10c   : > { %3739 = vrot.lane.b32.xlu0 %v3704_v62, %s9020_s12  ;;  %v3379_v43 = vsel %vm1435_vm9, %v3374_v27, %v3378_v24  ;;  %v8669_v28 = vld [vmem:[#allocation2 + $0xa4] ss:$0 sps:$4 sm:$0x11]   ;;  %v911_v29 = vrot.slane %v909_v17, 7  ;;  %1095 = vst [vmem:[#allocation2 + $0xa8] sm:$0xf] %v1094_v61  ;;  %v2110_v48 = vpop.permute.xlu1 %2109 }
 0x10d   : > { %3450 = vrot.lane.b32.xlu1 %v3379_v43, %s9022_s14  ;;  %v1598_v22 = vor.u32 %v1597_v32, %v1593_v60  ;;  %v2481_v30 = vshrl.u32 %v8668_v18, 16  ;;  %v2483_v36 = vshll.u32 %v8668_v18, 16  ;;  %v2488_v37 = vshll.u32 %v8669_v28, 16  ;;  %v8673_v16 = vld [vmem:[#allocation2 + $0x9c] sm:$0xfe]   ;;  %1250 = vst.msk [vmem:[#allocation3 + $0x38] sm:$0xff] %vm10834_vm4, %v8677_v39 }
 0x10e   : > { %v2830_v34 = vpop.permute.xlu0 %2829  ;;  %v396_v38 = vsel %vm9084_vm5, 0, %v395_v5  ;;  %v1910_v25 = vrot.slane %v9786_v2, 1  ;;  %v914_v40 = vor.u32 %v912_v23, %v911_v29  ;;  %v281_v11 = vld [vmem:[%s9107_s28 + $0xe0] sm:$0xff]  ;;  %v282_v45 = vld [vmem:[%s9107_s28 + $0xe8] sm:$0xff]  ;;  %v2805_v52 = vrot.slane %v8673_v16, 1  ;;  %1684 = vst.msk [vmem:[#allocation3 + $0x38] sm:$0xff] %vm10835_vm12, %v9779_v55 }
 0x10f   : > { %2872 = vst.msk [vmem:[#allocation3 + $0x30] sm:$0xff] %vm2865_vm2, %v2830_v34  ;;  %397 = vst [vmem:[#allocation2 + $0xb0] sm:$0x1] %v396_v38  ;;  %v1603_v41 = vsel %vm1435_vm9, %v1598_v22, %v1602_v50  ;;  %v2485_v21 = vrot.slane %v2483_v36, 1  ;;  %v2490_v57 = vrot.slane %v2488_v37, 1  ;;  %v442_v47 = vmul.f32 %v9682_v35, %v281_v11  ;;  %v3786_v54 = vld [vmem:[#allocation3 + $0x20] sm:$0xff] }
 0x110   : > { %1942 = vrot.lane.b32.xlu0 %v1908_v8, %s9015_s7  ;;  %v8674_v44 = vld [vmem:[#allocation2 + $0xa4] ss:$0 sps:$4 sm:$0x11]   ;;  %v915_v49 = vsel %vm9165_vm1, %v907_v26, %v914_v40  ;;  %v443_v53 = vmul.f32 %v9682_v35, %v282_v45  ;;  %v342_v7 = vld [vmem:[#allocation2 + $0xb4] sm:$0x1]  ;;  %vm10836_vm11 = vcmask 97344   ;;  %8400 = vmatprep.mubr.msk.bf16.mxu0 %vm3825_vm7, %v3786_v54  ;;  %v1911_v62 = vsel %vm1869_vm6, %v1909_v58, %v1910_v25  ;;  %v2543_v10 = vpop.permute.xlu1 %2542 }
 0x111   : > { %1652 = vrot.lane.b32.xlu1 %v1591_v19, %s9016_s8  ;;  %1096 = vst.msk [vmem:[#allocation2 + $0xac] sm:$0xf] %vm10815_vm0, %v915_v49  ;;  %v2486_v14 = vor.u32 %v2485_v21, %v2481_v30  ;;  %v2806_v24 = vrot.slane %v8674_v44, 1  ;;  %v481_v46 = vadd.f32 %v9621_v3, %v442_v47  ;;  %v398_v56 = vld [vmem:[#allocation2 + $0xbc] sm:$0x1]  ;;  %v3787_v59 = vld [vmem:[#allocation3 + $0x28] sm:$0xff] }
 0x112   : > { %v3008_v42 = vpop.permute.xlu0 %3007  ;;  %1974 = vst.msk [vmem:[#allocation3 + $0x38] sm:$0xff] %vm10836_vm11, %v1933_v13  ;;  %v916_v55 = vrot.slane %v911_v29, 4  ;;  %v343_v60 = vsel %vm9074_vm3, 0, %v342_v7  ;;  %v482_v4 = vadd.f32 %v9621_v3, %v443_v53  ;;  %v399_v51 = vsel %vm9084_vm5, 0, %v398_v56  ;;  %8401 = vmatmul.mubr.msk.bf16.gmra.mrb[8].mxu0 %vm3825_vm7, %v3787_v59  ;;  %v345_v27 = vld [vmem:[#allocation2 + $0xc0] sm:$0x1] }
 0x113   : > { %3050 = vst.msk [vmem:[#allocation3 + $0x30] sm:$0xff] %vm3043_vm10, %v3008_v42  ;;  %vm10837_vm4 = vcmask 130144   ;;  %v2491_v31 = vsel %vm1435_vm9, %v2486_v14, %v2490_v57  ;;  %344 = vst [vmem:[#allocation2 + $0xb4] sm:$0x1] %v343_v60  ;;  %vm513_vm12 = vcmp.gt.f32.partialorder %v481_v46, 0.0  ;;  %v2807_v0 = vsel %vm1869_vm6, %v2805_v52, %v2806_v24 }
 0x114   : > { %2119 = vrot.lane.b32.xlu0 %v8666_v15, %s9017_s9  ;;  %2151 = vst.msk [vmem:[#allocation3 + $0x38] sm:$0xff] %vm10837_vm4, %v2110_v48  ;;  %400 = vst [vmem:[#allocation2 + $0xbc] sm:$0x1] %v399_v51  ;;  %vm514_vm11 = vcmp.gt.f32.partialorder %v482_v4, 0.0  ;;  %v545_v63 = vmul.f32 0.01, %v481_v46 }
 0x115   : > { %1654 = vrot.lane.b32.xlu1 %v1603_v41, %s9016_s8  ;;  %v546_v32 = vmul.f32 0.01, %v482_v4  ;;  %v346_v50 = vsel %vm9074_vm3, 0, %v345_v27  ;;  %2584 = vst.msk [vmem:[#allocation3 + $0x38] sm:$0xff] %vm2576_vm13, %v2543_v10  ;;  %v401_v40 = vld [vmem:[#allocation2 + $0xc8] sm:$0x1] }
 0x116   : > { %v1097_v3 = vld [vmem:[#allocation2 + $0xb0] sm:$0x1]  ;;  %v577_v5 = vsel %vm513_vm12, %v481_v46, %v545_v63  ;;  %347 = vst [vmem:[#allocation2 + $0xc0] sm:$0x1] %v346_v50  ;;  %v3441_v28 = vpop.permute.xlu0 %3440  ;;  %v402_v60 = vsel %vm9084_vm5, 0, %v401_v40  ;;  %v8702_v10 = vld [vmem:[#allocation2 + $0x60] sm:$0xff]  }
 0x117   : > { %v1098_v2 = vsel %vm9074_vm3, %v916_v55, %v1097_v3  ;;  %v578_v33 = vsel %vm514_vm11, %v482_v4, %v546_v32  ;;  %v8312_v43 = vpack.c.bf16 %v577_v5, %v577_v5  ;;  %v2832_v36 = vpop.permute.xlu1 %2831  ;;  %3483 = vst.msk [vmem:[#allocation3 + $0x30] sm:$0xff] %vm3476_vm14, %v3441_v28  ;;  %403 = vst [vmem:[#allocation2 + $0xc8] sm:$0x1] %v402_v60  ;;  %v283_v3 = vld [vmem:[%s9107_s28 + $0xf0] sm:$0xff]  ;;  %vm10838_vm4 = vcmask 31744  }
 0x118   : > { %2552 = vrot.lane.b32.xlu0 %v2491_v31, %s9021_s13  ;;  %1099 = vst [vmem:[#allocation2 + $0xb0] sm:$0x1] %v1098_v2  ;;  %v8667_v8 = vld [vmem:[#allocation2 + $0xa8] sm:$0xff]   ;;  %v8313_v9 = vpack.c.bf16 %v578_v33, %v578_v33  ;;  %2873 = vst.msk [vmem:[#allocation3 + $0x38] sm:$0xff] %vm2865_vm2, %v2832_v36  ;;  %vm10839_vm12 = vcmask 64544   ;;  %vm10840_vm11 = vcmask 97344  }
 0x119   : > { %1944 = vrot.lane.b32.xlu1 %v1911_v62, %s9015_s7  ;;  %v8670_v13 = vld [vmem:[#allocation2 + $0xa8] sm:$0xff]   ;;  %v918_v58 = vshrl.u32 %v8312_v43, 16  ;;  %v921_v26 = vshll.u32 %v8312_v43, 16  ;;  %1251 = vst.msk [vmem:[#allocation3 + $0x40] sm:$0xff] %vm10838_vm4, %v8702_v10  ;;  %vm10841_vm4 = vcmask 130144  }
 0x11a   : > { %v8678_v15 = vld [vmem:[#allocation2 + $0xa8] sm:$0xff]   ;;  %v926_v17 = vshrl.u32 %v8313_v9, 16  ;;  %v929_v18 = vshll.u32 %v8313_v9, 16  ;;  %v2493_v19 = vshrl.u32 %v8670_v13, 16  ;;  %v2495_v22 = vshll.u32 %v8670_v13, 16  ;;  %v3730_v47 = vpop.permute.xlu0 %3729  ;;  %v284_v9 = vld [vmem:[%s9107_s28 + $0xf8] sm:$0xff] }
 0x11b   : > { %v8675_v23 = vld [vmem:[#allocation2 + $0xa8] sm:$0xfe]   ;;  %v920_v61 = vrot.slane %v918_v58, 7  ;;  %v1100_v30 = vld [vmem:[#allocation2 + $0xb4] sm:$0xf]  ;;  %v3010_v42 = vpop.permute.xlu1 %3009  ;;  %3772 = vst.msk [vmem:[#allocation3 + $0x30] sm:$0xff] %vm10816_vm8, %v3730_v47 }
 0x11c   : > { %2841 = vrot.lane.b32.xlu0 %v2807_v0, %s9019_s11  ;;  %v928_v29 = vrot.slane %v926_v17, 7  ;;  %v8680_v34 = vld [vmem:[#allocation2 + $0xa8] sm:$0xff]   ;;  %v2497_v37 = vrot.slane %v2495_v22, 1  ;;  %v1104_v25 = vld [vmem:[#allocation2 + $0xbc] sm:$0x1]  ;;  %v2808_v57 = vrot.slane %v8675_v23, 1 }
 0x11d   : > { %2121 = vrot.lane.b32.xlu1 %v8667_v8, %s9017_s9  ;;  %v923_v38 = vor.u32 %v921_v26, %v920_v61  ;;  %v924_v39 = vrot.slane %v920_v61, 4  ;;  %v8684_v45 = vld [vmem:[#allocation2 + $0xa8] sm:$0xfe]   ;;  %v3381_v24 = vshrl.u32 %v8680_v34, 16  ;;  %v3383_v7 = vshll.u32 %v8680_v34, 16  ;;  %3051 = vst.msk [vmem:[#allocation3 + $0x38] sm:$0xff] %vm3043_vm10, %v3010_v42 }
 0x11e   : > { %v931_v11 = vor.u32 %v929_v18, %v928_v29  ;;  %v933_v41 = vrot.slane %v928_v29, 4  ;;  %v2498_v48 = vor.u32 %v2497_v37, %v2493_v19  ;;  %v9849_v46 = vld [vmem:[#allocation2 + $0xa8] sm:$0xff]   ;;  %v3705_v2 = vrot.slane %v8684_v45, 1 }
 0x11f   : > { %v8671_v16 = vld [vmem:[#allocation2 + $0xb0] ss:$0 sps:$4 sm:$0x11]   ;;  %v1101_v44 = vsel %vm9158_vm15, %v923_v38, %v1100_v30  ;;  %v3385_v4 = vrot.slane %v3383_v7, 1  ;;  %v3732_v51 = vpop.permute.xlu0 %3731  ;;  %v1607_v63 = vshll.u32 %v9849_v46, 16  ;;  %v1605_v43 = vshrl.u32 %v9849_v46, 16 }
 0x120   : > { %3019 = vrot.lane.b32.xlu0 %v8678_v15, %s9018_s10  ;;  %v8676_v21 = vld [vmem:[#allocation2 + $0xb0] ss:$0 sps:$4 sm:$0x11]   ;;  %v2500_v49 = vshll.u32 %v8671_v16, 16  ;;  %v932_v52 = vsel %vm9165_vm1, %v924_v39, %v931_v11  ;;  %1102 = vst [vmem:[#allocation2 + $0xb4] sm:$0xf] %v1101_v44  ;;  %v1105_v54 = vsel %vm9074_vm3, %v933_v41, %v1104_v25  ;;  %v444_v19 = vmul.f32 %v9682_v35, %v283_v3 }
 0x121   : > { %v8681_v53 = vld [vmem:[#allocation2 + $0xb0] ss:$0 sps:$4 sm:$0x11]   ;;  %v2809_v14 = vrot.slane %v8676_v21, 1  ;;  %1103 = vst.msk [vmem:[#allocation2 + $0xb8] sm:$0xf] %vm10815_vm0, %v932_v52  ;;  %v3443_v0 = vpop.permute.xlu1 %3442  ;;  %v3386_v32 = vor.u32 %v3385_v4, %v3381_v24  ;;  %v445_v30 = vmul.f32 %v9682_v35, %v284_v9 }
 0x122   : > { %1106 = vst [vmem:[#allocation2 + $0xbc] sm:$0x1] %v1105_v54  ;;  %v2502_v56 = vrot.slane %v2500_v49, 1  ;;  %v3388_v59 = vshll.u32 %v8681_v53, 16  ;;  %3484 = vst.msk [vmem:[#allocation3 + $0x38] sm:$0xff] %vm3476_vm14, %v3443_v0  ;;  %v1609_v50 = vrot.slane %v1607_v63, 1 }
 0x123   : > { %v8685_v55 = vld [vmem:[#allocation2 + $0xb0] ss:$0 sps:$4 sm:$0x11]   ;;  %v2810_v33 = vsel %vm1869_vm6, %v2808_v57, %v2809_v14  ;;  %3773 = vst.msk [vmem:[#allocation3 + $0x38] sm:$0xff] %vm10816_vm8, %v3732_v51  ;;  %v8692_v58 = vld [vmem:[#allocation2 + $0xa8] sm:$0xfe]   ;;  %v1935_v15 = vpop.permute.xlu0 %1934 }
 0x124   : > { %v2503_v27 = vsel %vm1435_vm9, %v2498_v48, %v2502_v56  ;;  %v3390_v62 = vrot.slane %v3388_v59, 1  ;;  %v8687_v31 = vld [vmem:[#allocation2 + $0xb0] ss:$0 sps:$4 sm:$0x11]   ;;  %v3706_v5 = vrot.slane %v8685_v55, 1  ;;  %v1912_v57 = vrot.slane %v8692_v58, 1 }
 0x125   : > { %2554 = vrot.lane.b32.xlu1 %v2503_v27, %s9021_s13  ;;  %v1612_v8 = vshll.u32 %v8687_v31, 16  ;;  %v8693_v18 = vld [vmem:[#allocation2 + $0xb0] ss:$0 sps:$4 sm:$0x11]   ;;  %v1645_v22 = vpop.permute.xlu1 %1644  ;;  %v8971_v16 = vld [vmem:[%s10805_s2] ss:$0 sm:$0xff]  ;;  %v1610_v53 = vor.u32 %v1609_v50, %v1605_v43 }
 0x126   : > { %v3391_v13 = vsel %vm1435_vm9, %v3386_v32, %v3390_v62  ;;  %v3707_v28 = vsel %vm1869_vm6, %v3705_v2, %v3706_v5  ;;  %1685 = vst.msk [vmem:[#allocation3 + $0x40] sm:$0xff] %vm10839_vm12, %v1645_v22  ;;  %v483_v11 = vadd.f32 %v8971_v16, %v444_v19  ;;  %v1913_v48 = vrot.slane %v8693_v18, 1  ;;  %v8707_v10 = vld [vmem:[#allocation2 + $0x6c] sm:$0xff]  }
 0x127   : > { %3452 = vrot.lane.b32.xlu0 %v3391_v13, %s9022_s14  ;;  %v1614_v17 = vrot.slane %v1612_v8, 1  ;;  %1975 = vst.msk [vmem:[#allocation3 + $0x40] sm:$0xff] %vm10840_vm11, %v1935_v15  ;;  %v2112_v39 = vpop.permute.xlu0 %2111  ;;  %v484_v49 = vadd.f32 %v8971_v16, %v445_v30  ;;  %v3788_v18 = vld [vmem:[#allocation3 + $0x30] sm:$0xff] }
 0x128   : > { %v8679_v26 = vld [vmem:[#allocation2 + $0xb4] sm:$0xff]   ;;  %2152 = vst.msk [vmem:[#allocation3 + $0x40] sm:$0xff] %vm10841_vm4, %v2112_v39  ;;  %v1914_v59 = vsel %vm1869_vm6, %v1912_v57, %v1913_v48  ;;  %vm515_vm12 = vcmp.gt.f32.partialorder %v483_v11, 0.0  ;;  %v547_v4 = vmul.f32 0.01, %v483_v11  ;;  %vm10842_vm4 = vcmask 31744   ;;  %8404 = vmatprep.mubr.msk.bf16.mxu0 %vm3825_vm7, %v3788_v18 }
 0x129   : > { %2843 = vrot.lane.b32.xlu1 %v2810_v33, %s9019_s11  ;;  %v8682_v23 = vld [vmem:[#allocation2 + $0xb4] sm:$0xff]   ;;  %v8683_v61 = vld [vmem:[#allocation2 + $0xbc] ss:$0 sps:$4 sm:$0x11]   ;;  %v1647_v7 = vpop.permute.xlu1 %1646  ;;  %vm516_vm11 = vcmp.gt.f32.partialorder %v484_v49, 0.0  ;;  %v1615_v51 = vsel %vm1435_vm9, %v1610_v53, %v1614_v17  ;;  %1252 = vst.msk [vmem:[#allocation3 + $0x48] sm:$0xff] %vm10842_vm4, %v8707_v10 }
 0x12a   : > { %v8688_v29 = vld [vmem:[#allocation2 + $0xb4] sm:$0xfe]   ;;  %v3393_v34 = vshrl.u32 %v8682_v23, 16  ;;  %v3395_v36 = vshll.u32 %v8682_v23, 16  ;;  %v3400_v37 = vshll.u32 %v8683_v61, 16  ;;  %v579_v32 = vsel %vm515_vm12, %v483_v11, %v547_v4 }
 0x12b   : > { %v8689_v38 = vld [vmem:[#allocation2 + $0xbc] ss:$0 sps:$4 sm:$0x11]   ;;  %3741 = vrot.lane.b32.xlu0 %v3707_v28, %s9020_s12  ;;  %v3708_v25 = vrot.slane %v8688_v29, 1  ;;  %v8690_v40 = vld [vmem:[#allocation2 + $0xb4] sm:$0xff]   ;;  %v8314_v33 = vpack.c.bf16 %v579_v32, %v579_v32  ;;  %vm10843_vm12 = vcmask 64544  }
 0x12c   : > { %v3397_v35 = vrot.slane %v3395_v36, 1  ;;  %v3402_v41 = vrot.slane %v3400_v37, 1  ;;  %v3709_v21 = vrot.slane %v8689_v38, 1  ;;  %v8691_v44 = vld [vmem:[#allocation2 + $0xbc] ss:$0 sps:$4 sm:$0x11]  }
 0x12d   : > { %3021 = vrot.lane.b32.xlu1 %v8679_v26, %s9018_s10  ;;  %v1617_v45 = vshrl.u32 %v8690_v40, 16  ;;  %v1619_v47 = vshll.u32 %v8690_v40, 16  ;;  %v1624_v14 = vshll.u32 %v8691_v44, 16  ;;  %v8694_v24 = vld [vmem:[#allocation2 + $0xb4] sm:$0xfe]   ;;  %v935_v15 = vshrl.u32 %v8314_v33, 16 }
 0x12e   : > { %v3398_v52 = vor.u32 %v3397_v35, %v3393_v34  ;;  %v3710_v54 = vsel %vm1869_vm6, %v3708_v25, %v3709_v21  ;;  %v8695_v55 = vld [vmem:[#allocation2 + $0xbc] ss:$0 sps:$4 sm:$0x11]   ;;  %v8696_v60 = vld [vmem:[#allocation2 + $0xb4] sm:$0xff]   ;;  %v548_v31 = vmul.f32 0.01, %v484_v49 }
 0x12f   : > { %3743 = vrot.lane.b32.xlu0 %v3710_v54, %s9020_s12  ;;  %v1621_v42 = vrot.slane %v1619_v47, 1  ;;  %v1626_v62 = vrot.slane %v1624_v14, 1  ;;  %v8698_v63 = vld [vmem:[#allocation2 + $0xb4] sm:$0xff]   ;;  %v1915_v3 = vrot.slane %v8694_v24, 1  ;;  %v1916_v0 = vrot.slane %v8695_v55, 1  ;;  %1686 = vst.msk [vmem:[#allocation3 + $0x48] sm:$0xff] %vm10843_vm12, %v1647_v7 }
 0x130   : > { %v3403_v56 = vsel %vm1435_vm9, %v3398_v52, %v3402_v41  ;;  %v580_v5 = vsel %vm516_vm11, %v484_v49, %v548_v31  ;;  %v8699_v43 = vld [vmem:[#allocation2 + $0xbc] ss:$0 sps:$4 sm:$0x11]   ;;  %v2505_v50 = vshrl.u32 %v8698_v63, 16  ;;  %v2507_v9 = vshll.u32 %v8698_v63, 16  ;;  %v3789_v29 = vld [vmem:[#allocation3 + $0x38] sm:$0xff] }
 0x131   : > { %3454 = vrot.lane.b32.xlu1 %v3403_v56, %s9022_s14  ;;  %v1622_v27 = vor.u32 %v1621_v42, %v1617_v45  ;;  %v8315_v8 = vpack.c.bf16 %v580_v5, %v580_v5  ;;  %v938_v26 = vshll.u32 %v8314_v33, 16  ;;  %v2512_v17 = vshll.u32 %v8699_v43, 16  ;;  %v1107_v23 = vld [vmem:[#allocation2 + $0xc0] sm:$0xf]  ;;  %v8703_v28 = vld [vmem:[#allocation2 + $0xb4] sm:$0xfe]   ;;  %8405 = vmatmul.mubr.msk.bf16.gmra.mrb[12].mxu0 %vm3825_vm7, %v3789_v29 }
 0x132   : > { %v2509_v61 = vrot.slane %v2507_v9, 1  ;;  %v937_v30 = vrot.slane %v935_v15, 7  ;;  %v1111_v36 = vld [vmem:[#allocation2 + $0xc8] sm:$0x1]  ;;  %v8718_v38 = vld [vmem:[#allocation2 + $0x78] sm:$0xff]   ;;  %v2811_v40 = vrot.slane %v8703_v28, 1  ;;  %v1917_v16 = vsel %vm1869_vm6, %v1915_v3, %v1916_v0 }
 0x133   : > { %1946 = vrot.lane.b32.xlu0 %v1914_v59, %s9015_s7  ;;  %v1627_v58 = vsel %vm1435_vm9, %v1622_v27, %v1626_v62  ;;  %v943_v19 = vshrl.u32 %v8315_v8, 16  ;;  %v946_v22 = vshll.u32 %v8315_v8, 16  ;;  %v2514_v34 = vrot.slane %v2512_v17, 1  ;;  %v8704_v37 = vld [vmem:[#allocation2 + $0xbc] ss:$0 sps:$4 sm:$0x11]  }
 0x134   : > { %v2510_v25 = vor.u32 %v2509_v61, %v2505_v50  ;;  %vm10844_vm11 = vcmask 97344   ;;  %v940_v11 = vor.u32 %v938_v26, %v937_v30  ;;  %v941_v35 = vrot.slane %v937_v30, 4  ;;  %v348_v21 = vld [vmem:[#allocation2 + $0xcc] sm:$0x1]  ;;  %1253 = vst.msk [vmem:[#allocation3 + $0x50] sm:$0xff] %vm10842_vm4, %v8718_v38  ;;  %v8719_v54 = vld [vmem:[#allocation2 + $0x84] sm:$0xff]  }
 0x135   : > { %1656 = vrot.lane.b32.xlu1 %v1615_v51, %s9016_s8  ;;  %v945_v39 = vrot.slane %v943_v19, 7  ;;  %v2812_v41 = vrot.slane %v8704_v37, 1  ;;  %v349_v47 = vsel %vm9074_vm3, 0, %v348_v21  ;;  %v404_v48 = vld [vmem:[#allocation2 + $0xd4] sm:$0x1]  ;;  %vm10845_vm12 = vcmask 130144  }
 0x136   : > { %v2515_v45 = vsel %vm1435_vm9, %v2510_v25, %v2514_v34  ;;  %v1108_v52 = vsel %vm9158_vm15, %v940_v11, %v1107_v23  ;;  %350 = vst [vmem:[#allocation2 + $0xcc] sm:$0x1] %v349_v47  ;;  %v405_v53 = vsel %vm9084_vm5, 0, %v404_v48  ;;  %v8720_v7 = vld [vmem:[#allocation2 + $0x90] sm:$0xff]   ;;  %vm10847_vm5 = vmmov %vm10842_vm4  ;;  %v8722_v56 = vld [vmem:[#allocation2 + $0xa8] sm:$0xff]  }
 0x137   : > { %2123 = vrot.lane.b32.xlu0 %v8696_v60, %s9017_s9  ;;  %v948_v57 = vor.u32 %v946_v22, %v945_v39  ;;  %v950_v44 = vrot.slane %v945_v39, 4  ;;  %1109 = vst [vmem:[#allocation2 + $0xc0] sm:$0xf] %v1108_v52  ;;  %v2813_v24 = vsel %vm1869_vm6, %v2811_v40, %v2812_v41  ;;  %406 = vst [vmem:[#allocation2 + $0xd4] sm:$0x1] %v405_v53  ;;  %v8723_v59 = vld [vmem:[#allocation2 + $0xb4] sm:$0xff]  }
 0x138   : > { %1255 = vst.msk [vmem:[#allocation3 + $0x60] sm:$0xff] %vm10847_vm5, %v8720_v7  ;;  %v8716_v17 = vld [vmem:[#allocation2 + $0xcc] sm:$0xfe]   ;;  %v8724_v7 = vld [vmem:[#allocation2] sm:$0xff]  }
 0x139   : > { %v1937_v13 = vpop.permute.xlu1 %1936  ;;  %1658 = vrot.lane.b32.xlu1 %v1627_v58, %s9016_s8  ;;  %v949_v42 = vsel %vm9165_vm1, %v941_v35, %v948_v57  ;;  %v1112_v14 = vsel %vm9074_vm3, %v950_v44, %v1111_v36  ;;  %v3714_v57 = vrot.slane %v8716_v17, 1 }
 0x13a   : > { %1976 = vst.msk [vmem:[#allocation3 + $0x48] sm:$0xff] %vm10844_vm11, %v1937_v13  ;;  %1113 = vst [vmem:[#allocation2 + $0xc8] sm:$0x1] %v1112_v14 }
 0x13b   : > { %2556 = vrot.lane.b32.xlu0 %v2515_v45, %s9021_s13  ;;  %1110 = vst.msk [vmem:[#allocation2 + $0xc4] sm:$0xf] %vm10815_vm0, %v949_v42  ;;  %vm10846_vm11 = vmmov %vm10842_vm4 }
 0x13c   : > { %1254 = vst.msk [vmem:[#allocation3 + $0x58] sm:$0xff] %vm10846_vm11, %v8719_v54  ;;  %vm10849_vm0 = vmmov %vm10842_vm4  ;;  %vm10851_vm11 = vcmask 97344  }
 0x13d   : > { %1948 = vrot.lane.b32.xlu1 %v1917_v16, %s9015_s7  ;;  %1258 = vst.msk [vmem:[#allocation3 + $0x78] sm:$0xff] %vm10849_vm0, %v8723_v59  ;;  %v8712_v26 = vld [vmem:[#allocation2 + $0xcc] sm:$0xff]   ;;  %vm10850_vm0 = vcmask 64544  }
 0x13e   : > { %v2545_v46 = vpop.permute.xlu0 %2544  ;;  %v8713_v19 = vld [vmem:[#allocation2 + $0xd4] ss:$0 sps:$4 sm:$0x11]   ;;  %v3417_v28 = vshrl.u32 %v8712_v26, 16  ;;  %v3419_v29 = vshll.u32 %v8712_v26, 16  ;;  %v8709_v44 = vld [vmem:[#allocation2 + $0xcc] sm:$0xff]   ;;  %vm10852_vm5 = vmmov %vm10850_vm0 }
 0x13f   : > { %2585 = vst.msk [vmem:[#allocation3 + $0x40] sm:$0xff] %vm2576_vm13, %v2545_v46  ;;  %2845 = vrot.lane.b32.xlu0 %v2813_v24, %s9019_s11  ;;  %v8721_v46 = vld [vmem:[#allocation2 + $0x9c] sm:$0xff]   ;;  %v3424_v30 = vshll.u32 %v8713_v19, 16  ;;  %v8717_v35 = vld [vmem:[#allocation2 + $0xd4] ss:$0 sps:$4 sm:$0x11]  }
 0x140   : > { %1256 = vst.msk [vmem:[#allocation3 + $0x68] sm:$0xff] %vm10842_vm4, %v8721_v46  ;;  %v3421_v16 = vrot.slane %v3419_v29, 1  ;;  %v8725_v46 = vld [vmem:[#allocation2 + $0x8] ss:$0 sps:$4 sm:$0x11]  }
 0x141   : > { %v8701_v51 = vld [vmem:[#allocation2 + $0xc8] ss:$0 sps:$4 sm:$0x11]   ;;  %v3426_v45 = vrot.slane %v3424_v30, 1 }
 0x142   : > { %v2834_v2 = vpop.permute.xlu0 %2833  ;;  %v8697_v60 = vld [vmem:[#allocation2 + $0xc0] sm:$0xff]   ;;  %v2524_v3 = vshll.u32 %v8701_v51, 16  ;;  %v8706_v0 = vld [vmem:[#allocation2 + $0xc8] ss:$0 sps:$4 sm:$0x11]   ;;  %v3422_v47 = vor.u32 %v3421_v16, %v3417_v28  ;;  %v4991_v51 = vshll.u32 %v8725_v46, 16 }
 0x143   : > { %2874 = vst.msk [vmem:[#allocation3 + $0x40] sm:$0xff] %vm2865_vm2, %v2834_v2  ;;  %v8700_v4 = vld [vmem:[#allocation2 + $0xc0] sm:$0xff]   ;;  %2125 = vrot.lane.b32.xlu1 %v8697_v60, %s9017_s9  ;;  %v2815_v50 = vrot.slane %v8706_v0, 1  ;;  %v8711_v13 = vld [vmem:[#allocation2 + $0xc8] ss:$0 sps:$4 sm:$0x11]  }
 0x144   : > { %v8705_v27 = vld [vmem:[#allocation2 + $0xc0] sm:$0xfe]   ;;  %v2517_v31 = vshrl.u32 %v8700_v4, 16  ;;  %v2519_v63 = vshll.u32 %v8700_v4, 16  ;;  %v2526_v43 = vrot.slane %v2524_v3, 1  ;;  %v3412_v61 = vshll.u32 %v8711_v13, 16 }
 0x145   : > { %v2814_v2 = vrot.slane %v8705_v27, 1  ;;  %v8708_v5 = vld [vmem:[#allocation2 + $0xc0] sm:$0xff]   ;;  %v8715_v39 = vld [vmem:[#allocation2 + $0xc8] ss:$0 sps:$4 sm:$0x11]   ;;  %v3427_v42 = vsel %vm1435_vm9, %v3422_v47, %v3426_v45  ;;  %v4984_v60 = vshrl.u32 %v8724_v7, 16 }
 0x146   : > { %v2521_v33 = vrot.slane %v2519_v63, 1  ;;  %v8710_v8 = vld [vmem:[#allocation2 + $0xc0] sm:$0xff]   ;;  %3023 = vrot.lane.b32.xlu0 %v8708_v5, %s9018_s10  ;;  %v3414_v38 = vrot.slane %v3412_v61, 1  ;;  %v3712_v21 = vrot.slane %v8715_v39, 1  ;;  %v4986_v4 = vshll.u32 %v8724_v7, 16 }
 0x147   : > { %v3405_v58 = vshrl.u32 %v8710_v8, 16  ;;  %v3407_v15 = vshll.u32 %v8710_v8, 16  ;;  %v8714_v34 = vld [vmem:[#allocation2 + $0xc0] sm:$0xfe]   ;;  %v2816_v36 = vsel %vm1869_vm6, %v2814_v2, %v2815_v50  ;;  %v4993_v63 = vrot.slane %v4991_v51, 1 }
 0x148   : > { %v2522_v10 = vor.u32 %v2521_v33, %v2517_v31  ;;  %v3711_v11 = vrot.slane %v8714_v34, 1  ;;  %v8727_v27 = vld [vmem:[#allocation2 + $0x8] ss:$0 sps:$4 sm:$0x11]   ;;  %v4988_v31 = vrot.slane %v4986_v4, 1 }
 0x149   : > { %v3409_v23 = vrot.slane %v3407_v15, 1 }
 0x14a   : > { %v2114_v49 = vpop.permute.xlu1 %2113  ;;  %v2527_v22 = vsel %vm1435_vm9, %v2522_v10, %v2526_v43  ;;  %v3713_v48 = vsel %vm1869_vm6, %v3711_v11, %v3712_v21  ;;  %v4989_v3 = vor.u32 %v4988_v31, %v4984_v60 }
 0x14b   : > { %2153 = vst.msk [vmem:[#allocation3 + $0x48] sm:$0xff] %vm10845_vm12, %v2114_v49  ;;  %vm10848_vm12 = vmmov %vm10842_vm4  ;;  %2558 = vrot.lane.b32.xlu1 %v2527_v22, %s9021_s13  ;;  %v3410_v37 = vor.u32 %v3409_v23, %v3405_v58  ;;  %v3715_v49 = vrot.slane %v8717_v35, 1  ;;  %vm10853_vm4 = vcmask 130144  }
 0x14c   : > { %1257 = vst.msk [vmem:[#allocation3 + $0x70] sm:$0xff] %vm10848_vm12, %v8722_v56  ;;  %vm10854_vm12 = vmmov %vm10851_vm11  ;;  %v4994_v33 = vsel %vm1435_vm9, %v4989_v3, %v4993_v63 }
 0x14d   : > { %v3415_v41 = vsel %vm1435_vm9, %v3410_v37, %v3414_v38  ;;  %v3716_v56 = vsel %vm1869_vm6, %v3714_v57, %v3715_v49  ;;  %v9979_v37 = vld [vmem:[%s10807_s4] ss:$0 sm:$0xff] }
 0x14e   : > { %v3012_v6 = vpop.permute.xlu0 %3011  ;;  %3456 = vrot.lane.b32.xlu0 %v3415_v41, %s9022_s14 }
 0x14f   : > { %3052 = vst.msk [vmem:[#allocation3 + $0x40] sm:$0xff] %vm3043_vm10, %v3012_v6  ;;  %2847 = vrot.lane.b32.xlu1 %v2816_v36, %s9019_s11 }
 0x152   : > { %v2547_v55 = vpop.permute.xlu1 %2546  ;;  %3745 = vrot.lane.b32.xlu0 %v3713_v48, %s9020_s12 }
 0x153   : > { %2586 = vst.msk [vmem:[#allocation3 + $0x48] sm:$0xff] %vm2576_vm13, %v2547_v55  ;;  %3025 = vrot.lane.b32.xlu1 %v8709_v44, %s9018_s10  ;;  %v8726_v55 = vld [vmem:[#allocation2] sm:$0xfe]  }
 0x154   : > { %v5415_v0 = vrot.slane %v8726_v55, 1 }
 0x156   : > { %v2836_v62 = vpop.permute.xlu1 %2835  ;;  %v3445_v32 = vpop.permute.xlu0 %3444  ;;  %5175 = vrot.lane.b32.xlu0 %v4994_v33, %s9016_s8 }
 0x157   : > { %2875 = vst.msk [vmem:[#allocation3 + $0x48] sm:$0xff] %vm2865_vm2, %v2836_v62  ;;  %3458 = vrot.lane.b32.xlu1 %v3427_v42, %s9022_s14 }
 0x158   : > { %3485 = vst.msk [vmem:[#allocation3 + $0x40] sm:$0xff] %vm3476_vm14, %v3445_v32  ;;  %v5416_v32 = vrot.slane %v8727_v27, 1 }
 0x15a   : > { %v3014_v9 = vpop.permute.xlu1 %3013  ;;  %v3734_v18 = vpop.permute.xlu0 %3733  ;;  %v5417_v43 = vsel %vm1869_vm6, %v5415_v0, %v5416_v32 }
 0x15b   : > { %3053 = vst.msk [vmem:[#allocation3 + $0x48] sm:$0xff] %vm3043_vm10, %v3014_v9  ;;  %3747 = vrot.lane.b32.xlu1 %v3716_v56, %s9020_s12  ;;  %5463 = vrot.lane.b32.xlu0 %v5417_v43, %s9015_s7 }
 0x15c   : > { %3774 = vst.msk [vmem:[#allocation3 + $0x40] sm:$0xff] %vm10816_vm8, %v3734_v18 }
 0x15e   : > { %v3447_v25 = vpop.permute.xlu1 %3446  ;;  %v3736_v40 = vpop.permute.xlu0 %3735 }
 0x15f   : > { %3486 = vst.msk [vmem:[#allocation3 + $0x48] sm:$0xff] %vm3476_vm14, %v3447_v25 }
 0x160   : > { %3775 = vst.msk [vmem:[#allocation3 + $0x48] sm:$0xff] %vm10816_vm8, %v3736_v40 }
 0x162   : > { %v1649_v52 = vpop.permute.xlu1 %1648  ;;  %v1939_v54 = vpop.permute.xlu0 %1938 }
 0x163   : > { %v3790_v53 = vld [vmem:[#allocation3 + $0x40] sm:$0xff]  ;;  %1687 = vst.msk [vmem:[#allocation3 + $0x50] sm:$0xff] %vm10850_vm0, %v1649_v52  ;;  %vm10855_vm0 = vmmov %vm10853_vm4 }
 0x164   : > { %8408 = vmatprep.mubr.msk.bf16.mxu0 %vm3825_vm7, %v3790_v53  ;;  %1977 = vst.msk [vmem:[#allocation3 + $0x50] sm:$0xff] %vm10851_vm11, %v1939_v54  ;;  %vm10856_vm11 = vmmov %vm10852_vm5 }
 0x166   : > { %v1651_v14 = vpop.permute.xlu1 %1650  ;;  %v2116_v24 = vpop.permute.xlu0 %2115 }
 0x167   : > { %1688 = vst.msk [vmem:[#allocation3 + $0x58] sm:$0xff] %vm10852_vm5, %v1651_v14  ;;  %v3791_v6 = vld [vmem:[#allocation3 + $0x48] sm:$0xff]  ;;  %vm10857_vm5 = vmmov %vm10854_vm12 }
 0x168   : > { %2154 = vst.msk [vmem:[#allocation3 + $0x50] sm:$0xff] %vm10853_vm4, %v2116_v24  ;;  %8409 = vmatmul.mubr.msk.bf16.gmra.mrb[16].mxu0 %vm3825_vm7, %v3791_v6  ;;  %vm10858_vm4 = vmmov %vm10855_vm0 }
 0x16a   : > { %v1941_v59 = vpop.permute.xlu1 %1940  ;;  %v2549_v62 = vpop.permute.xlu0 %2548 }
 0x16b   : > { %1978 = vst.msk [vmem:[#allocation3 + $0x58] sm:$0xff] %vm10854_vm12, %v1941_v59  ;;  %vm10859_vm12 = vmmov %vm10856_vm11 }
 0x16c   : > { %2587 = vst.msk [vmem:[#allocation3 + $0x50] sm:$0xff] %vm2576_vm13, %v2549_v62  ;;  %v4558_v62 = vld [vmem:[#allocation2 + $0x18] sm:$0xf] }
 0x16e   : > { %v2838_v2 = vpop.permute.xlu0 %2837  ;;  %v2118_v5 = vpop.permute.xlu1 %2117 }
 0x16f   : > { %2876 = vst.msk [vmem:[#allocation3 + $0x50] sm:$0xff] %vm2865_vm2, %v2838_v2  ;;  %v4551_v2 = vld [vmem:[#allocation2 + $0xc] sm:$0xf] }
 0x170   : > { %2155 = vst.msk [vmem:[#allocation3 + $0x58] sm:$0xff] %vm10855_vm0, %v2118_v5  ;;  %vm10860_vm0 = vmmov %vm10857_vm5 }
 0x172   : > { %v3016_v50 = vpop.permute.xlu0 %3015 }
 0x173   : > { %3054 = vst.msk [vmem:[#allocation3 + $0x50] sm:$0xff] %vm3043_vm10, %v3016_v50  ;;  %v2551_v8 = vpop.permute.xlu1 %2550  ;;  %v4562_v50 = vld [vmem:[#allocation2 + $0x20] sm:$0x1] }
 0x174   : > { %2588 = vst.msk [vmem:[#allocation3 + $0x58] sm:$0xff] %vm2576_vm13, %v2551_v8 }
 0x176   : > { %v3449_v10 = vpop.permute.xlu0 %3448 }
 0x177   : > { %v2840_v9 = vpop.permute.xlu1 %2839  ;;  %3487 = vst.msk [vmem:[#allocation3 + $0x50] sm:$0xff] %vm3476_vm14, %v3449_v10 }
 0x178   : > { %2877 = vst.msk [vmem:[#allocation3 + $0x58] sm:$0xff] %vm2865_vm2, %v2840_v9 }
 0x17a   : > { %v3738_v58 = vpop.permute.xlu0 %3737 }
 0x17b   : > { %v3018_v13 = vpop.permute.xlu1 %3017  ;;  %3776 = vst.msk [vmem:[#allocation3 + $0x50] sm:$0xff] %vm10816_vm8, %v3738_v58 }
 0x17c   : > { %3055 = vst.msk [vmem:[#allocation3 + $0x58] sm:$0xff] %vm3043_vm10, %v3018_v13 }
 0x17e   : > { %v3740_v15 = vpop.permute.xlu0 %3739 }
 0x17f   : > { %v3451_v26 = vpop.permute.xlu1 %3450 }
 0x180   : > { %3488 = vst.msk [vmem:[#allocation3 + $0x58] sm:$0xff] %vm3476_vm14, %v3451_v26 }
 0x181   : > { %3777 = vst.msk [vmem:[#allocation3 + $0x58] sm:$0xff] %vm10816_vm8, %v3740_v15 }
 0x182   : > { %v3792_v17 = vld [vmem:[#allocation3 + $0x50] sm:$0xff]  ;;  %v1943_v18 = vpop.permute.xlu0 %1942 }
 0x183   : > { %8412 = vmatprep.mubr.msk.bf16.mxu0 %vm3825_vm7, %v3792_v17  ;;  %v1653_v19 = vpop.permute.xlu1 %1652 }
 0x184   : > { %1689 = vst.msk [vmem:[#allocation3 + $0x60] sm:$0xff] %vm10856_vm11, %v1653_v19  ;;  %vm10861_vm11 = vmmov %vm10858_vm4 }
 0x185   : > { %1979 = vst.msk [vmem:[#allocation3 + $0x60] sm:$0xff] %vm10857_vm5, %v1943_v18  ;;  %v4555_v18 = vld [vmem:[#allocation2 + $0x14] sm:$0x1] }
 0x186   : > { %v2120_v22 = vpop.permute.xlu0 %2119 }
 0x187   : > { %2156 = vst.msk [vmem:[#allocation3 + $0x60] sm:$0xff] %vm10858_vm4, %v2120_v22  ;;  %v1655_v23 = vpop.permute.xlu1 %1654 }
 0x188   : > { %1690 = vst.msk [vmem:[#allocation3 + $0x68] sm:$0xff] %vm10859_vm12, %v1655_v23  ;;  %v3793_v61 = vld [vmem:[#allocation3 + $0x58] sm:$0xff] }
 0x189   : > { %8413 = vmatmul.mubr.msk.bf16.gmra.mrb[20].mxu0 %vm3825_vm7, %v3793_v61 }
 0x18a   : > { %v2553_v28 = vpop.permute.xlu0 %2552 }
 0x18b   : > { %2589 = vst.msk [vmem:[#allocation3 + $0x60] sm:$0xff] %vm2576_vm13, %v2553_v28  ;;  %v1945_v29 = vpop.permute.xlu1 %1944 }
 0x18c   : > { %1980 = vst.msk [vmem:[#allocation3 + $0x68] sm:$0xff] %vm10860_vm0, %v1945_v29 }
 0x18e   : > { %v2842_v30 = vpop.permute.xlu0 %2841 }
 0x18f   : > { %2878 = vst.msk [vmem:[#allocation3 + $0x60] sm:$0xff] %vm2865_vm2, %v2842_v30  ;;  %v2122_v34 = vpop.permute.xlu1 %2121 }
 0x190   : > { %2157 = vst.msk [vmem:[#allocation3 + $0x68] sm:$0xff] %vm10861_vm11, %v2122_v34  ;;  %vm10862_vm11 = vcmask 64544  }
 0x192   : > { %v3020_v36 = vpop.permute.xlu0 %3019 }
 0x193   : > { %3056 = vst.msk [vmem:[#allocation3 + $0x60] sm:$0xff] %vm3043_vm10, %v3020_v36 }
 0x197   : > { %v2555_v38 = vpop.permute.xlu1 %2554 }
 0x198   : > { %2590 = vst.msk [vmem:[#allocation3 + $0x68] sm:$0xff] %vm2576_vm13, %v2555_v38 }
 0x199   : > { %v3453_v16 = vpop.permute.xlu0 %3452 }
 0x19a   : > { %3489 = vst.msk [vmem:[#allocation3 + $0x60] sm:$0xff] %vm3476_vm14, %v3453_v16 }
 0x19b   : > { %v2844_v41 = vpop.permute.xlu1 %2843 }
 0x19c   : > { %2879 = vst.msk [vmem:[#allocation3 + $0x68] sm:$0xff] %vm2865_vm2, %v2844_v41 }
 0x19d   : > { %v3742_v52 = vpop.permute.xlu0 %3741 }
 0x19e   : > { %3778 = vst.msk [vmem:[#allocation3 + $0x60] sm:$0xff] %vm10816_vm8, %v3742_v52 }
 0x19f   : > { %v3022_v14 = vpop.permute.xlu1 %3021 }
 0x1a0   : > { %3057 = vst.msk [vmem:[#allocation3 + $0x68] sm:$0xff] %vm3043_vm10, %v3022_v14 }
 0x1a1   : > { %v3744_v60 = vpop.permute.xlu0 %3743 }
 0x1a3   : > { %v3455_v0 = vpop.permute.xlu1 %3454 }
 0x1a4   : > { %3490 = vst.msk [vmem:[#allocation3 + $0x68] sm:$0xff] %vm3476_vm14, %v3455_v0 }
 0x1a5   : > { %3779 = vst.msk [vmem:[#allocation3 + $0x68] sm:$0xff] %vm10816_vm8, %v3744_v60  ;;  %v1947_v10 = vpop.permute.xlu0 %1946  ;;  %v3794_v13 = vld [vmem:[#allocation3 + $0x60] sm:$0xff]  ;;  %vm10867_vm8 = vmmov %vm10862_vm11 }
 0x1a6   : > { %8416 = vmatprep.mubr.msk.bf16.mxu0 %vm3825_vm7, %v3794_v13 }
 0x1a7   : > { %v1657_v28 = vpop.permute.xlu1 %1656 }
 0x1a8   : > { %1691 = vst.msk [vmem:[#allocation3 + $0x70] sm:$0xff] %vm10862_vm11, %v1657_v28 }
 0x1a9   : > { %v8394_v39 = vpop.f32.mrb[0].mxu0  ;;  %v2124_v38 = vpop.permute.xlu0 %2123 }
 0x1aa   : > { %v3921_v25 = vadd.f32 %v8394_v39, %v9979_v37  ;;  %v3912_v40 = vpop.f32.mrb[1].mxu0 }
 0x1ab   : > { %v3913_v11 = vadd.f32 %v9979_v37, %v3912_v40  ;;  %v8395_v35 = vpop.f32.mrb[2].mxu0  ;;  %v1659_v39 = vpop.permute.xlu1 %1658 }
 0x1ac   : > { %vm4041_vm5 = vcmp.gt.f32.partialorder %v3921_v25, 0.0  ;;  %v4073_v21 = vmul.f32 0.01, %v3921_v25  ;;  %v3924_v57 = vadd.f32 %v8395_v35, %v9979_v37  ;;  %v3915_v44 = vpop.f32.mrb[3].mxu0  ;;  %1692 = vst.msk [vmem:[#allocation3 + $0x78] sm:$0xff] %vm10867_vm8, %v1659_v39 }
 0x1ad   : > { %vm4039_vm4 = vcmp.gt.f32.partialorder %v3913_v11, 0.0  ;;  %v4071_v45 = vmul.f32 0.01, %v3913_v11  ;;  %v3916_v47 = vadd.f32 %v9979_v37, %v3915_v44  ;;  %v2557_v40 = vpop.permute.xlu0 %2556 }
 0x1ae   : > { %v4105_v48 = vsel %vm4041_vm5, %v3921_v25, %v4073_v21  ;;  %vm4042_vm12 = vcmp.gt.f32.partialorder %v3924_v57, 0.0  ;;  %v4074_v49 = vmul.f32 0.01, %v3924_v57  ;;  %vm10863_vm5 = vcmask 27648   ;;  %v3795_v25 = vld [vmem:[#allocation3 + $0x68] sm:$0xff] }
 0x1af   : > { %v8318_v53 = vpack.c.bf16 %v4105_v48, %v4105_v48  ;;  %v4103_v54 = vsel %vm4039_vm4, %v3913_v11, %v4071_v45  ;;  %vm4040_vm0 = vcmp.gt.f32.partialorder %v3916_v47, 0.0  ;;  %v4072_v42 = vmul.f32 0.01, %v3916_v47  ;;  %8417 = vmatmul.mubr.msk.bf16.gmra.mrb[24].mxu0 %vm3825_vm7, %v3795_v25  ;;  %v1949_v16 = vpop.permute.xlu1 %1948 }
 0x1b0   : > { %v8316_v24 = vpack.c.bf16 %v4103_v54, %v4103_v54  ;;  %v4106_v6 = vsel %vm4042_vm12, %v3924_v57, %v4074_v49  ;;  %vm10864_vm4 = vcmask 97344   ;;  %vm10865_vm12 = vmmov %vm10863_vm5 }
 0x1b1   : > { %v4249_v7 = vshrl.u32 %v8318_v53, 16  ;;  %v8319_v46 = vpack.c.bf16 %v4106_v6, %v4106_v6  ;;  %v4104_v56 = vsel %vm4040_vm0, %v3916_v47, %v4072_v42  ;;  %v4252_v51 = vshll.u32 %v8318_v53, 16  ;;  %1981 = vst.msk [vmem:[#allocation3 + $0x70] sm:$0xff] %vm10864_vm4, %v1947_v10  ;;  %vm10868_vm11 = vmmov %vm10864_vm4  ;;  %v2846_v44 = vpop.permute.xlu0 %2845 }
 0x1b2   : > { %v4232_v59 = vshrl.u32 %v8316_v24, 16  ;;  %v8317_v55 = vpack.c.bf16 %v4104_v56, %v4104_v56  ;;  %v4235_v63 = vshll.u32 %v8316_v24, 16  ;;  %vm10866_vm0 = vcmask 130144   ;;  %1982 = vst.msk [vmem:[#allocation3 + $0x78] sm:$0xff] %vm10868_vm11, %v1949_v16 }
 0x1b3   : > { %v4251_v4 = vrot.slane %v4249_v7, 7  ;;  %v4257_v27 = vshrl.u32 %v8319_v46, 16  ;;  %v4260_v33 = vshll.u32 %v8319_v46, 16  ;;  %2158 = vst.msk [vmem:[#allocation3 + $0x70] sm:$0xff] %vm10866_vm0, %v2124_v38  ;;  %vm10869_vm8 = vmmov %vm10866_vm0  ;;  %vm10870_vm11 = vcmask 294144  }
 0x1b4   : > { %v4234_v31 = vrot.slane %v4232_v59, 7  ;;  %v4240_v3 = vshrl.u32 %v8317_v55, 16  ;;  %v4243_v9 = vshll.u32 %v8317_v55, 16  ;;  %2591 = vst.msk [vmem:[#allocation3 + $0x70] sm:$0xff] %vm2576_vm13, %v2557_v40 }
 0x1b5   : > { %v4254_v32 = vor.u32 %v4252_v51, %v4251_v4  ;;  %v4259_v5 = vrot.slane %v4257_v27, 7  ;;  %v4255_v58 = vrot.slane %v4251_v4, 4  ;;  %2880 = vst.msk [vmem:[#allocation3 + $0x70] sm:$0xff] %vm2865_vm2, %v2846_v44  ;;  %v2126_v4 = vpop.permute.xlu1 %2125 }
 0x1b6   : > { %v4237_v43 = vor.u32 %v4235_v63, %v4234_v31  ;;  %v4242_v8 = vrot.slane %v4240_v3, 7  ;;  %v4238_v19 = vrot.slane %v4234_v31, 4  ;;  %2159 = vst.msk [vmem:[#allocation3 + $0x78] sm:$0xff] %vm10869_vm8, %v2126_v4  ;;  %vm10871_vm8 = vcmask 31744  }
 0x1b7   : > { %v4559_v15 = vsel %vm9158_vm15, %v4254_v32, %v4558_v62  ;;  %v4262_v26 = vor.u32 %v4260_v33, %v4259_v5  ;;  %v4264_v17 = vrot.slane %v4259_v5, 4 }
 0x1b8   : > { %4560 = vst [vmem:[#allocation2 + $0x18] sm:$0xf] %v4559_v15  ;;  %v4552_v22 = vsel %vm9158_vm15, %v4237_v43, %v4551_v2  ;;  %v4245_v23 = vor.u32 %v4243_v9, %v4242_v8  ;;  %v4247_v61 = vrot.slane %v4242_v8, 4 }
 0x1b9   : > { %4553 = vst [vmem:[#allocation2 + $0xc] sm:$0xf] %v4552_v22  ;;  %v4263_v29 = vsel %vm9165_vm1, %v4255_v58, %v4262_v26  ;;  %v4563_v30 = vsel %vm9074_vm3, %v4264_v17, %v4562_v50  ;;  %v3024_v50 = vpop.permute.xlu0 %3023 }
 0x1ba   : > { %4561 = vst.msk [vmem:[#allocation2 + $0x1c] sm:$0xf] %vm10863_vm5, %v4263_v29  ;;  %4564 = vst [vmem:[#allocation2 + $0x20] sm:$0x1] %v4563_v30  ;;  %v4246_v34 = vsel %vm9165_vm1, %v4238_v19, %v4245_v23  ;;  %v4556_v36 = vsel %vm9074_vm3, %v4247_v61, %v4555_v18 }
 0x1bb   : > { %4554 = vst.msk [vmem:[#allocation2 + $0x10] sm:$0xf] %vm10865_vm12, %v4246_v34  ;;  %4557 = vst [vmem:[#allocation2 + $0x14] sm:$0x1] %v4556_v36 }
 0x1bc   : > { %3058 = vst.msk [vmem:[#allocation3 + $0x70] sm:$0xff] %vm3043_vm10, %v3024_v50 }
 0x1bd   : > { %v2559_v34 = vpop.permute.xlu1 %2558 }
 0x1be   : > { %2592 = vst.msk [vmem:[#allocation3 + $0x78] sm:$0xff] %vm2576_vm13, %v2559_v34 }
 0x1c1   : > { %v8728_v11 = vld [vmem:[#allocation2 + $0x18] sm:$0xff]   ;;  %v8731_v21 = vld [vmem:[#allocation2 + $0x20] ss:$0 sps:$4 sm:$0x11]  }
 0x1c2   : > { %v8729_v35 = vld [vmem:[#allocation2 + $0x18] sm:$0xff]   ;;  %6535 = vrot.lane.b32.xlu0 %v8728_v11, %s9018_s10  ;;  %v8732_v57 = vld [vmem:[#allocation2 + $0xc] sm:$0xff]   ;;  %v6315_v47 = vrot.slane %v8731_v21, 1  ;;  %v8734_v49 = vld [vmem:[#allocation2 + $0x20] ss:$0 sps:$4 sm:$0x11]  }
 0x1c3   : > { %v8730_v41 = vld [vmem:[#allocation2 + $0x18] sm:$0xfe]   ;;  %5641 = vrot.lane.b32.xlu1 %v8729_v35, %s9017_s9  ;;  %v8735_v42 = vld [vmem:[#allocation2 + $0xc] sm:$0xfe]   ;;  %v7208_v24 = vrot.slane %v8734_v49, 1  ;;  %v8398_v8 = vpop.f32.mrb[4].mxu0 }
 0x1c4   : > { %v6314_v45 = vrot.slane %v8730_v41, 1  ;;  %v8733_v48 = vld [vmem:[#allocation2 + $0x18] sm:$0xfe]   ;;  %v8736_v14 = vld [vmem:[#allocation2 + $0x14] ss:$0 sps:$4 sm:$0x11]   ;;  %v3937_v10 = vadd.f32 %v8398_v8, %v9979_v37 }
 0x1c5   : > { %v8739_v52 = vld [vmem:[#allocation2 + $0x18] sm:$0xff]   ;;  %v7207_v54 = vrot.slane %v8733_v48, 1  ;;  %v5418_v7 = vrot.slane %v8735_v42, 1  ;;  %v5419_v46 = vrot.slane %v8736_v14, 1  ;;  %v8741_v33 = vld [vmem:[#allocation2 + $0xc] sm:$0xfe]   ;;  %v3457_v48 = vpop.permute.xlu0 %3456 }
 0x1c6   : > { %v6316_v53 = vsel %vm1869_vm6, %v6314_v45, %v6315_v47  ;;  %5639 = vrot.lane.b32.xlu0 %v8732_v57, %s9017_s9  ;;  %v5892_v6 = vshrl.u32 %v8739_v52, 16  ;;  %v8737_v56 = vld [vmem:[#allocation2 + $0x18] sm:$0xfe]   ;;  %v8738_v55 = vld [vmem:[#allocation2 + $0x20] ss:$0 sps:$4 sm:$0x11]   ;;  %v2848_v47 = vpop.permute.xlu1 %2847 }
 0x1c7   : > { %6361 = vrot.lane.b32.xlu1 %v6316_v53, %s9019_s11  ;;  %v7209_v59 = vsel %vm1869_vm6, %v7207_v54, %v7208_v24  ;;  %v5894_v60 = vshll.u32 %v8739_v52, 16  ;;  %v5420_v51 = vsel %vm1869_vm6, %v5418_v7, %v5419_v46  ;;  %v5421_v27 = vrot.slane %v8737_v56, 1  ;;  %v8743_v62 = vld [vmem:[#allocation2 + $0x18] sm:$0xff]   ;;  %v8740_v63 = vld [vmem:[#allocation2 + $0x20] ss:$0 sps:$4 sm:$0x11]  }
 0x1c8   : > { %v5422_v31 = vrot.slane %v8738_v55, 1  ;;  %v10025_v0 = vld [vmem:[#allocation2 + $0x18] sm:$0xff]   ;;  %v5899_v5 = vshll.u32 %v8740_v63, 16  ;;  %v8742_v43 = vld [vmem:[#allocation2 + $0x14] ss:$0 sps:$4 sm:$0x11]  }
 0x1c9   : > { %v5896_v3 = vrot.slane %v5894_v60, 1  ;;  %v5008_v9 = vshrl.u32 %v8743_v62, 16  ;;  %v3928_v13 = vpop.f32.mrb[5].mxu0  ;;  %v6311_v15 = vrot.slane %v8741_v33, 1  ;;  %v6312_v26 = vrot.slane %v8742_v43, 1  ;;  %2881 = vst.msk [vmem:[#allocation3 + $0x78] sm:$0xff] %vm2865_vm2, %v2848_v47 }
 0x1ca   : > { %7255 = vrot.lane.b32.xlu0 %v7209_v59, %s9020_s12  ;;  %v5423_v32 = vsel %vm1869_vm6, %v5421_v27, %v5422_v31  ;;  %v5901_v58 = vrot.slane %v5899_v5, 1  ;;  %v3929_v17 = vadd.f32 %v9979_v37, %v3928_v13  ;;  %v8399_v18 = vpop.f32.mrb[6].mxu0  ;;  %v8744_v19 = vld [vmem:[#allocation2 + $0x20] ss:$0 sps:$4 sm:$0x11]   ;;  %v5010_v22 = vshll.u32 %v8743_v62, 16  ;;  %v3746_v5 = vpop.permute.xlu0 %3745 }
 0x1cb   : > { %5465 = vrot.lane.b32.xlu1 %v5420_v51, %s9015_s7  ;;  %v5897_v2 = vor.u32 %v5896_v3, %v5892_v6  ;;  %v6776_v23 = vshrl.u32 %v10025_v0, 16  ;;  %vm4045_vm5 = vcmp.gt.f32.partialorder %v3937_v10, 0.0  ;;  %v4077_v61 = vmul.f32 0.01, %v3937_v10  ;;  %v3931_v29 = vpop.f32.mrb[7].mxu0  ;;  %3491 = vst.msk [vmem:[#allocation3 + $0x70] sm:$0xff] %vm3476_vm14, %v3457_v48 }
 0x1cc   : > { %v3940_v28 = vadd.f32 %v8399_v18, %v9979_v37  ;;  %vm4043_vm4 = vcmp.gt.f32.partialorder %v3929_v17, 0.0  ;;  %v4075_v36 = vmul.f32 0.01, %v3929_v17  ;;  %v3932_v38 = vadd.f32 %v9979_v37, %v3931_v29  ;;  %v4572_v42 = vld [vmem:[#allocation2 + $0x30] sm:$0xf]  ;;  %3780 = vst.msk [vmem:[#allocation3 + $0x70] sm:$0xff] %vm10870_vm11, %v3746_v5 }
 0x1cd   : > { %v5902_v30 = vsel %vm1435_vm9, %v5897_v2, %v5901_v58  ;;  %v6313_v39 = vsel %vm1869_vm6, %v6311_v15, %v6312_v26  ;;  %v4109_v25 = vsel %vm4045_vm5, %v3937_v10, %v4077_v61  ;;  %v5012_v16 = vrot.slane %v5010_v22, 1  ;;  %v8746_v46 = vld [vmem:[#allocation2 + $0x20] ss:$0 sps:$4 sm:$0x11]   ;;  %v4565_v59 = vld [vmem:[#allocation2 + $0x24] sm:$0xf]  ;;  %v3026_v2 = vpop.permute.xlu1 %3025  ;;  %vm10872_vm5 = vmmov %vm10871_vm8 }
 0x1ce   : > { %5467 = vrot.lane.b32.xlu0 %v5423_v32, %s9015_s7  ;;  %vm4046_vm12 = vcmp.gt.f32.partialorder %v3940_v28, 0.0  ;;  %v4078_v40 = vmul.f32 0.01, %v3940_v28  ;;  %v8322_v11 = vpack.c.bf16 %v4109_v25, %v4109_v25  ;;  %v4107_v35 = vsel %vm4043_vm4, %v3929_v17, %v4075_v36  ;;  %v8747_v51 = vld [vmem:[#allocation2 + $0xc] sm:$0xff]   ;;  %v4576_v62 = vld [vmem:[#allocation2 + $0x38] sm:$0x1]  ;;  %vm10873_vm4 = vmmov %vm10872_vm5 }
 0x1cf   : > { %6073 = vrot.lane.b32.xlu1 %v5902_v30, %s9021_s13  ;;  %vm4044_vm0 = vcmp.gt.f32.partialorder %v3932_v38, 0.0  ;;  %v4076_v41 = vmul.f32 0.01, %v3932_v38  ;;  %v8320_v21 = vpack.c.bf16 %v4107_v35, %v4107_v35  ;;  %v5013_v44 = vor.u32 %v5012_v16, %v5008_v9  ;;  %v8821_v32 = vld [vmem:[#allocation2] sm:$0xff]   ;;  %3059 = vst.msk [vmem:[#allocation3 + $0x78] sm:$0xff] %vm3043_vm10, %v3026_v2  ;;  %v8842_v17 = vld [vmem:[#allocation2 + $0x18] sm:$0xff]  }
 0x1d0   : > { %v4110_v57 = vsel %vm4046_vm12, %v3940_v28, %v4078_v40  ;;  %v5015_v45 = vshll.u32 %v8744_v19, 16  ;;  %v4283_v49 = vshrl.u32 %v8322_v11, 16  ;;  %v4286_v52 = vshll.u32 %v8322_v11, 16  ;;  %v8748_v9 = vld [vmem:[#allocation2 + $0x14] ss:$0 sps:$4 sm:$0x11]  }
 0x1d1   : > { %v8323_v53 = vpack.c.bf16 %v4110_v57, %v4110_v57  ;;  %v4108_v54 = vsel %vm4044_vm0, %v3932_v38, %v4076_v41  ;;  %v4266_v14 = vshrl.u32 %v8320_v21, 16  ;;  %v4269_v24 = vshll.u32 %v8320_v21, 16  ;;  %v4569_v15 = vld [vmem:[#allocation2 + $0x2c] sm:$0x1]  ;;  %4791 = vst.msk [vmem:[#allocation3] sm:$0xff] %vm10871_vm8, %v8821_v32  ;;  %v3459_v25 = vpop.permute.xlu1 %3458 }
 0x1d2   : > { %6359 = vrot.lane.b32.xlu0 %v6313_v39, %s9019_s11  ;;  %v8321_v6 = vpack.c.bf16 %v4108_v54, %v4108_v54  ;;  %v5017_v7 = vrot.slane %v5015_v45, 1  ;;  %v4285_v56 = vrot.slane %v4283_v49, 7  ;;  %v6778_v4 = vshll.u32 %v10025_v0, 16  ;;  %v8749_v28 = vld [vmem:[#allocation2 + $0xc] sm:$0xff]   ;;  %4793 = vst.msk [vmem:[#allocation3 + $0x10] sm:$0xff] %vm10872_vm5, %v8842_v17 }
 0x1d3   : > { %v4291_v55 = vshrl.u32 %v8323_v53, 16  ;;  %v4294_v60 = vshll.u32 %v8323_v53, 16  ;;  %v4268_v27 = vrot.slane %v4266_v14, 7  ;;  %v6783_v26 = vshll.u32 %v8746_v46, 16  ;;  %v8847_v30 = vld [vmem:[#allocation2 + $0xc] sm:$0xff]   ;;  %3492 = vst.msk [vmem:[#allocation3 + $0x78] sm:$0xff] %vm3476_vm14, %v3459_v25  ;;  %v5176_v46 = vpop.permute.xlu0 %5175 }
 0x1d4   : > { %v4274_v31 = vshrl.u32 %v8321_v6, 16  ;;  %v4277_v63 = vshll.u32 %v8321_v6, 16  ;;  %v5018_v3 = vsel %vm1435_vm9, %v5013_v44, %v5017_v7  ;;  %v4288_v33 = vor.u32 %v4286_v52, %v4285_v56  ;;  %v8750_v29 = vld [vmem:[#allocation2 + $0x14] ss:$0 sps:$4 sm:$0x11]   ;;  %4792 = vst.msk [vmem:[#allocation3 + $0x8] sm:$0xff] %vm10873_vm4, %v8847_v30 }
 0x1d5   : > { %v4289_v43 = vrot.slane %v4285_v56, 4  ;;  %v4293_v50 = vrot.slane %v4291_v55, 7  ;;  %5179 = vrot.lane.b32.xlu1 %v5018_v3, %s9016_s8  ;;  %v6780_v8 = vrot.slane %v6778_v4, 1  ;;  %v4271_v10 = vor.u32 %v4269_v24, %v4268_v27  ;;  %v3748_v47 = vpop.permute.xlu1 %3747  ;;  %v3796_v48 = vld [vmem:[#allocation3 + $0x70] sm:$0xff] }
 0x1d6   : > { %v4272_v13 = vrot.slane %v4268_v27, 4  ;;  %v4276_v58 = vrot.slane %v4274_v31, 7  ;;  %v4573_v18 = vsel %vm9158_vm15, %v4288_v33, %v4572_v42  ;;  %v6785_v39 = vrot.slane %v6783_v26, 1  ;;  %3781 = vst.msk [vmem:[#allocation3 + $0x78] sm:$0xff] %vm10870_vm11, %v3748_v47  ;;  %8420 = vmatprep.mubr.msk.bf16.mxu0 %vm3825_vm7, %v3796_v48 }
 0x1d7   : > { %v4296_v19 = vor.u32 %v4294_v60, %v4293_v50  ;;  %v4298_v22 = vrot.slane %v4293_v50, 4  ;;  %v6781_v61 = vor.u32 %v6780_v8, %v6776_v23  ;;  %4574 = vst [vmem:[#allocation2 + $0x30] sm:$0xf] %v4573_v18  ;;  %v4566_v34 = vsel %vm9158_vm15, %v4271_v10, %v4565_v59 }
 0x1d8   : > { %v4279_v36 = vor.u32 %v4277_v63, %v4276_v58  ;;  %v4281_v38 = vrot.slane %v4276_v58, 4  ;;  %4567 = vst [vmem:[#allocation2 + $0x24] sm:$0xf] %v4566_v34  ;;  %v4998_v23 = vshll.u32 %v8747_v51, 16  ;;  %vm10874_vm12 = vcmask 27648   ;;  %v5464_v63 = vpop.permute.xlu0 %5463 }
 0x1d9   : > { %v4297_v40 = vsel %vm9165_vm1, %v4289_v43, %v4296_v19  ;;  %v4577_v0 = vsel %vm9074_vm3, %v4298_v22, %v4576_v62  ;;  %v6786_v35 = vsel %vm1435_vm9, %v6781_v61, %v6785_v39  ;;  %v5003_v41 = vshll.u32 %v8748_v9, 16  ;;  %vm10875_vm0 = vmmov %vm10874_vm12 }
 0x1da   : > { %4575 = vst.msk [vmem:[#allocation2 + $0x34] sm:$0xf] %vm10874_vm12, %v4297_v40  ;;  %4578 = vst [vmem:[#allocation2 + $0x38] sm:$0x1] %v4577_v0  ;;  %v4280_v16 = vsel %vm9165_vm1, %v4272_v13, %v4279_v36  ;;  %v4570_v11 = vsel %vm9074_vm3, %v4281_v38, %v4569_v15  ;;  %6967 = vrot.lane.b32.xlu0 %v6786_v35, %s9022_s14  ;;  %v4996_v21 = vshrl.u32 %v8747_v51, 16  ;;  %v5000_v57 = vrot.slane %v4998_v23, 1 }
 0x1db   : > { %4568 = vst.msk [vmem:[#allocation2 + $0x28] sm:$0xf] %vm10875_vm0, %v4280_v16  ;;  %4571 = vst [vmem:[#allocation2 + $0x2c] sm:$0x1] %v4570_v11  ;;  %v5882_v44 = vshll.u32 %v8749_v28, 16  ;;  %v5887_v45 = vshll.u32 %v8750_v29, 16 }
 0x1dc   : > { %v5001_v49 = vor.u32 %v5000_v57, %v4996_v21  ;;  %v5005_v52 = vrot.slane %v5003_v41, 1  ;;  %v5880_v53 = vshrl.u32 %v8749_v28, 16  ;;  %vm10876_vm8 = vcmask 64544  }
 0x1dd   : > { %v5884_v54 = vrot.slane %v5882_v44, 1  ;;  %v5889_v42 = vrot.slane %v5887_v45, 1  ;;  %5223 = vst.msk [vmem:[#allocation3] sm:$0xff] %vm10876_vm8, %v5176_v46  ;;  %v3797_v60 = vld [vmem:[#allocation3 + $0x78] sm:$0xff]  ;;  %vm10877_vm5 = vcmask 97344   ;;  %vm10878_vm8 = vcmask 31744  }
 0x1de   : > { %v5006_v14 = vsel %vm1435_vm9, %v5001_v49, %v5005_v52  ;;  %8421 = vmatmul.mubr.msk.bf16.gmra.mrb[28].mxu0 %vm3825_vm7, %v3797_v60  ;;  %5511 = vst.msk [vmem:[#allocation3] sm:$0xff] %vm10877_vm5, %v5464_v63  ;;  %vm10879_vm5 = vcmask 27648  }
 0x1df   : > { %v5885_v24 = vor.u32 %v5884_v54, %v5880_v53  ;;  %5177 = vrot.lane.b32.xlu1 %v5006_v14, %s9016_s8 }
 0x1e1   : > { %v5890_v6 = vsel %vm1435_vm9, %v5885_v24, %v5889_v42  ;;  %v8751_v7 = vld [vmem:[#allocation2 + $0x30] sm:$0xff]   ;;  %v8756_v4 = vld [vmem:[#allocation2 + $0x38] ss:$0 sps:$4 sm:$0x11]  }
 0x1e2   : > { %6071 = vrot.lane.b32.xlu0 %v5890_v6, %s9021_s13  ;;  %v8752_v56 = vld [vmem:[#allocation2 + $0x30] sm:$0xff]   ;;  %v8753_v59 = vld [vmem:[#allocation2 + $0x24] sm:$0xff]   ;;  %v8758_v31 = vld [vmem:[#allocation2 + $0x38] ss:$0 sps:$4 sm:$0x11]   ;;  %v6321_v3 = vrot.slane %v8756_v4, 1 }
 0x1e3   : > { %5645 = vrot.lane.b32.xlu1 %v8751_v7, %s9017_s9  ;;  %v8755_v55 = vld [vmem:[#allocation2 + $0x30] sm:$0xfe]   ;;  %v8754_v51 = vld [vmem:[#allocation2 + $0x24] sm:$0xff]   ;;  %v7214_v5 = vrot.slane %v8758_v31, 1 }
 0x1e4   : > { %v6320_v27 = vrot.slane %v8755_v55, 1  ;;  %v8757_v62 = vld [vmem:[#allocation2 + $0x30] sm:$0xfe]   ;;  %v8759_v33 = vld [vmem:[#allocation2 + $0x24] sm:$0xfe]  }
 0x1e5   : > { %v8763_v32 = vld [vmem:[#allocation2 + $0x30] sm:$0xff]   ;;  %v7213_v2 = vrot.slane %v8757_v62, 1  ;;  %v8760_v43 = vld [vmem:[#allocation2 + $0x2c] ss:$0 sps:$4 sm:$0x11]   ;;  %v5424_v8 = vrot.slane %v8759_v33, 1 }
 0x1e6   : > { %6539 = vrot.lane.b32.xlu0 %v8752_v56, %s9018_s10  ;;  %v5916_v50 = vshrl.u32 %v8763_v32, 16  ;;  %v5918_v9 = vshll.u32 %v8763_v32, 16  ;;  %v6322_v10 = vsel %vm1869_vm6, %v6320_v27, %v6321_v3  ;;  %v5425_v13 = vrot.slane %v8760_v43, 1  ;;  %v8761_v58 = vld [vmem:[#allocation2 + $0x30] sm:$0xfe]   ;;  %v8402_v36 = vpop.f32.mrb[8].mxu0 }
 0x1e7   : > { %6537 = vrot.lane.b32.xlu1 %v8753_v59, %s9018_s10  ;;  %v8762_v15 = vld [vmem:[#allocation2 + $0x38] ss:$0 sps:$4 sm:$0x11]   ;;  %v7215_v26 = vsel %vm1869_vm6, %v7213_v2, %v7214_v5  ;;  %v5427_v17 = vrot.slane %v8761_v58, 1  ;;  %v8765_v30 = vld [vmem:[#allocation2 + $0x24] sm:$0xfe]   ;;  %v3953_v25 = vadd.f32 %v8402_v36, %v9979_v37 }
 0x1e8   : > { %v5428_v18 = vrot.slane %v8762_v15, 1  ;;  %v8764_v19 = vld [vmem:[#allocation2 + $0x38] ss:$0 sps:$4 sm:$0x11]   ;;  %v5920_v22 = vrot.slane %v5918_v9, 1  ;;  %v5426_v61 = vsel %vm1869_vm6, %v5424_v8, %v5425_v13  ;;  %v8767_v39 = vld [vmem:[#allocation2 + $0x30] sm:$0xff]  }
 0x1e9   : > { %v5923_v29 = vshll.u32 %v8764_v19, 16  ;;  %v8766_v34 = vld [vmem:[#allocation2 + $0x2c] ss:$0 sps:$4 sm:$0x11]   ;;  %v3944_v40 = vpop.f32.mrb[9].mxu0  ;;  %v7210_v23 = vrot.slane %v8765_v30, 1 }
 0x1ea   : > { %5643 = vrot.lane.b32.xlu0 %v8754_v51, %s9017_s9  ;;  %v5921_v28 = vor.u32 %v5920_v22, %v5916_v50  ;;  %v5429_v38 = vsel %vm1869_vm6, %v5427_v17, %v5428_v18  ;;  %v7211_v16 = vrot.slane %v8766_v34, 1  ;;  %v3945_v11 = vadd.f32 %v9979_v37, %v3944_v40  ;;  %v8403_v35 = vpop.f32.mrb[10].mxu0  ;;  %v8768_v41 = vld [vmem:[#allocation2 + $0x38] ss:$0 sps:$4 sm:$0x11]   ;;  %v8771_v2 = vld [vmem:[#allocation2 + $0x24] sm:$0xff]  }
 0x1eb   : > { %6365 = vrot.lane.b32.xlu1 %v6322_v10, %s9019_s11  ;;  %v5925_v0 = vrot.slane %v5923_v29, 1  ;;  %v5032_v21 = vshrl.u32 %v8767_v39, 16  ;;  %v5034_v57 = vshll.u32 %v8767_v39, 16  ;;  %vm4049_vm4 = vcmp.gt.f32.partialorder %v3953_v25, 0.0  ;;  %v3947_v47 = vpop.f32.mrb[11].mxu0  ;;  %v8773_v17 = vld [vmem:[#allocation2 + $0x30] sm:$0xff]  }
 0x1ec   : > { %v4081_v44 = vmul.f32 0.01, %v3953_v25  ;;  %v3956_v45 = vadd.f32 %v8403_v35, %v9979_v37  ;;  %vm4047_vm12 = vcmp.gt.f32.partialorder %v3945_v11, 0.0  ;;  %v4079_v49 = vmul.f32 0.01, %v3945_v11  ;;  %v8775_v29 = vld [vmem:[#allocation2 + $0x24] sm:$0xff]  }
 0x1ed   : > { %v5926_v48 = vsel %vm1435_vm9, %v5921_v28, %v5925_v0  ;;  %v3948_v52 = vadd.f32 %v9979_v37, %v3947_v47  ;;  %v7212_v53 = vsel %vm1869_vm6, %v7210_v23, %v7211_v16  ;;  %v5036_v14 = vrot.slane %v5034_v57, 1  ;;  %v8769_v46 = vld [vmem:[#allocation2 + $0x24] sm:$0xfe]   ;;  %v8770_v37 = vld [vmem:[#allocation2 + $0x2c] ss:$0 sps:$4 sm:$0x11]  }
 0x1ee   : > { %7259 = vrot.lane.b32.xlu0 %v7215_v26, %s9020_s12  ;;  %v4113_v54 = vsel %vm4049_vm4, %v3953_v25, %v4081_v44  ;;  %vm4050_vm0 = vcmp.gt.f32.partialorder %v3956_v45, 0.0  ;;  %v4082_v42 = vmul.f32 0.01, %v3956_v45  ;;  %v4111_v6 = vsel %vm4047_vm12, %v3945_v11, %v4079_v49  ;;  %v4586_v31 = vld [vmem:[#allocation2 + $0x48] sm:$0xf]  ;;  %v8869_v16 = vld [vmem:[#allocation2 + $0x30] sm:$0xff]   ;;  %vm10880_vm4 = vmmov %vm10879_vm5 }
 0x1ef   : > { %5469 = vrot.lane.b32.xlu1 %v5426_v61, %s9015_s7  ;;  %v8326_v24 = vpack.c.bf16 %v4113_v54, %v4113_v54  ;;  %vm4048_vm11 = vcmp.gt.f32.partialorder %v3948_v52, 0.0  ;;  %v4080_v7 = vmul.f32 0.01, %v3948_v52  ;;  %v8324_v56 = vpack.c.bf16 %v4111_v6, %v4111_v6  ;;  %v4579_v43 = vld [vmem:[#allocation2 + $0x3c] sm:$0xf]  ;;  %v8777_v49 = vld [vmem:[#allocation2 + $0x24] sm:$0xff]   ;;  %vm10881_vm12 = vmmov %vm10878_vm8 }
 0x1f0   : > { %v4114_v59 = vsel %vm4050_vm0, %v3956_v45, %v4082_v42  ;;  %v5037_v55 = vor.u32 %v5036_v14, %v5032_v21  ;;  %v5039_v60 = vshll.u32 %v8768_v41, 16  ;;  %v6317_v8 = vrot.slane %v8769_v46, 1  ;;  %v8772_v9 = vld [vmem:[#allocation2 + $0x2c] ss:$0 sps:$4 sm:$0x11]   ;;  %4795 = vst.msk [vmem:[#allocation3 + $0x20] sm:$0xff] %vm10878_vm8, %v8869_v16 }
 0x1f1   : > { %v4317_v4 = vshrl.u32 %v8326_v24, 16  ;;  %v8327_v51 = vpack.c.bf16 %v4114_v59, %v4114_v59  ;;  %v4112_v27 = vsel %vm4048_vm11, %v3948_v52, %v4080_v7  ;;  %v4320_v62 = vshll.u32 %v8326_v24, 16  ;;  %v4590_v58 = vld [vmem:[#allocation2 + $0x50] sm:$0x1]  ;;  %v4583_v61 = vld [vmem:[#allocation2 + $0x44] sm:$0x1] }
 0x1f2   : > { %5471 = vrot.lane.b32.xlu0 %v5429_v38, %s9015_s7  ;;  %v4300_v63 = vshrl.u32 %v8324_v56, 16  ;;  %v8325_v3 = vpack.c.bf16 %v4112_v27, %v4112_v27  ;;  %v5041_v32 = vrot.slane %v5039_v60, 1  ;;  %v4303_v33 = vshll.u32 %v8324_v56, 16  ;;  %v8774_v39 = vld [vmem:[#allocation2 + $0x38] ss:$0 sps:$4 sm:$0x11]  }
 0x1f3   : > { %6077 = vrot.lane.b32.xlu1 %v5926_v48, %s9021_s13  ;;  %v4319_v5 = vrot.slane %v4317_v4, 7  ;;  %v4325_v50 = vshrl.u32 %v8327_v51, 16  ;;  %v4328_v13 = vshll.u32 %v8327_v51, 16  ;;  %v6318_v28 = vrot.slane %v8770_v37, 1  ;;  %v8879_v51 = vld [vmem:[#allocation2 + $0x24] sm:$0xff]  }
 0x1f4   : > { %v4302_v10 = vrot.slane %v4300_v63, 7  ;;  %v4308_v15 = vshrl.u32 %v8325_v3, 16  ;;  %v5042_v26 = vsel %vm1435_vm9, %v5037_v55, %v5041_v32  ;;  %v4311_v22 = vshll.u32 %v8325_v3, 16  ;;  %v8776_v48 = vld [vmem:[#allocation2 + $0x2c] ss:$0 sps:$4 sm:$0x11]  }
 0x1f5   : > { %v4322_v18 = vor.u32 %v4320_v62, %v4319_v5  ;;  %v4327_v19 = vrot.slane %v4325_v50, 7  ;;  %v4323_v30 = vrot.slane %v4319_v5, 4  ;;  %v6319_v23 = vsel %vm1869_vm6, %v6317_v8, %v6318_v28  ;;  %v8778_v55 = vld [vmem:[#allocation2 + $0x2c] ss:$0 sps:$4 sm:$0x11]   ;;  %4794 = vst.msk [vmem:[#allocation3 + $0x18] sm:$0xff] %vm10881_vm12, %v8879_v51  ;;  %vm10882_vm12 = vmmov %vm10880_vm4 }
 0x1f6   : > { %7257 = vrot.lane.b32.xlu0 %v7212_v53, %s9020_s12  ;;  %v4305_v34 = vor.u32 %v4303_v33, %v4302_v10  ;;  %v4306_v36 = vrot.slane %v4302_v10, 4  ;;  %v4310_v38 = vrot.slane %v4308_v15, 7  ;;  %v6790_v21 = vshll.u32 %v8771_v2, 16 }
 0x1f7   : > { %5183 = vrot.lane.b32.xlu1 %v5042_v26, %s9016_s8  ;;  %v4587_v25 = vsel %vm9158_vm15, %v4322_v18, %v4586_v31  ;;  %v4330_v40 = vor.u32 %v4328_v13, %v4327_v19  ;;  %v4332_v0 = vrot.slane %v4327_v19, 4  ;;  %v6788_v45 = vshrl.u32 %v8771_v2, 16 }
 0x1f8   : > { %4588 = vst [vmem:[#allocation2 + $0x48] sm:$0xf] %v4587_v25  ;;  %v4580_v11 = vsel %vm9158_vm15, %v4305_v34, %v4579_v43  ;;  %v4313_v35 = vor.u32 %v4311_v22, %v4310_v38  ;;  %v4315_v41 = vrot.slane %v4310_v38, 4  ;;  %v6795_v47 = vshll.u32 %v8772_v9, 16 }
 0x1f9   : > { %4581 = vst [vmem:[#allocation2 + $0x3c] sm:$0xf] %v4580_v11  ;;  %v4331_v57 = vsel %vm9165_vm1, %v4323_v30, %v4330_v40  ;;  %v4591_v44 = vsel %vm9074_vm3, %v4332_v0, %v4590_v58  ;;  %v6792_v54 = vrot.slane %v6790_v21, 1  ;;  %v6802_v42 = vshll.u32 %v8773_v17, 16 }
 0x1fa   : > { %6363 = vrot.lane.b32.xlu0 %v6319_v23, %s9019_s11  ;;  %4589 = vst.msk [vmem:[#allocation2 + $0x4c] sm:$0xf] %vm10879_vm5, %v4331_v57  ;;  %4592 = vst [vmem:[#allocation2 + $0x50] sm:$0x1] %v4591_v44  ;;  %v4314_v52 = vsel %vm9165_vm1, %v4306_v36, %v4313_v35  ;;  %v4584_v53 = vsel %vm9074_vm3, %v4315_v41, %v4583_v61  ;;  %v6800_v14 = vshrl.u32 %v8773_v17, 16  ;;  %v6807_v24 = vshll.u32 %v8774_v39, 16 }
 0x1fb   : > { %4582 = vst.msk [vmem:[#allocation2 + $0x40] sm:$0xf] %vm10880_vm4, %v4314_v52  ;;  %4585 = vst [vmem:[#allocation2 + $0x44] sm:$0x1] %v4584_v53  ;;  %v5022_v6 = vshll.u32 %v8775_v29, 16  ;;  %v6793_v7 = vor.u32 %v6792_v54, %v6788_v45  ;;  %v6797_v46 = vrot.slane %v6795_v47, 1 }
 0x1fc   : > { %v6804_v56 = vrot.slane %v6802_v42, 1  ;;  %v5027_v59 = vshll.u32 %v8776_v48, 16  ;;  %v5020_v60 = vshrl.u32 %v8775_v29, 16  ;;  %v5906_v4 = vshll.u32 %v8777_v49, 16  ;;  %v10139_v53 = vld [vmem:[%s10807_s4] ss:$0 sm:$0xff] }
 0x1fd   : > { %v5024_v37 = vrot.slane %v5022_v6, 1  ;;  %v6798_v27 = vsel %vm1435_vm9, %v6793_v7, %v6797_v46  ;;  %v6809_v31 = vrot.slane %v6807_v24, 1  ;;  %v5911_v63 = vshll.u32 %v8778_v55, 16 }
 0x1fe   : > { %v6805_v62 = vor.u32 %v6804_v56, %v6800_v14  ;;  %6969 = vrot.lane.b32.xlu1 %v6798_v27, %s9022_s14  ;;  %v5904_v32 = vshrl.u32 %v8777_v49, 16  ;;  %v5908_v2 = vrot.slane %v5906_v4, 1  ;;  %v5029_v33 = vrot.slane %v5027_v59, 1 }
 0x1ff   : > { %v5025_v3 = vor.u32 %v5024_v37, %v5020_v60  ;;  %v5913_v8 = vrot.slane %v5911_v63, 1 }
 0x200   : > { %v6810_v5 = vsel %vm1435_vm9, %v6805_v62, %v6809_v31  ;;  %v5909_v43 = vor.u32 %v5908_v2, %v5904_v32 }
 0x201   : > { %6971 = vrot.lane.b32.xlu0 %v6810_v5, %s9022_s14  ;;  %v5030_v50 = vsel %vm1435_vm9, %v5025_v3, %v5029_v33  ;;  %v8779_v9 = vld [vmem:[#allocation2 + $0x48] sm:$0xff]   ;;  %v8784_v15 = vld [vmem:[#allocation2 + $0x50] ss:$0 sps:$4 sm:$0x11]  }
 0x202   : > { %5181 = vrot.lane.b32.xlu1 %v5030_v50, %s9016_s8  ;;  %v5914_v10 = vsel %vm1435_vm9, %v5909_v43, %v5913_v8  ;;  %v8783_v13 = vld [vmem:[#allocation2 + $0x48] sm:$0xfe]   ;;  %v8781_v18 = vld [vmem:[#allocation2 + $0x3c] sm:$0xff]   ;;  %v6327_v19 = vrot.slane %v8784_v15, 1 }
 0x203   : > { %v8780_v58 = vld [vmem:[#allocation2 + $0x48] sm:$0xff]   ;;  %v6326_v26 = vrot.slane %v8783_v13, 1  ;;  %v8786_v61 = vld [vmem:[#allocation2 + $0x50] ss:$0 sps:$4 sm:$0x11]   ;;  %v8782_v28 = vld [vmem:[#allocation2 + $0x3c] sm:$0xff]  }
 0x204   : > { %v8791_v17 = vld [vmem:[#allocation2 + $0x48] sm:$0xff]   ;;  %v7220_v30 = vrot.slane %v8786_v61, 1  ;;  %v8787_v34 = vld [vmem:[#allocation2 + $0x3c] sm:$0xfe]   ;;  %v8406_v45 = vpop.f32.mrb[12].mxu0 }
 0x205   : > { %6075 = vrot.lane.b32.xlu0 %v5914_v10, %s9021_s13  ;;  %v8785_v22 = vld [vmem:[#allocation2 + $0x48] sm:$0xfe]   ;;  %v8788_v36 = vld [vmem:[#allocation2 + $0x44] ss:$0 sps:$4 sm:$0x11]   ;;  %v5940_v38 = vshrl.u32 %v8791_v17, 16  ;;  %v6328_v41 = vsel %vm1869_vm6, %v6326_v26, %v6327_v19  ;;  %v3969_v54 = vadd.f32 %v10139_v53, %v8406_v45 }
 0x206   : > { %5649 = vrot.lane.b32.xlu1 %v8779_v9, %s9017_s9  ;;  %v7219_v29 = vrot.slane %v8785_v22, 1  ;;  %v10128_v39 = vld [vmem:[#allocation2 + $0x48] sm:$0xff]   ;;  %v5430_v25 = vrot.slane %v8787_v34, 1  ;;  %v5942_v0 = vshll.u32 %v8791_v17, 16  ;;  %v5431_v23 = vrot.slane %v8788_v36, 1  ;;  %v3960_v42 = vpop.f32.mrb[13].mxu0 }
 0x207   : > { %v8789_v40 = vld [vmem:[#allocation2 + $0x48] sm:$0xfe]   ;;  %v8790_v16 = vld [vmem:[#allocation2 + $0x50] ss:$0 sps:$4 sm:$0x11]   ;;  %v5056_v52 = vshrl.u32 %v10128_v39, 16  ;;  %v3961_v7 = vadd.f32 %v10139_v53, %v3960_v42 }
 0x208   : > { %v5433_v11 = vrot.slane %v8789_v40, 1  ;;  %v5944_v35 = vrot.slane %v5942_v0, 1  ;;  %v5434_v21 = vrot.slane %v8790_v16, 1  ;;  %v8792_v57 = vld [vmem:[#allocation2 + $0x50] ss:$0 sps:$4 sm:$0x11]   ;;  %v7221_v47 = vsel %vm1869_vm6, %v7219_v29, %v7220_v30 }
 0x209   : > { %6543 = vrot.lane.b32.xlu0 %v8780_v58, %s9018_s10  ;;  %v8793_v44 = vld [vmem:[#allocation2 + $0x3c] sm:$0xfe]   ;;  %v5947_v48 = vshll.u32 %v8792_v57, 16  ;;  %v8794_v49 = vld [vmem:[#allocation2 + $0x44] ss:$0 sps:$4 sm:$0x11]   ;;  %v5432_v14 = vsel %vm1869_vm6, %v5430_v25, %v5431_v23 }
 0x20a   : > { %6541 = vrot.lane.b32.xlu1 %v8781_v18, %s9018_s10  ;;  %v5945_v24 = vor.u32 %v5944_v35, %v5940_v38  ;;  %v7216_v6 = vrot.slane %v8793_v44, 1  ;;  %v8407_v46 = vpop.f32.mrb[14].mxu0  ;;  %v7217_v59 = vrot.slane %v8794_v49, 1  ;;  %v5058_v55 = vshll.u32 %v10128_v39, 16  ;;  %v8797_v10 = vld [vmem:[#allocation2 + $0x3c] sm:$0xfe]  }
 0x20b   : > { %v5949_v56 = vrot.slane %v5947_v48, 1  ;;  %vm4053_vm0 = vcmp.gt.f32.partialorder %v3969_v54, 0.0  ;;  %v4085_v60 = vmul.f32 0.01, %v3969_v54  ;;  %v3972_v37 = vadd.f32 %v10139_v53, %v8407_v46  ;;  %v3963_v4 = vpop.f32.mrb[15].mxu0  ;;  %v8799_v39 = vld [vmem:[#allocation2 + $0x3c] sm:$0xff]  }
 0x20c   : > { %vm4051_vm11 = vcmp.gt.f32.partialorder %v3961_v7, 0.0  ;;  %v4083_v51 = vmul.f32 0.01, %v3961_v7  ;;  %v3964_v27 = vadd.f32 %v10139_v53, %v3963_v4  ;;  %v5435_v62 = vsel %vm1869_vm6, %v5433_v11, %v5434_v21  ;;  %v8796_v31 = vld [vmem:[#allocation2 + $0x50] ss:$0 sps:$4 sm:$0x11]  }
 0x20d   : > { %5647 = vrot.lane.b32.xlu0 %v8782_v28, %s9017_s9  ;;  %v4117_v63 = vsel %vm4053_vm0, %v3969_v54, %v4085_v60  ;;  %vm4054_vm8 = vcmp.gt.f32.partialorder %v3972_v37, 0.0  ;;  %v4086_v3 = vmul.f32 0.01, %v3972_v37  ;;  %v5950_v32 = vsel %vm1435_vm9, %v5945_v24, %v5949_v56  ;;  %v8798_v17 = vld [vmem:[#allocation2 + $0x44] ss:$0 sps:$4 sm:$0x11]  }
 0x20e   : > { %6369 = vrot.lane.b32.xlu1 %v6328_v41, %s9019_s11  ;;  %v8330_v2 = vpack.c.bf16 %v4117_v63, %v4117_v63  ;;  %v4115_v5 = vsel %vm4051_vm11, %v3961_v7, %v4083_v51  ;;  %vm4052_vm5 = vcmp.gt.f32.partialorder %v3964_v27, 0.0  ;;  %v4084_v33 = vmul.f32 0.01, %v3964_v27  ;;  %v4600_v19 = vld [vmem:[#allocation2 + $0x60] sm:$0xf]  ;;  %v8801_v45 = vld [vmem:[#allocation2 + $0x48] sm:$0xff]  }
 0x20f   : > { %v8328_v43 = vpack.c.bf16 %v4115_v5, %v4115_v5  ;;  %v4118_v50 = vsel %vm4054_vm8, %v3972_v37, %v4086_v3  ;;  %v5060_v8 = vrot.slane %v5058_v55, 1  ;;  %v5063_v9 = vshll.u32 %v8796_v31, 16  ;;  %v4593_v34 = vld [vmem:[#allocation2 + $0x54] sm:$0xf]  ;;  %v4604_v0 = vld [vmem:[#allocation2 + $0x68] sm:$0x1] }
 0x210   : > { %v4351_v13 = vshrl.u32 %v8330_v2, 16  ;;  %v8331_v58 = vpack.c.bf16 %v4118_v50, %v4118_v50  ;;  %v4116_v15 = vsel %vm4052_vm5, %v3964_v27, %v4084_v33  ;;  %v7218_v26 = vsel %vm1869_vm6, %v7216_v6, %v7217_v59  ;;  %v4597_v21 = vld [vmem:[#allocation2 + $0x5c] sm:$0x1]  ;;  %v8800_v44 = vld [vmem:[#allocation2 + $0x44] ss:$0 sps:$4 sm:$0x11]  }
 0x211   : > { %7263 = vrot.lane.b32.xlu0 %v7221_v47, %s9020_s12  ;;  %v4354_v18 = vshll.u32 %v8330_v2, 16  ;;  %v4334_v22 = vshrl.u32 %v8328_v43, 16  ;;  %v8329_v61 = vpack.c.bf16 %v4116_v15, %v4116_v15  ;;  %v5061_v28 = vor.u32 %v5060_v8, %v5056_v52  ;;  %v8803_v54 = vld [vmem:[#allocation2 + $0x3c] sm:$0xff]   ;;  %v8802_v46 = vld [vmem:[#allocation2 + $0x50] ss:$0 sps:$4 sm:$0x11]  }
 0x212   : > { %5473 = vrot.lane.b32.xlu1 %v5432_v14, %s9015_s7  ;;  %v4353_v29 = vrot.slane %v4351_v13, 7  ;;  %v4337_v30 = vshll.u32 %v8328_v43, 16  ;;  %v4359_v36 = vshrl.u32 %v8331_v58, 16  ;;  %v5065_v38 = vrot.slane %v5063_v9, 1  ;;  %v8870_v42 = vld [vmem:[%s10808_s5] sm:$0xff]   ;;  %v8874_v56 = vld [vmem:[%s10808_s5 + $0x8] sm:$0xff]  }
 0x213   : > { %v4336_v25 = vrot.slane %v4334_v22, 7  ;;  %v4362_v40 = vshll.u32 %v8331_v58, 16  ;;  %v4342_v23 = vshrl.u32 %v8329_v61, 16  ;;  %v6323_v16 = vrot.slane %v8797_v10, 1  ;;  %v8805_v4 = vld [vmem:[#allocation2 + $0x3c] sm:$0xff]   ;;  %8424 = vmatprep.subr.bf16.mxu1 %v8870_v42  ;;  %v8902_v5 = vld [vmem:[#allocation2 + $0x48] sm:$0xff]  }
 0x214   : > { %v4356_v11 = vor.u32 %v4354_v18, %v4353_v29  ;;  %v4361_v35 = vrot.slane %v4359_v36, 7  ;;  %v4345_v41 = vshll.u32 %v8329_v61, 16  ;;  %v5066_v57 = vsel %vm1435_vm9, %v5061_v28, %v5065_v38  ;;  %8425 = vmatpush3.bf16.msra.mxu1 %v8870_v42  ;;  %v8804_v2 = vld [vmem:[#allocation2 + $0x44] ss:$0 sps:$4 sm:$0x11]  }
 0x215   : > { %5475 = vrot.lane.b32.xlu0 %v5435_v62, %s9015_s7  ;;  %v4357_v47 = vrot.slane %v4353_v29, 4  ;;  %v4339_v48 = vor.u32 %v4337_v30, %v4336_v25  ;;  %v4344_v49 = vrot.slane %v4342_v23, 7  ;;  %v6324_v52 = vrot.slane %v8798_v17, 1  ;;  %8426 = vmatprep.subr.bf16.mxu1 %v8874_v56  ;;  %v8806_v17 = vld [vmem:[#allocation2 + $0x44] ss:$0 sps:$4 sm:$0x11]  }
 0x216   : > { %6081 = vrot.lane.b32.xlu1 %v5950_v32, %s9021_s13  ;;  %v4601_v14 = vsel %vm9158_vm15, %v4356_v11, %v4600_v19  ;;  %v4340_v24 = vrot.slane %v4336_v25, 4  ;;  %v4364_v6 = vor.u32 %v4362_v40, %v4361_v35  ;;  %v4366_v7 = vrot.slane %v4361_v35, 4 }
 0x217   : > { %4602 = vst [vmem:[#allocation2 + $0x60] sm:$0xf] %v4601_v14  ;;  %v4594_v59 = vsel %vm9158_vm15, %v4339_v48, %v4593_v34  ;;  %v4347_v55 = vor.u32 %v4345_v41, %v4344_v49  ;;  %v4349_v60 = vrot.slane %v4344_v49, 4  ;;  %v6325_v37 = vsel %vm1869_vm6, %v6323_v16, %v6324_v52 }
 0x218   : > { %4595 = vst [vmem:[#allocation2 + $0x54] sm:$0xf] %v4594_v59  ;;  %v4365_v51 = vsel %vm9165_vm1, %v4357_v47, %v4364_v6  ;;  %v4605_v27 = vsel %vm9074_vm3, %v4366_v7, %v4604_v0  ;;  %v6814_v62 = vshll.u32 %v8799_v39, 16  ;;  %v6819_v31 = vshll.u32 %v8800_v44, 16  ;;  %8427 = vmatpush3.bf16.msra.mxu1 %v8874_v56 }
 0x219   : > { %7261 = vrot.lane.b32.xlu0 %v7218_v26, %s9020_s12  ;;  %4603 = vst.msk [vmem:[#allocation2 + $0x64] sm:$0xf] %vm10880_vm4, %v4365_v51  ;;  %4606 = vst [vmem:[#allocation2 + $0x68] sm:$0x1] %v4605_v27  ;;  %v4348_v63 = vsel %vm9165_vm1, %v4340_v24, %v4347_v55  ;;  %v4598_v3 = vsel %vm9074_vm3, %v4349_v60, %v4597_v21  ;;  %v6826_v32 = vshll.u32 %v8801_v45, 16  ;;  %v6812_v33 = vshrl.u32 %v8799_v39, 16 }
 0x21a   : > { %5187 = vrot.lane.b32.xlu1 %v5066_v57, %s9016_s8  ;;  %4596 = vst.msk [vmem:[#allocation2 + $0x58] sm:$0xf] %vm10882_vm12, %v4348_v63  ;;  %4599 = vst [vmem:[#allocation2 + $0x5c] sm:$0x1] %v4598_v3  ;;  %v6816_v43 = vrot.slane %v6814_v62, 1  ;;  %v6831_v50 = vshll.u32 %v8802_v46, 16 }
 0x21b   : > { %v6821_v8 = vrot.slane %v6819_v31, 1  ;;  %v6824_v9 = vshrl.u32 %v8801_v45, 16  ;;  %v6828_v10 = vrot.slane %v6826_v32, 1  ;;  %v5046_v13 = vshll.u32 %v8803_v54, 16 }
 0x21c   : > { %vm10883_vm0 = vcmask 31744   ;;  %v6817_v58 = vor.u32 %v6816_v43, %v6812_v33  ;;  %v5044_v15 = vshrl.u32 %v8803_v54, 16  ;;  %v5051_v26 = vshll.u32 %v8804_v2, 16 }
 0x21d   : > { %6367 = vrot.lane.b32.xlu0 %v6325_v37, %s9019_s11  ;;  %4797 = vst.msk [vmem:[#allocation3 + $0x30] sm:$0xff] %vm10883_vm0, %v8902_v5  ;;  %v5930_v18 = vshll.u32 %v8805_v4, 16  ;;  %v6829_v19 = vor.u32 %v6828_v10, %v6824_v9  ;;  %v6833_v22 = vrot.slane %v6831_v50, 1  ;;  %v5048_v61 = vrot.slane %v5046_v13, 1 }
 0x21e   : > { %v5928_v28 = vshrl.u32 %v8805_v4, 16  ;;  %v6822_v29 = vsel %vm1435_vm9, %v6817_v58, %v6821_v8  ;;  %v5935_v34 = vshll.u32 %v8806_v17, 16  ;;  %v5053_v39 = vrot.slane %v5051_v26, 1 }
 0x21f   : > { %v5932_v30 = vrot.slane %v5930_v18, 1  ;;  %6973 = vrot.lane.b32.xlu1 %v6822_v29, %s9022_s14  ;;  %v6834_v36 = vsel %vm1435_vm9, %v6829_v19, %v6833_v22  ;;  %v5049_v38 = vor.u32 %v5048_v61, %v5044_v15  ;;  %vm10884_vm11 = vcmask 130144  }
 0x220   : > { %v5937_v0 = vrot.slane %v5935_v34, 1  ;;  %v8807_v35 = vld [vmem:[#allocation2 + $0x60] sm:$0xff]   ;;  %v8812_v21 = vld [vmem:[#allocation2 + $0x68] ss:$0 sps:$4 sm:$0x11]  }
 0x221   : > { %6975 = vrot.lane.b32.xlu0 %v6834_v36, %s9022_s14  ;;  %v5933_v25 = vor.u32 %v5932_v30, %v5928_v28  ;;  %v5054_v16 = vsel %vm1435_vm9, %v5049_v38, %v5053_v39  ;;  %v8811_v41 = vld [vmem:[#allocation2 + $0x60] sm:$0xfe]   ;;  %v6333_v49 = vrot.slane %v8812_v21, 1  ;;  %v8814_v52 = vld [vmem:[#allocation2 + $0x68] ss:$0 sps:$4 sm:$0x11]  }
 0x222   : > { %v10192_v57 = vld [vmem:[#allocation2 + $0x60] sm:$0xff]   ;;  %v6332_v47 = vrot.slane %v8811_v41, 1  ;;  %v8809_v42 = vld [vmem:[#allocation2 + $0x54] sm:$0xff]   ;;  %v7226_v7 = vrot.slane %v8814_v52, 1 }
 0x223   : > { %5185 = vrot.lane.b32.xlu1 %v5054_v16, %s9016_s8  ;;  %v5938_v11 = vsel %vm1435_vm9, %v5933_v25, %v5937_v0  ;;  %v8808_v45 = vld [vmem:[#allocation2 + $0x60] sm:$0xff]   ;;  %v5964_v24 = vshrl.u32 %v10192_v57, 16  ;;  %v8810_v6 = vld [vmem:[#allocation2 + $0x54] sm:$0xff]   ;;  %v8816_v56 = vld [vmem:[#allocation2 + $0x5c] ss:$0 sps:$4 sm:$0x11]  }
 0x224   : > { %v8813_v48 = vld [vmem:[#allocation2 + $0x60] sm:$0xfe]   ;;  %v8815_v46 = vld [vmem:[#allocation2 + $0x54] sm:$0xfe]   ;;  %v5437_v60 = vrot.slane %v8816_v56, 1  ;;  %v5966_v4 = vshll.u32 %v10192_v57, 16  ;;  %v6334_v3 = vsel %vm1869_vm6, %v6332_v47, %v6333_v49 }
 0x225   : > { %6079 = vrot.lane.b32.xlu0 %v5938_v11, %s9021_s13  ;;  %v7225_v14 = vrot.slane %v8813_v48, 1  ;;  %v5436_v55 = vrot.slane %v8815_v46, 1  ;;  %v8817_v37 = vld [vmem:[#allocation2 + $0x60] sm:$0xfe]   ;;  %v8822_v36 = vld [vmem:[#allocation2 + $0x54] sm:$0xfe]  }
 0x226   : > { %v8818_v62 = vld [vmem:[#allocation2 + $0x68] ss:$0 sps:$4 sm:$0x11]   ;;  %v5439_v2 = vrot.slane %v8817_v37, 1  ;;  %v5968_v30 = vrot.slane %v5966_v4, 1  ;;  %v10217_v11 = vld [vmem:[#allocation2 + $0x60] sm:$0xff]  }
 0x227   : > { %5653 = vrot.lane.b32.xlu1 %v8807_v35, %s9017_s9  ;;  %v7227_v32 = vsel %vm1869_vm6, %v7225_v14, %v7226_v7  ;;  %v5440_v8 = vrot.slane %v8818_v62, 1  ;;  %v5438_v58 = vsel %vm1869_vm6, %v5436_v55, %v5437_v60  ;;  %v8820_v15 = vld [vmem:[#allocation2 + $0x68] ss:$0 sps:$4 sm:$0x11]   ;;  %v4614_v41 = vld [vmem:[#allocation2 + $0x78] sm:$0xf] }
 0x228   : > { %v5971_v34 = vshll.u32 %v8820_v15, 16  ;;  %v8823_v16 = vld [vmem:[#allocation2 + $0x5c] ss:$0 sps:$4 sm:$0x11]   ;;  %v4607_v49 = vld [vmem:[#allocation2 + $0x6c] sm:$0xf] }
 0x229   : > { %6547 = vrot.lane.b32.xlu0 %v8808_v45, %s9018_s10  ;;  %v5441_v18 = vsel %vm1869_vm6, %v5439_v2, %v5440_v8  ;;  %v5969_v45 = vor.u32 %v5968_v30, %v5964_v24  ;;  %v4618_v7 = vld [vmem:[#allocation2 + $0x80] sm:$0x1]  ;;  %v4611_v4 = vld [vmem:[#allocation2 + $0x74] sm:$0x1]  ;;  %v5080_v8 = vshrl.u32 %v10217_v11, 16 }
 0x22a   : > { %v5973_v14 = vrot.slane %v5971_v34, 1  ;;  %v8825_v24 = vld [vmem:[#allocation2 + $0x68] ss:$0 sps:$4 sm:$0x11]   ;;  %v8911_v62 = vld [vmem:[#allocation2 + $0x3c] sm:$0xff]  }
 0x22b   : > { %6545 = vrot.lane.b32.xlu1 %v8809_v42, %s9018_s10  ;;  %v8830_v2 = vld [vmem:[#allocation2 + $0x60] sm:$0xff]   ;;  %4796 = vst.msk [vmem:[#allocation3 + $0x28] sm:$0xff] %vm10883_vm0, %v8911_v62  ;;  %v5087_v30 = vshll.u32 %v8825_v24, 16  ;;  %v8835_v24 = vld [vmem:[#allocation2 + $0x5c] ss:$0 sps:$4 sm:$0x11]  }
 0x22d   : > { %5651 = vrot.lane.b32.xlu0 %v8810_v6, %s9017_s9 }
 0x22f   : > { %6373 = vrot.lane.b32.xlu1 %v6334_v3, %s9019_s11 }
 0x231   : > { %7267 = vrot.lane.b32.xlu0 %v7227_v32, %s9020_s12  ;;  %v7223_v32 = vrot.slane %v8823_v16, 1  ;;  %v5089_v16 = vrot.slane %v5087_v30, 1 }
 0x233   : > { %5477 = vrot.lane.b32.xlu1 %v5438_v58, %s9015_s7 }
 0x234   : > { %v10184_v40 = vpop.permute.xlu0 %6535 }
 0x235   : > { %v10186_v23 = vpop.permute.xlu1 %5641  ;;  %5479 = vrot.lane.b32.xlu0 %v5441_v18, %s9015_s7 }
 0x238   : > { %v5640_v44 = vpop.permute.xlu0 %5639 }
 0x239   : > { %5687 = vst.msk [vmem:[#allocation3] sm:$0xff] %vm10884_vm11, %v5640_v44  ;;  %v10195_v54 = vpop.permute.xlu1 %6361  ;;  %vm10885_vm11 = vcmask 64544  }
 0x23b   : > { %v8410_v59 = vpop.f32.mrb[16].mxu0 }
 0x23c   : > { %v3985_v51 = vadd.f32 %v10139_v53, %v8410_v59  ;;  %v3976_v27 = vpop.f32.mrb[17].mxu0  ;;  %v10210_v9 = vpop.permute.xlu0 %7255  ;;  %v7222_v59 = vrot.slane %v8822_v36, 1 }
 0x23d   : > { %v3977_v31 = vadd.f32 %v10139_v53, %v3976_v27  ;;  %v8411_v63 = vpop.f32.mrb[18].mxu0  ;;  %v10207_v5 = vpop.permute.xlu1 %5465  ;;  %v8828_v27 = vld [vmem:[#allocation2 + $0x54] sm:$0xff]  }
 0x23e   : > { %vm4057_vm8 = vcmp.gt.f32.partialorder %v3985_v51, 0.0  ;;  %v4089_v33 = vmul.f32 0.01, %v3985_v51  ;;  %v3988_v43 = vadd.f32 %v10139_v53, %v8411_v63  ;;  %v3979_v50 = vpop.f32.mrb[19].mxu0  ;;  %v7224_v18 = vsel %vm1869_vm6, %v7222_v59, %v7223_v32 }
 0x23f   : > { %vm4055_vm5 = vcmp.gt.f32.partialorder %v3977_v31, 0.0  ;;  %v4087_v10 = vmul.f32 0.01, %v3977_v31  ;;  %v3980_v13 = vadd.f32 %v10139_v53, %v3979_v50  ;;  %7265 = vrot.lane.b32.xlu0 %v7224_v18, %s9020_s12 }
 0x240   : > { %v4121_v26 = vsel %vm4057_vm8, %v3985_v51, %v4089_v33  ;;  %vm4058_vm4 = vcmp.gt.f32.partialorder %v3988_v43, 0.0  ;;  %v4090_v17 = vmul.f32 0.01, %v3988_v43  ;;  %v5468_v47 = vpop.permute.xlu0 %5467  ;;  %v5974_v51 = vsel %vm1435_vm9, %v5969_v45, %v5973_v14  ;;  %v8834_v45 = vld [vmem:[#allocation2 + $0x54] sm:$0xff]  }
 0x241   : > { %v8334_v19 = vpack.c.bf16 %v4121_v26, %v4121_v26  ;;  %v4119_v22 = vsel %vm4055_vm5, %v3977_v31, %v4087_v10  ;;  %vm4056_vm12 = vcmp.gt.f32.partialorder %v3980_v13, 0.0  ;;  %v4088_v61 = vmul.f32 0.01, %v3980_v13  ;;  %v10219_v35 = vpop.permute.xlu1 %6073  ;;  %6085 = vrot.lane.b32.xlu1 %v5974_v51, %s9021_s13  ;;  %v8826_v10 = vld [vmem:[#allocation2 + $0x54] sm:$0xfe]  }
 0x242   : > { %v8332_v28 = vpack.c.bf16 %v4119_v22, %v4119_v22  ;;  %v4122_v29 = vsel %vm4058_vm4, %v3988_v43, %v4090_v17  ;;  %vm10886_vm8 = vcmask 97344   ;;  %vm10887_vm5 = vcmask 27648  }
 0x243   : > { %v4385_v38 = vshrl.u32 %v8334_v19, 16  ;;  %v4388_v39 = vshll.u32 %v8334_v19, 16  ;;  %v8335_v25 = vpack.c.bf16 %v4122_v29, %v4122_v29  ;;  %v4120_v0 = vsel %vm4056_vm12, %v3980_v13, %v4088_v61  ;;  %v8832_v13 = vld [vmem:[#allocation2 + $0x54] sm:$0xff]   ;;  %v8827_v19 = vld [vmem:[#allocation2 + $0x5c] ss:$0 sps:$4 sm:$0x11]   ;;  %vm10888_vm4 = vmmov %vm10887_vm5 }
 0x244   : > { %v4368_v21 = vshrl.u32 %v8332_v28, 16  ;;  %v4371_v57 = vshll.u32 %v8332_v28, 16  ;;  %v8333_v44 = vpack.c.bf16 %v4120_v0, %v4120_v0  ;;  %v10232_v22 = vpop.permute.xlu0 %6359  ;;  %v5082_v29 = vshll.u32 %v10217_v11, 16  ;;  %vm10889_vm12 = vmmov %vm10885_vm11 }
 0x245   : > { %v4387_v48 = vrot.slane %v4385_v38, 7  ;;  %v4393_v52 = vshrl.u32 %v8335_v25, 16  ;;  %v4396_v42 = vshll.u32 %v8335_v25, 16  ;;  %v6329_v38 = vrot.slane %v8826_v10, 1  ;;  %vm10890_vm0 = vmmov %vm10886_vm8 }
 0x246   : > { %v4370_v6 = vrot.slane %v4368_v21, 7  ;;  %v4376_v46 = vshrl.u32 %v8333_v44, 16  ;;  %v4379_v56 = vshll.u32 %v8333_v44, 16  ;;  %v8829_v25 = vld [vmem:[#allocation2 + $0x5c] ss:$0 sps:$4 sm:$0x11]  }
 0x247   : > { %v4390_v55 = vor.u32 %v4388_v39, %v4387_v48  ;;  %v4391_v60 = vrot.slane %v4387_v48, 4  ;;  %v4395_v37 = vrot.slane %v4393_v52, 7  ;;  %v5180_v58 = vpop.permute.xlu1 %5179  ;;  %v6330_v39 = vrot.slane %v8827_v19, 1 }
 0x248   : > { %v4373_v31 = vor.u32 %v4371_v57, %v4370_v6  ;;  %v4374_v63 = vrot.slane %v4370_v6, 4  ;;  %v4378_v3 = vrot.slane %v4376_v46, 7  ;;  %5225 = vst.msk [vmem:[#allocation3 + $0x10] sm:$0xff] %vm10885_vm11, %v5180_v58  ;;  %v5084_v0 = vrot.slane %v5082_v29, 1 }
 0x249   : > { %v4615_v33 = vsel %vm9158_vm15, %v4390_v55, %v4614_v41  ;;  %v4398_v43 = vor.u32 %v4396_v42, %v4395_v37  ;;  %v4400_v50 = vrot.slane %v4395_v37, 4  ;;  %5513 = vst.msk [vmem:[#allocation3 + $0x10] sm:$0xff] %vm10886_vm8, %v5468_v47  ;;  %v6836_v11 = vshrl.u32 %v8828_v27, 16 }
 0x24a   : > { %4616 = vst [vmem:[#allocation2 + $0x78] sm:$0xf] %v4615_v33  ;;  %v4608_v15 = vsel %vm9158_vm15, %v4373_v31, %v4607_v49  ;;  %v4381_v26 = vor.u32 %v4379_v56, %v4378_v3  ;;  %v4383_v17 = vrot.slane %v4378_v3, 4  ;;  %v6838_v41 = vshll.u32 %v8828_v27, 16 }
 0x24b   : > { %4609 = vst [vmem:[#allocation2 + $0x6c] sm:$0xf] %v4608_v15  ;;  %v4399_v61 = vsel %vm9165_vm1, %v4391_v60, %v4398_v43  ;;  %v4619_v28 = vsel %vm9074_vm3, %v4400_v50, %v4618_v7  ;;  %v6331_v21 = vsel %vm1869_vm6, %v6329_v38, %v6330_v39  ;;  %v6843_v57 = vshll.u32 %v8829_v25, 16  ;;  %v8831_v49 = vld [vmem:[#allocation2 + $0x68] ss:$0 sps:$4 sm:$0x11]  }
 0x24c   : > { %4617 = vst.msk [vmem:[#allocation2 + $0x7c] sm:$0xf] %vm10887_vm5, %v4399_v61  ;;  %4620 = vst [vmem:[#allocation2 + $0x80] sm:$0x1] %v4619_v28  ;;  %v4382_v34 = vsel %vm9165_vm1, %v4374_v63, %v4381_v26  ;;  %v4612_v36 = vsel %vm9074_vm3, %v4383_v17, %v4611_v4  ;;  %v6848_v44 = vshrl.u32 %v8830_v2, 16  ;;  %v5085_v47 = vor.u32 %v5084_v0, %v5080_v8  ;;  %v6968_v7 = vpop.permute.xlu0 %6967 }
 0x24d   : > { %4610 = vst.msk [vmem:[#allocation2 + $0x70] sm:$0xf] %vm10888_vm4, %v4382_v34  ;;  %4613 = vst [vmem:[#allocation2 + $0x74] sm:$0x1] %v4612_v36  ;;  %6371 = vrot.lane.b32.xlu0 %v6331_v21, %s9019_s11  ;;  %v6840_v48 = vrot.slane %v6838_v41, 1  ;;  %v6850_v52 = vshll.u32 %v8830_v2, 16 }
 0x24e   : > { %v5068_v42 = vshrl.u32 %v8832_v13, 16  ;;  %v6845_v14 = vrot.slane %v6843_v57, 1  ;;  %v5070_v6 = vshll.u32 %v8832_v13, 16  ;;  %v5090_v46 = vsel %vm1435_vm9, %v5085_v47, %v5089_v16  ;;  %v8833_v60 = vld [vmem:[#allocation2 + $0x5c] ss:$0 sps:$4 sm:$0x11]  }
 0x24f   : > { %v6841_v56 = vor.u32 %v6840_v48, %v6836_v11  ;;  %v6852_v59 = vrot.slane %v6850_v52, 1  ;;  %v6855_v55 = vshll.u32 %v8831_v49, 16  ;;  %5191 = vrot.lane.b32.xlu1 %v5090_v46, %s9016_s8  ;;  %v5075_v27 = vshll.u32 %v8833_v60, 16 }
 0x250   : > { %v5072_v37 = vrot.slane %v5070_v6, 1  ;;  %v5954_v62 = vshll.u32 %v8834_v45, 16  ;;  %v5959_v2 = vshll.u32 %v8835_v24, 16  ;;  %v5952_v33 = vshrl.u32 %v8834_v45, 16 }
 0x251   : > { %v6853_v4 = vor.u32 %v6852_v59, %v6848_v44  ;;  %v6857_v51 = vrot.slane %v6855_v55, 1  ;;  %v5178_v31 = vpop.permute.xlu1 %5177  ;;  %v6846_v63 = vsel %vm1435_vm9, %v6841_v56, %v6845_v14  ;;  %v5077_v8 = vrot.slane %v5075_v27, 1 }
 0x252   : > { %v5073_v32 = vor.u32 %v5072_v37, %v5068_v42  ;;  %5224 = vst.msk [vmem:[#allocation3 + $0x8] sm:$0xff] %vm10889_vm12, %v5178_v31  ;;  %v5956_v43 = vrot.slane %v5954_v62, 1  ;;  %vm10891_vm11 = vcmask 130144   ;;  %v5961_v13 = vrot.slane %v5959_v2, 1 }
 0x253   : > { %v6858_v3 = vsel %vm1435_vm9, %v6853_v4, %v6857_v51  ;;  %6977 = vrot.lane.b32.xlu1 %v6846_v63, %s9022_s14  ;;  %5512 = vst.msk [vmem:[#allocation3 + $0x8] sm:$0xff] %vm10890_vm0, %v10207_v5  ;;  %v8840_v5 = vld [vmem:[#allocation2 + $0x78] sm:$0xfe]   ;;  %vm10892_vm8 = vcmask 294144   ;;  %vm10893_vm5 = vmmov %vm10891_vm11 }
 0x254   : > { %6979 = vrot.lane.b32.xlu0 %v6858_v3, %s9022_s14  ;;  %v6072_v50 = vpop.permute.xlu0 %6071  ;;  %5688 = vst.msk [vmem:[#allocation3 + $0x8] sm:$0xff] %vm10891_vm11, %v10186_v23  ;;  %v5957_v10 = vor.u32 %v5956_v43, %v5952_v33  ;;  %v5078_v15 = vsel %vm1435_vm9, %v5073_v32, %v5077_v8  ;;  %v8836_v26 = vld [vmem:[#allocation2 + $0x78] sm:$0xff]   ;;  %v6338_v19 = vrot.slane %v8840_v5, 1  ;;  %v8844_v61 = vld [vmem:[#allocation2 + $0x80] ss:$0 sps:$4 sm:$0x11]  }
 0x255   : > { %6119 = vst.msk [vmem:[#allocation3] sm:$0xff] %vm2576_vm13, %v6072_v50  ;;  %6120 = vst.msk [vmem:[#allocation3 + $0x8] sm:$0xff] %vm2576_vm13, %v10219_v35  ;;  %v10266_v58 = vpop.permute.xlu1 %5645  ;;  %v8841_v35 = vld [vmem:[#allocation2 + $0x80] ss:$0 sps:$4 sm:$0x11]   ;;  %v8837_v18 = vld [vmem:[#allocation2 + $0x78] sm:$0xff]  }
 0x256   : > { %6407 = vst.msk [vmem:[#allocation3] sm:$0xff] %vm2865_vm2, %v10232_v22  ;;  %6408 = vst.msk [vmem:[#allocation3 + $0x8] sm:$0xff] %vm2865_vm2, %v10195_v54  ;;  %v5962_v23 = vsel %vm1435_vm9, %v5957_v10, %v5961_v13  ;;  %v8850_v22 = vld [vmem:[#allocation2 + $0x78] sm:$0xff]   ;;  %v6339_v54 = vrot.slane %v8841_v35, 1  ;;  %v8838_v29 = vld [vmem:[#allocation2 + $0x6c] sm:$0xff]   ;;  %v7232_v34 = vrot.slane %v8844_v61, 1 }
 0x257   : > { %6583 = vst.msk [vmem:[#allocation3] sm:$0xff] %vm3043_vm10, %v10184_v40  ;;  %5189 = vrot.lane.b32.xlu1 %v5078_v15, %s9016_s8  ;;  %v8843_v40 = vld [vmem:[#allocation2 + $0x78] sm:$0xfe]   ;;  %v8845_v36 = vld [vmem:[#allocation2 + $0x6c] sm:$0xfe]   ;;  %v5988_v0 = vshrl.u32 %v8850_v22, 16 }
 0x258   : > { %7015 = vst.msk [vmem:[#allocation3] sm:$0xff] %vm3476_vm14, %v6968_v7  ;;  %v10276_v17 = vpop.permute.xlu0 %6539  ;;  %6083 = vrot.lane.b32.xlu0 %v5962_v23, %s9021_s13  ;;  %v7231_v30 = vrot.slane %v8843_v40, 1  ;;  %v8839_v39 = vld [vmem:[#allocation2 + $0x6c] sm:$0xff]   ;;  %v8846_v25 = vld [vmem:[#allocation2 + $0x74] ss:$0 sps:$4 sm:$0x11]   ;;  %v6340_v6 = vsel %vm1869_vm6, %v6338_v19, %v6339_v54 }
 0x259   : > { %7303 = vst.msk [vmem:[#allocation3] sm:$0xff] %vm10892_vm8, %v10210_v9  ;;  %v6538_v28 = vpop.permute.xlu1 %6537  ;;  %v5442_v9 = vrot.slane %v8845_v36, 1  ;;  %v8848_v16 = vld [vmem:[#allocation2 + $0x78] sm:$0xfe]   ;;  %v5990_v11 = vshll.u32 %v8850_v22, 16  ;;  %v5443_v21 = vrot.slane %v8846_v25, 1 }
 0x25a   : > { %6584 = vst.msk [vmem:[#allocation3 + $0x8] sm:$0xff] %vm3043_vm10, %v6538_v28  ;;  %v8849_v57 = vld [vmem:[#allocation2 + $0x80] ss:$0 sps:$4 sm:$0x11]   ;;  %v5445_v44 = vrot.slane %v8848_v16, 1  ;;  %v8854_v47 = vld [vmem:[#allocation2 + $0x78] sm:$0xff]   ;;  %v7233_v55 = vsel %vm1869_vm6, %v7231_v30, %v7232_v34 }
 0x25b   : > { %5657 = vrot.lane.b32.xlu1 %v8836_v26, %s9017_s9  ;;  %v5992_v45 = vrot.slane %v5990_v11, 1  ;;  %v5446_v48 = vrot.slane %v8849_v57, 1  ;;  %v8851_v49 = vld [vmem:[#allocation2 + $0x80] ss:$0 sps:$4 sm:$0x11]   ;;  %v5444_v51 = vsel %vm1869_vm6, %v5442_v9, %v5443_v21  ;;  %v5104_v32 = vshrl.u32 %v8854_v47, 16 }
 0x25c   : > { %v5644_v38 = vpop.permute.xlu0 %5643  ;;  %6551 = vrot.lane.b32.xlu0 %v8837_v18, %s9018_s10  ;;  %v8852_v52 = vld [vmem:[#allocation2 + $0x6c] sm:$0xfe]   ;;  %v5995_v46 = vshll.u32 %v8851_v49, 16  ;;  %v8853_v56 = vld [vmem:[#allocation2 + $0x74] ss:$0 sps:$4 sm:$0x11]  }
 0x25d   : > { %5689 = vst.msk [vmem:[#allocation3 + $0x10] sm:$0xff] %vm10893_vm5, %v5644_v38  ;;  %v10285_v41 = vpop.permute.xlu1 %6365  ;;  %v5993_v7 = vor.u32 %v5992_v45, %v5988_v0  ;;  %v8414_v59 = vpop.f32.mrb[20].mxu0  ;;  %v7228_v60 = vrot.slane %v8852_v52, 1  ;;  %v7229_v27 = vrot.slane %v8853_v56, 1  ;;  %v5447_v3 = vsel %vm1869_vm6, %v5445_v44, %v5446_v48  ;;  %v8856_v19 = vld [vmem:[#allocation2 + $0x6c] sm:$0xfe]  }
 0x25e   : > { %v4001_v37 = vadd.f32 %v10139_v53, %v8414_v59  ;;  %v3992_v4 = vpop.f32.mrb[21].mxu0  ;;  %v5997_v24 = vrot.slane %v5995_v46, 1  ;;  %v8855_v62 = vld [vmem:[#allocation2 + $0x80] ss:$0 sps:$4 sm:$0x11]   ;;  %v5106_v2 = vshll.u32 %v8854_v47, 16 }
 0x25f   : > { %6549 = vrot.lane.b32.xlu1 %v8838_v29, %s9018_s10  ;;  %v3993_v31 = vadd.f32 %v10139_v53, %v3992_v4  ;;  %v8415_v63 = vpop.f32.mrb[22].mxu0  ;;  %v7230_v15 = vsel %vm1869_vm6, %v7228_v60, %v7229_v27  ;;  %v8857_v61 = vld [vmem:[#allocation2 + $0x74] ss:$0 sps:$4 sm:$0x11]   ;;  %v5111_v30 = vshll.u32 %v8855_v62, 16  ;;  %v10311_v21 = vld [vmem:[#allocation2 + $0x6c] sm:$0xff]  }
 0x260   : > { %5655 = vrot.lane.b32.xlu0 %v8839_v39, %s9017_s9  ;;  %v10289_v42 = vpop.permute.xlu0 %7259  ;;  %vm4061_vm4 = vcmp.gt.f32.partialorder %v4001_v37, 0.0  ;;  %v4093_v33 = vmul.f32 0.01, %v4001_v37  ;;  %v4004_v43 = vadd.f32 %v10139_v53, %v8415_v63  ;;  %v3995_v50 = vpop.f32.mrb[23].mxu0  ;;  %v5998_v8 = vsel %vm1435_vm9, %v5993_v7, %v5997_v24  ;;  %v4628_v25 = vld [vmem:[#allocation2 + $0x90] sm:$0xf] }
 0x261   : > { %v10291_v14 = vpop.permute.xlu1 %5469  ;;  %vm4059_vm12 = vcmp.gt.f32.partialorder %v3993_v31, 0.0  ;;  %v4091_v10 = vmul.f32 0.01, %v3993_v31  ;;  %v3996_v13 = vadd.f32 %v10139_v53, %v3995_v50  ;;  %v5108_v18 = vrot.slane %v5106_v2, 1  ;;  %v4621_v44 = vld [vmem:[#allocation2 + $0x84] sm:$0xf] }
 0x262   : > { %v4125_v26 = vsel %vm4061_vm4, %v4001_v37, %v4093_v33  ;;  %vm4062_vm0 = vcmp.gt.f32.partialorder %v4004_v43, 0.0  ;;  %v4094_v35 = vmul.f32 0.01, %v4004_v43  ;;  %v5113_v11 = vrot.slane %v5111_v30, 1  ;;  %v4632_v46 = vld [vmem:[#allocation2 + $0x98] sm:$0x1] }
 0x263   : > { %6377 = vrot.lane.b32.xlu1 %v6340_v6, %s9019_s11  ;;  %v8338_v22 = vpack.c.bf16 %v4125_v26, %v4125_v26  ;;  %v4123_v54 = vsel %vm4059_vm12, %v3993_v31, %v4091_v10  ;;  %vm4060_vm11 = vcmp.gt.f32.partialorder %v3996_v13, 0.0  ;;  %v4092_v40 = vmul.f32 0.01, %v3996_v13  ;;  %v8859_v49 = vld [vmem:[#allocation2 + $0x74] ss:$0 sps:$4 sm:$0x11]  }
 0x264   : > { %7271 = vrot.lane.b32.xlu0 %v7233_v55, %s9020_s12  ;;  %v5472_v5 = vpop.permute.xlu0 %5471  ;;  %v8336_v53 = vpack.c.bf16 %v4123_v54, %v4123_v54  ;;  %v4126_v28 = vsel %vm4062_vm0, %v4004_v43, %v4094_v35  ;;  %v5109_v29 = vor.u32 %v5108_v18, %v5104_v32  ;;  %v6335_v48 = vrot.slane %v8856_v19, 1  ;;  %v8860_v60 = vld [vmem:[#allocation2 + $0x78] sm:$0xff]   ;;  %v4625_v27 = vld [vmem:[#allocation2 + $0x8c] sm:$0x1] }
 0x265   : > { %v10306_v23 = vpop.permute.xlu1 %6077  ;;  %v4419_v34 = vshrl.u32 %v8338_v22, 16  ;;  %v4422_v36 = vshll.u32 %v8338_v22, 16  ;;  %v8339_v38 = vpack.c.bf16 %v4126_v28, %v4126_v28  ;;  %v4124_v39 = vsel %vm4060_vm11, %v3996_v13, %v4092_v40  ;;  %v7319_v37 = vld [vmem:[#allocation3] sm:$0xff]  ;;  %v8861_v31 = vld [vmem:[#allocation2 + $0x80] ss:$0 sps:$4 sm:$0x11]  }
 0x266   : > { %v4402_v0 = vshrl.u32 %v8336_v53, 16  ;;  %v4405_v9 = vshll.u32 %v8336_v53, 16  ;;  %v8337_v16 = vpack.c.bf16 %v4124_v39, %v4124_v39  ;;  %v5114_v55 = vsel %vm1435_vm9, %v5109_v29, %v5113_v11  ;;  %8430 = vmatprep.mubr.msk.bf16.mxu1 %vm3825_vm7, %v7319_v37  ;;  %v8862_v33 = vld [vmem:[#allocation2 + $0x6c] sm:$0xff]   ;;  %v8932_v13 = vld [vmem:[#allocation2 + $0x60] sm:$0xff]   ;;  %v8940_v19 = vld [vmem:[#allocation2 + $0x54] sm:$0xff]  }
 0x267   : > { %5481 = vrot.lane.b32.xlu1 %v5444_v51, %s9015_s7  ;;  %v4421_v57 = vrot.slane %v4419_v34, 7  ;;  %v4427_v45 = vshrl.u32 %v8339_v38, 16  ;;  %v4430_v47 = vshll.u32 %v8339_v38, 16  ;;  %vm10894_vm8 = vcmask 64544   ;;  %v8958_v37 = vld [vmem:[#allocation2 + $0x78] sm:$0xff]  }
 0x268   : > { %5483 = vrot.lane.b32.xlu0 %v5447_v3, %s9015_s7  ;;  %v10313_v52 = vpop.permute.xlu0 %7257  ;;  %v4404_v7 = vrot.slane %v4402_v0, 7  ;;  %v4410_v56 = vshrl.u32 %v8337_v16, 16  ;;  %v4413_v59 = vshll.u32 %v8337_v16, 16  ;;  %v6336_v62 = vrot.slane %v8857_v61, 1  ;;  %v8864_v61 = vld [vmem:[#allocation2 + $0x6c] sm:$0xff]  }
 0x269   : > { %v5184_v6 = vpop.permute.xlu1 %5183  ;;  %v4424_v4 = vor.u32 %v4422_v36, %v4421_v57  ;;  %v4425_v51 = vrot.slane %v4421_v57, 4  ;;  %v4429_v24 = vrot.slane %v4427_v45, 7  ;;  %vm10895_vm5 = vcmask 97344   ;;  %v8863_v18 = vld [vmem:[#allocation2 + $0x74] ss:$0 sps:$4 sm:$0x11]  }
 0x26a   : > { %5227 = vst.msk [vmem:[#allocation3 + $0x20] sm:$0xff] %vm10894_vm8, %v5184_v6  ;;  %v4407_v63 = vor.u32 %v4405_v9, %v4404_v7  ;;  %v4408_v3 = vrot.slane %v4404_v7, 4  ;;  %v4412_v32 = vrot.slane %v4410_v56, 7  ;;  %v6860_v2 = vshrl.u32 %v10311_v21, 16 }
 0x26b   : > { %6089 = vrot.lane.b32.xlu1 %v5998_v8, %s9021_s13  ;;  %5515 = vst.msk [vmem:[#allocation3 + $0x20] sm:$0xff] %vm10895_vm5, %v5472_v5  ;;  %v4629_v43 = vsel %vm9158_vm15, %v4424_v4, %v4628_v25  ;;  %v4432_v50 = vor.u32 %v4430_v47, %v4429_v24  ;;  %v4434_v8 = vrot.slane %v4429_v24, 4  ;;  %v6337_v10 = vsel %vm1869_vm6, %v6335_v48, %v6336_v62  ;;  %v8865_v11 = vld [vmem:[#allocation2 + $0x74] ss:$0 sps:$4 sm:$0x11]  }
 0x26c   : > { %7269 = vrot.lane.b32.xlu0 %v7230_v15, %s9020_s12  ;;  %4630 = vst [vmem:[#allocation2 + $0x90] sm:$0xf] %v4629_v43  ;;  %v4622_v15 = vsel %vm9158_vm15, %v4407_v63, %v4621_v44  ;;  %v4415_v26 = vor.u32 %v4413_v59, %v4412_v32  ;;  %v4417_v5 = vrot.slane %v4412_v32, 4  ;;  %v6862_v35 = vshll.u32 %v10311_v21, 16  ;;  %v6364_v53 = vpop.permute.xlu0 %6363 }
 0x26d   : > { %4623 = vst [vmem:[#allocation2 + $0x84] sm:$0xf] %v4622_v15  ;;  %v4433_v22 = vsel %vm9165_vm1, %v4425_v51, %v4432_v50  ;;  %v4633_v54 = vsel %vm9074_vm3, %v4434_v8, %v4632_v46  ;;  %v6867_v40 = vshll.u32 %v8859_v49, 16  ;;  %vm10896_vm4 = vcmask 31744  }
 0x26e   : > { %4799 = vst.msk [vmem:[#allocation3 + $0x40] sm:$0xff] %vm10896_vm4, %v8932_v13  ;;  %vm10897_vm12 = vcmask 27648   ;;  %4634 = vst [vmem:[#allocation2 + $0x98] sm:$0x1] %v4633_v54  ;;  %v4416_v28 = vsel %vm9165_vm1, %v4408_v3, %v4415_v26  ;;  %v4626_v29 = vsel %vm9074_vm3, %v4417_v5, %v4625_v27  ;;  %v6864_v30 = vrot.slane %v6862_v35, 1 }
 0x26f   : > { %5195 = vrot.lane.b32.xlu1 %v5114_v55, %s9016_s8  ;;  %4631 = vst.msk [vmem:[#allocation2 + $0x94] sm:$0xf] %vm10897_vm12, %v4433_v22  ;;  %v6874_v34 = vshll.u32 %v8860_v60, 16  ;;  %vm10898_vm0 = vmmov %vm10896_vm4  ;;  %v6872_v36 = vshrl.u32 %v8860_v60, 16  ;;  %v6879_v38 = vshll.u32 %v8861_v31, 16  ;;  %v5094_v39 = vshll.u32 %v8862_v33, 16 }
 0x270   : > { %6375 = vrot.lane.b32.xlu0 %v6337_v10, %s9019_s11  ;;  %4798 = vst.msk [vmem:[#allocation3 + $0x38] sm:$0xff] %vm10898_vm0, %v8940_v19  ;;  %vm10899_vm11 = vmmov %vm10897_vm12  ;;  %v6865_v25 = vor.u32 %v6864_v30, %v6860_v2  ;;  %v6869_v0 = vrot.slane %v6867_v40, 1  ;;  %v5099_v16 = vshll.u32 %v8863_v18, 16  ;;  %v5092_v21 = vshrl.u32 %v8862_v33, 16  ;;  %v6970_v45 = vpop.permute.xlu1 %6969 }
 0x271   : > { %4624 = vst.msk [vmem:[#allocation2 + $0x88] sm:$0xf] %vm10899_vm11, %v4416_v28  ;;  %4627 = vst [vmem:[#allocation2 + $0x8c] sm:$0x1] %v4626_v29  ;;  %v6876_v9 = vrot.slane %v6874_v34, 1  ;;  %v5096_v57 = vrot.slane %v5094_v39, 1 }
 0x272   : > { %v5978_v44 = vshll.u32 %v8864_v61, 16  ;;  %v6870_v47 = vsel %vm1435_vm9, %v6865_v25, %v6869_v0  ;;  %v6881_v49 = vrot.slane %v6879_v38, 1  ;;  %v5983_v6 = vshll.u32 %v8865_v11, 16  ;;  %7016 = vst.msk [vmem:[#allocation3 + $0x8] sm:$0xff] %vm3476_vm14, %v6970_v45  ;;  %vm10902_vm4 = vmmov %vm10898_vm0 }
 0x273   : > { %v6877_v48 = vor.u32 %v6876_v9, %v6872_v36  ;;  %6981 = vrot.lane.b32.xlu1 %v6870_v47, %s9022_s14  ;;  %v5097_v7 = vor.u32 %v5096_v57, %v5092_v21  ;;  %v5976_v46 = vshrl.u32 %v8864_v61, 16  ;;  %vm10900_vm8 = vcmask 294144   ;;  %v6972_v59 = vpop.permute.xlu0 %6971  ;;  %4801 = vst.msk [vmem:[#allocation3 + $0x50] sm:$0xff] %vm10902_vm4, %v8958_v37  ;;  %v8880_v5 = vld [vmem:[%s10808_s5 + $0x10] ss:$0 sps:$4 sm:$0x33]  }
 0x274   : > { %v5980_v56 = vrot.slane %v5978_v44, 1  ;;  %7304 = vst.msk [vmem:[#allocation3 + $0x8] sm:$0xff] %vm10900_vm8, %v10313_v52  ;;  %v5101_v60 = vrot.slane %v5099_v16, 1  ;;  %v5182_v51 = vpop.permute.xlu1 %5181  ;;  %v5985_v27 = vrot.slane %v5983_v6, 1  ;;  %vm10901_vm5 = vcmask 64544   ;;  %vm10905_vm11 = vmmov %vm10900_vm8 }
 0x275   : > { %v6882_v55 = vsel %vm1435_vm9, %v6877_v48, %v6881_v49  ;;  %5226 = vst.msk [vmem:[#allocation3 + $0x18] sm:$0xff] %vm10901_vm5, %v5182_v51  ;;  %vm10903_vm12 = vcmask 97344   ;;  %vm10904_vm0 = vcmask 130144   ;;  %v8873_v32 = vld [vmem:[#allocation2 + $0x98] ss:$0 sps:$4 sm:$0x11]  }
 0x276   : > { %6983 = vrot.lane.b32.xlu0 %v6882_v55, %s9022_s14  ;;  %v5981_v4 = vor.u32 %v5980_v56, %v5976_v46  ;;  %v5102_v24 = vsel %vm1435_vm9, %v5097_v7, %v5101_v60  ;;  %v8866_v62 = vld [vmem:[#allocation2 + $0x90] sm:$0xff]   ;;  %5514 = vst.msk [vmem:[#allocation3 + $0x18] sm:$0xff] %vm10903_vm12, %v10291_v14  ;;  %v6345_v43 = vrot.slane %v8873_v32, 1  ;;  %v8876_v8 = vld [vmem:[#allocation2 + $0x98] ss:$0 sps:$4 sm:$0x11]   ;;  %vm10907_vm5 = vmmov %vm10904_vm0 }
 0x277   : > { %5193 = vrot.lane.b32.xlu1 %v5102_v24, %s9016_s8  ;;  %v6076_v52 = vpop.permute.xlu0 %6075  ;;  %v8872_v63 = vld [vmem:[#allocation2 + $0x90] sm:$0xfe]   ;;  %5690 = vst.msk [vmem:[#allocation3 + $0x18] sm:$0xff] %vm10904_vm0, %v10266_v58  ;;  %v7238_v13 = vrot.slane %v8876_v8, 1  ;;  %vm10906_vm8 = vcmask 1041408  }
 0x278   : > { %v5986_v31 = vsel %vm1435_vm9, %v5981_v4, %v5985_v27  ;;  %6121 = vst.msk [vmem:[#allocation3 + $0x10] sm:$0xff] %vm2576_vm13, %v6076_v52  ;;  %v8867_v3 = vld [vmem:[#allocation2 + $0x90] sm:$0xff]   ;;  %6122 = vst.msk [vmem:[#allocation3 + $0x18] sm:$0xff] %vm2576_vm13, %v10306_v23  ;;  %v10361_v2 = vpop.permute.xlu1 %5649  ;;  %v6344_v14 = vrot.slane %v8872_v63, 1  ;;  %v8868_v58 = vld [vmem:[#allocation2 + $0x84] sm:$0xff]   ;;  %8463 = vmatprep.subr.msk.bf16.mxu1 %vm10906_vm8, %v8880_v5 }
 0x279   : > { %6409 = vst.msk [vmem:[#allocation3 + $0x10] sm:$0xff] %vm2865_vm2, %v6364_v53  ;;  %6410 = vst.msk [vmem:[#allocation3 + $0x18] sm:$0xff] %vm2865_vm2, %v10285_v41  ;;  %v8883_v33 = vld [vmem:[#allocation2 + $0x90] sm:$0xff]   ;;  %v8871_v41 = vld [vmem:[#allocation2 + $0x84] sm:$0xff]  }
 0x27a   : > { %6087 = vrot.lane.b32.xlu0 %v5986_v31, %s9021_s13  ;;  %6585 = vst.msk [vmem:[#allocation3 + $0x10] sm:$0xff] %vm3043_vm10, %v10276_v17  ;;  %v8875_v50 = vld [vmem:[#allocation2 + $0x90] sm:$0xfe]   ;;  %v8877_v15 = vld [vmem:[#allocation2 + $0x84] sm:$0xfe]   ;;  %v6012_v18 = vshrl.u32 %v8883_v33, 16  ;;  %vm10908_vm4 = vmmov %vm10906_vm8  ;;  %v6346_v29 = vsel %vm1869_vm6, %v6344_v14, %v6345_v43 }
 0x27b   : > { %5661 = vrot.lane.b32.xlu1 %v8866_v62, %s9017_s9  ;;  %7017 = vst.msk [vmem:[#allocation3 + $0x10] sm:$0xff] %vm3476_vm14, %v6972_v59  ;;  %v10369_v23 = vpop.permute.xlu0 %6543  ;;  %v7237_v10 = vrot.slane %v8875_v50, 1  ;;  %v8878_v26 = vld [vmem:[#allocation2 + $0x8c] ss:$0 sps:$4 sm:$0x11]   ;;  %v5448_v35 = vrot.slane %v8877_v15, 1 }
 0x27c   : > { %7305 = vst.msk [vmem:[#allocation3 + $0x10] sm:$0xff] %vm10905_vm11, %v10289_v42  ;;  %v6542_v17 = vpop.permute.xlu1 %6541  ;;  %v5449_v42 = vrot.slane %v8878_v26, 1  ;;  %v8881_v22 = vld [vmem:[#allocation2 + $0x90] sm:$0xfe]   ;;  %v6014_v54 = vshll.u32 %v8883_v33, 16  ;;  %v7404_v61 = vsel %vm10908_vm4, %v8880_v5, 0 }
 0x27d   : > { %6586 = vst.msk [vmem:[#allocation3 + $0x18] sm:$0xff] %vm3043_vm10, %v6542_v17  ;;  %v8882_v40 = vld [vmem:[#allocation2 + $0x98] ss:$0 sps:$4 sm:$0x11]   ;;  %v10383_v53 = vld [vmem:[#allocation2 + $0x90] sm:$0xff]   ;;  %v5451_v30 = vrot.slane %v8881_v22, 1  ;;  %8429 = vmatpush3.bf16.msra.mxu1 %v7404_v61  ;;  %v7239_v25 = vsel %vm1869_vm6, %v7237_v10, %v7238_v13 }
 0x27e   : > { %6555 = vrot.lane.b32.xlu0 %v8867_v3, %s9018_s10  ;;  %v6016_v34 = vrot.slane %v6014_v54, 1  ;;  %v5452_v36 = vrot.slane %v8882_v40, 1  ;;  %v8884_v38 = vld [vmem:[#allocation2 + $0x98] ss:$0 sps:$4 sm:$0x11]   ;;  %v5450_v48 = vsel %vm1869_vm6, %v5448_v35, %v5449_v42  ;;  %v5128_v55 = vshrl.u32 %v10383_v53, 16 }
 0x27f   : > { %6553 = vrot.lane.b32.xlu1 %v8868_v58, %s9018_s10  ;;  %v5648_v19 = vpop.permute.xlu0 %5647  ;;  %v8885_v0 = vld [vmem:[#allocation2 + $0x84] sm:$0xfe]   ;;  %v6019_v11 = vshll.u32 %v8884_v38, 16  ;;  %v8886_v21 = vld [vmem:[#allocation2 + $0x8c] ss:$0 sps:$4 sm:$0x11]  }
 0x280   : > { %5691 = vst.msk [vmem:[#allocation3 + $0x20] sm:$0xff] %vm10907_vm5, %v5648_v19  ;;  %v10385_v28 = vpop.permute.xlu1 %6369  ;;  %v6017_v16 = vor.u32 %v6016_v34, %v6012_v18  ;;  %v10398_v44 = vld [vmem:[%s10807_s4] ss:$0 sm:$0xff]  ;;  %v5453_v49 = vsel %vm1869_vm6, %v5451_v30, %v5452_v36  ;;  %v7234_v6 = vrot.slane %v8885_v0, 1  ;;  %v7235_v59 = vrot.slane %v8886_v21, 1  ;;  %v8891_v38 = vld [vmem:[#allocation2 + $0x84] sm:$0xff]  }
 0x281   : > { %v6021_v56 = vrot.slane %v6019_v11, 1  ;;  %v5130_v51 = vshll.u32 %v10383_v53, 16  ;;  %v7320_v24 = vld [vmem:[#allocation3 + $0x8] sm:$0xff]  ;;  %v8888_v63 = vld [vmem:[#allocation2 + $0x98] ss:$0 sps:$4 sm:$0x11]  }
 0x282   : > { %5659 = vrot.lane.b32.xlu0 %v8871_v41, %s9017_s9  ;;  %v8418_v9 = vpop.f32.mrb[24].mxu0  ;;  %8431 = vmatmul.mubr.msk.bf16.vlgmr.msra.gmra.mrb[0].mxu1 %vm3825_vm7, %v7320_v24  ;;  %v7236_v33 = vsel %vm1869_vm6, %v7234_v6, %v7235_v59  ;;  %v5135_v13 = vshll.u32 %v8888_v63, 16  ;;  %v8889_v15 = vld [vmem:[#allocation2 + $0x84] sm:$0xfe]   ;;  %v4635_v30 = vld [vmem:[#allocation2 + $0x9c] sm:$0xf] }
 0x283   : > { %6381 = vrot.lane.b32.xlu1 %v6346_v29, %s9019_s11  ;;  %v10389_v39 = vpop.permute.xlu0 %7263  ;;  %v4017_v45 = vadd.f32 %v10398_v44, %v8418_v9  ;;  %v4008_v47 = vpop.f32.mrb[25].mxu0  ;;  %v6022_v31 = vsel %vm1435_vm9, %v6017_v16, %v6021_v56  ;;  %v5132_v10 = vrot.slane %v5130_v51, 1  ;;  %v8890_v35 = vld [vmem:[#allocation2 + $0x8c] ss:$0 sps:$4 sm:$0x11]   ;;  %v6341_v21 = vrot.slane %v8889_v15, 1 }
 0x284   : > { %v10393_v57 = vpop.permute.xlu1 %5473  ;;  %v4009_v7 = vadd.f32 %v10398_v44, %v4008_v47  ;;  %v8419_v46 = vpop.f32.mrb[26].mxu0  ;;  %v7321_v18 = vld [vmem:[#allocation3 + $0x10] sm:$0xff]  ;;  %v5137_v36 = vrot.slane %v5135_v13, 1  ;;  %v4646_v16 = vld [vmem:[#allocation2 + $0xb0] sm:$0x1]  ;;  %vm10909_vm5 = vcmask 64544  }
 0x285   : > { %vm4065_vm12 = vcmp.gt.f32.partialorder %v4017_v45, 0.0  ;;  %v4097_v60 = vmul.f32 0.01, %v4017_v45  ;;  %v4020_v37 = vadd.f32 %v10398_v44, %v8419_v46  ;;  %v4011_v4 = vpop.f32.mrb[27].mxu0  ;;  %v4642_v42 = vld [vmem:[#allocation2 + $0xa8] sm:$0xf]  ;;  %v5133_v40 = vor.u32 %v5132_v10, %v5128_v55  ;;  %8434 = vmatprep.mubr.msk.bf16.mxu1 %vm3825_vm7, %v7321_v18 }
 0x286   : > { %7275 = vrot.lane.b32.xlu0 %v7239_v25, %s9020_s12  ;;  %vm4063_vm0 = vcmp.gt.f32.partialorder %v4009_v7, 0.0  ;;  %v4095_v62 = vmul.f32 0.01, %v4009_v7  ;;  %v4012_v52 = vadd.f32 %v10398_v44, %v4011_v4  ;;  %v8893_v46 = vld [vmem:[#allocation2 + $0x90] sm:$0xff]   ;;  %vm10910_vm4 = vcmask 97344  }
 0x287   : > { %5485 = vrot.lane.b32.xlu1 %v5450_v48, %s9015_s7  ;;  %v5476_v27 = vpop.permute.xlu0 %5475  ;;  %v4129_v32 = vsel %vm4065_vm12, %v4017_v45, %v4097_v60  ;;  %vm4066_vm11 = vcmp.gt.f32.partialorder %v4020_v37, 0.0  ;;  %v4098_v14 = vmul.f32 0.01, %v4020_v37  ;;  %v5138_v6 = vsel %vm1435_vm9, %v5133_v40, %v5137_v36  ;;  %v8961_v4 = vld [vmem:[#allocation2 + $0x6c] sm:$0xff]  }
 0x288   : > { %v10412_v3 = vpop.permute.xlu1 %6081  ;;  %v8342_v58 = vpack.c.bf16 %v4129_v32, %v4129_v32  ;;  %v4127_v43 = vsel %vm4063_vm0, %v4009_v7, %v4095_v62  ;;  %vm4064_vm8 = vcmp.gt.f32.partialorder %v4012_v52, 0.0  ;;  %v4096_v50 = vmul.f32 0.01, %v4012_v52  ;;  %v8892_v7 = vld [vmem:[#allocation2 + $0x8c] ss:$0 sps:$4 sm:$0x11]  }
 0x289   : > { %v8340_v8 = vpack.c.bf16 %v4127_v43, %v4127_v43  ;;  %v4130_v41 = vsel %vm4066_vm11, %v4020_v37, %v4098_v14  ;;  %v6342_v60 = vrot.slane %v8890_v35, 1  ;;  %v8895_v37 = vld [vmem:[#allocation2 + $0x84] sm:$0xff]   ;;  %v8894_v14 = vld [vmem:[#allocation2 + $0x98] ss:$0 sps:$4 sm:$0x11]   ;;  %vm10911_vm12 = vcmask 31744  }
 0x28a   : > { %5487 = vrot.lane.b32.xlu0 %v5453_v49, %s9015_s7  ;;  %v4453_v17 = vshrl.u32 %v8342_v58, 16  ;;  %v8343_v26 = vpack.c.bf16 %v4130_v41, %v4130_v41  ;;  %v4128_v5 = vsel %vm4064_vm8, %v4012_v52, %v4096_v50  ;;  %v4456_v19 = vshll.u32 %v8342_v58, 16  ;;  %v4639_v49 = vld [vmem:[#allocation2 + $0xa4] sm:$0x1]  ;;  %4800 = vst.msk [vmem:[#allocation3 + $0x48] sm:$0xff] %vm10911_vm12, %v8961_v4  ;;  %vm10914_vm8 = vmmov %vm10911_vm12 }
 0x28b   : > { %6093 = vrot.lane.b32.xlu1 %v6022_v31, %s9021_s13  ;;  %v4436_v22 = vshrl.u32 %v8340_v8, 16  ;;  %v8341_v54 = vpack.c.bf16 %v4128_v5, %v4128_v5  ;;  %v10418_v61 = vpop.permute.xlu0 %7261  ;;  %v4439_v29 = vshll.u32 %v8340_v8, 16  ;;  %v6343_v32 = vsel %vm1869_vm6, %v6341_v21, %v6342_v60  ;;  %v8896_v15 = vld [vmem:[#allocation2 + $0x8c] ss:$0 sps:$4 sm:$0x11]  }
 0x28c   : > { %v4455_v53 = vrot.slane %v4453_v17, 7  ;;  %v4461_v34 = vshrl.u32 %v8343_v26, 16  ;;  %v5188_v25 = vpop.permute.xlu1 %5187  ;;  %v4464_v9 = vshll.u32 %v8343_v26, 16  ;;  %v6886_v50 = vshll.u32 %v8891_v38, 16  ;;  %v8897_v17 = vld [vmem:[#allocation2 + $0x84] sm:$0xff]   ;;  %v8962_v26 = vld [vmem:[#allocation2 + $0x90] sm:$0xff]  }
 0x28d   : > { %v4438_v0 = vrot.slane %v4436_v22, 7  ;;  %v4444_v11 = vshrl.u32 %v8341_v54, 16  ;;  %5229 = vst.msk [vmem:[#allocation3 + $0x30] sm:$0xff] %vm10909_vm5, %v5188_v25  ;;  %v4447_v48 = vshll.u32 %v8341_v54, 16  ;;  %v6891_v8 = vshll.u32 %v8892_v7, 16 }
 0x28e   : > { %7273 = vrot.lane.b32.xlu0 %v7236_v33, %s9020_s12  ;;  %v4458_v45 = vor.u32 %v4456_v19, %v4455_v53  ;;  %v4463_v47 = vrot.slane %v4461_v34, 7  ;;  %5517 = vst.msk [vmem:[#allocation3 + $0x30] sm:$0xff] %vm10910_vm4, %v5476_v27  ;;  %v4459_v56 = vrot.slane %v4455_v53, 4  ;;  %vm10912_vm0 = vcmask 27648   ;;  %vm10916_vm4 = vmmov %vm10914_vm8 }
 0x28f   : > { %v4441_v59 = vor.u32 %v4439_v29, %v4438_v0  ;;  %v4446_v55 = vrot.slane %v4444_v11, 7  ;;  %5199 = vrot.lane.b32.xlu1 %v5138_v6, %s9016_s8  ;;  %v4442_v24 = vrot.slane %v4438_v0, 4  ;;  %v6368_v33 = vpop.permute.xlu0 %6367  ;;  %v6898_v13 = vshll.u32 %v8893_v46, 16  ;;  %vm10913_vm11 = vmmov %vm10912_vm0  ;;  %4803 = vst.msk [vmem:[#allocation3 + $0x60] sm:$0xff] %vm10914_vm8, %v8962_v26 }
 0x290   : > { %v4643_v51 = vsel %vm9158_vm15, %v4458_v45, %v4642_v42  ;;  %v4466_v62 = vor.u32 %v4464_v9, %v4463_v47  ;;  %v4468_v52 = vrot.slane %v4463_v47, 4  ;;  %v6884_v5 = vshrl.u32 %v8891_v38, 16 }
 0x291   : > { %4644 = vst [vmem:[#allocation2 + $0xa8] sm:$0xf] %v4643_v51  ;;  %v4636_v31 = vsel %vm9158_vm15, %v4441_v59, %v4635_v30  ;;  %v4449_v63 = vor.u32 %v4447_v48, %v4446_v55  ;;  %v4451_v27 = vrot.slane %v4446_v55, 4  ;;  %v6888_v35 = vrot.slane %v6886_v50, 1  ;;  %v6974_v34 = vpop.permute.xlu1 %6973 }
 0x292   : > { %4637 = vst [vmem:[#allocation2 + $0x9c] sm:$0xf] %v4636_v31  ;;  %v4467_v58 = vsel %vm9165_vm1, %v4459_v56, %v4466_v62  ;;  %v4647_v43 = vsel %vm9074_vm3, %v4468_v52, %v4646_v16  ;;  %6379 = vrot.lane.b32.xlu0 %v6343_v32, %s9019_s11  ;;  %v6896_v18 = vshrl.u32 %v8893_v46, 16  ;;  %v6903_v19 = vshll.u32 %v8894_v14, 16  ;;  %7018 = vst.msk [vmem:[#allocation3 + $0x18] sm:$0xff] %vm3476_vm14, %v6974_v34  ;;  %v8963_v16 = vld [vmem:[#allocation2 + $0x84] sm:$0xff]  }
 0x293   : > { %4645 = vst.msk [vmem:[#allocation2 + $0xac] sm:$0xf] %vm10912_vm0, %v4467_v58  ;;  %4648 = vst [vmem:[#allocation2 + $0xb0] sm:$0x1] %v4647_v43  ;;  %v4450_v41 = vsel %vm9165_vm1, %v4442_v24, %v4449_v63  ;;  %v4640_v10 = vsel %vm9074_vm3, %v4451_v27, %v4639_v49  ;;  %v6893_v42 = vrot.slane %v6891_v8, 1  ;;  %v6900_v22 = vrot.slane %v6898_v13, 1  ;;  %v6976_v38 = vpop.permute.xlu0 %6975 }
 0x294   : > { %4638 = vst.msk [vmem:[#allocation2 + $0xa0] sm:$0xf] %vm10913_vm11, %v4450_v41  ;;  %4641 = vst [vmem:[#allocation2 + $0xa4] sm:$0x1] %v4640_v10  ;;  %v5116_v54 = vshrl.u32 %v8895_v37, 16  ;;  %v5118_v40 = vshll.u32 %v8895_v37, 16  ;;  %v6889_v53 = vor.u32 %v6888_v35, %v6884_v5 }
 0x295   : > { %v5123_v29 = vshll.u32 %v8896_v15, 16  ;;  %v8898_v30 = vld [vmem:[#allocation2 + $0x8c] ss:$0 sps:$4 sm:$0x11]   ;;  %v6901_v36 = vor.u32 %v6900_v22, %v6896_v18  ;;  %v6905_v25 = vrot.slane %v6903_v19, 1  ;;  %v6002_v9 = vshll.u32 %v8897_v17, 16  ;;  %v5186_v7 = vpop.permute.xlu1 %5185 }
 0x296   : > { %v5120_v0 = vrot.slane %v5118_v40, 1  ;;  %v6894_v11 = vsel %vm1435_vm9, %v6889_v53, %v6893_v42  ;;  %v6007_v21 = vshll.u32 %v8898_v30, 16  ;;  %vm10915_vm5 = vcmask 294144   ;;  %4802 = vst.msk [vmem:[#allocation3 + $0x58] sm:$0xff] %vm10916_vm4, %v8963_v16 }
 0x297   : > { %7306 = vst.msk [vmem:[#allocation3 + $0x18] sm:$0xff] %vm10915_vm5, %v10418_v61  ;;  %6985 = vrot.lane.b32.xlu1 %v6894_v11, %s9022_s14  ;;  %v6906_v45 = vsel %vm1435_vm9, %v6901_v36, %v6905_v25  ;;  %v6000_v48 = vshrl.u32 %v8897_v17, 16  ;;  %v6004_v49 = vrot.slane %v6002_v9, 1  ;;  %v5125_v6 = vrot.slane %v5123_v29, 1  ;;  %v6080_v59 = vpop.permute.xlu0 %6079  ;;  %vm10920_vm8 = vmmov %vm10915_vm5 }
 0x298   : > { %v5121_v47 = vor.u32 %v5120_v0, %v5116_v54  ;;  %6987 = vrot.lane.b32.xlu0 %v6906_v45, %s9022_s14  ;;  %v6009_v56 = vrot.slane %v6007_v21, 1  ;;  %vm10917_vm12 = vcmask 64544   ;;  %vm10918_vm0 = vcmask 97344   ;;  %6123 = vst.msk [vmem:[#allocation3 + $0x20] sm:$0xff] %vm2576_vm13, %v6080_v59 }
 0x299   : > { %v6005_v46 = vor.u32 %v6004_v49, %v6000_v48  ;;  %5228 = vst.msk [vmem:[#allocation3 + $0x28] sm:$0xff] %vm10917_vm12, %v5186_v7  ;;  %vm10919_vm11 = vcmask 130144   ;;  %v10465_v24 = vpop.permute.xlu1 %5653 }
 0x29a   : > { %v5126_v61 = vsel %vm1435_vm9, %v5121_v47, %v5125_v6  ;;  %5516 = vst.msk [vmem:[#allocation3 + $0x28] sm:$0xff] %vm10918_vm0, %v10393_v57  ;;  %v8899_v60 = vld [vmem:[#allocation2 + $0xa8] sm:$0xff]   ;;  %v8906_v63 = vld [vmem:[#allocation2 + $0xb0] ss:$0 sps:$4 sm:$0x11]   ;;  %vm10921_vm5 = vmmov %vm10919_vm11 }
 0x29b   : > { %5197 = vrot.lane.b32.xlu1 %v5126_v61, %s9016_s8  ;;  %v6010_v55 = vsel %vm1435_vm9, %v6005_v46, %v6009_v56  ;;  %5692 = vst.msk [vmem:[#allocation3 + $0x28] sm:$0xff] %vm10919_vm11, %v10361_v2  ;;  %v8900_v37 = vld [vmem:[#allocation2 + $0x9c] sm:$0xff]   ;;  %v8904_v51 = vld [vmem:[#allocation2 + $0xa4] ss:$0 sps:$4 sm:$0x11]   ;;  %v10470_v2 = vpop.permute.xlu0 %6547  ;;  %v8914_v19 = vld [vmem:[#allocation2 + $0xa8] sm:$0xff]  }
 0x29c   : > { %6411 = vst.msk [vmem:[#allocation3 + $0x20] sm:$0xff] %vm2865_vm2, %v6368_v33  ;;  %6091 = vrot.lane.b32.xlu0 %v6010_v55, %s9021_s13  ;;  %v8903_v4 = vld [vmem:[#allocation2 + $0x9c] sm:$0xfe]   ;;  %v7241_v52 = vrot.slane %v8904_v51, 1  ;;  %v8905_v31 = vld [vmem:[#allocation2 + $0xa8] sm:$0xfe]  }
 0x29d   : > { %6124 = vst.msk [vmem:[#allocation3 + $0x28] sm:$0xff] %vm2576_vm13, %v10412_v3  ;;  %v8912_v57 = vld [vmem:[#allocation2 + $0x9c] sm:$0xff]   ;;  %v7240_v62 = vrot.slane %v8903_v4, 1  ;;  %v6350_v27 = vrot.slane %v8905_v31, 1  ;;  %v6546_v14 = vpop.permute.xlu1 %6545  ;;  %v6351_v33 = vrot.slane %v8906_v63, 1  ;;  %v6038_v53 = vshll.u32 %v8914_v19, 16 }
 0x29e   : > { %6587 = vst.msk [vmem:[#allocation3 + $0x20] sm:$0xff] %vm3043_vm10, %v10369_v23  ;;  %v8901_v3 = vld [vmem:[#allocation2 + $0x9c] sm:$0xff]   ;;  %v6024_v23 = vshrl.u32 %v8912_v57, 16  ;;  %v8908_v58 = vld [vmem:[#allocation2 + $0xa4] ss:$0 sps:$4 sm:$0x11]  }
 0x29f   : > { %6412 = vst.msk [vmem:[#allocation3 + $0x28] sm:$0xff] %vm2865_vm2, %v10385_v28  ;;  %5665 = vrot.lane.b32.xlu1 %v8899_v60, %s9017_s9  ;;  %v8907_v32 = vld [vmem:[#allocation2 + $0x9c] sm:$0xfe]   ;;  %v6026_v28 = vshll.u32 %v8912_v57, 16  ;;  %v5652_v43 = vpop.permute.xlu0 %5651  ;;  %v6348_v41 = vrot.slane %v8908_v58, 1  ;;  %v6352_v35 = vsel %vm1869_vm6, %v6350_v27, %v6351_v33  ;;  %v6036_v29 = vshrl.u32 %v8914_v19, 16 }
 0x2a0   : > { %7019 = vst.msk [vmem:[#allocation3 + $0x20] sm:$0xff] %vm3476_vm14, %v6976_v38  ;;  %5663 = vrot.lane.b32.xlu0 %v8900_v37, %s9017_s9  ;;  %v6347_v50 = vrot.slane %v8907_v32, 1  ;;  %v8909_v10 = vld [vmem:[#allocation2 + $0x9c] sm:$0xfe]   ;;  %v6040_v25 = vrot.slane %v6038_v53, 1  ;;  %v7322_v11 = vld [vmem:[#allocation3 + $0x18] sm:$0xff] }
 0x2a1   : > { %7307 = vst.msk [vmem:[#allocation3 + $0x20] sm:$0xff] %vm10920_vm8, %v10389_v39  ;;  %v6028_v8 = vrot.slane %v6026_v28, 1  ;;  %v7242_v39 = vsel %vm1869_vm6, %v7240_v62, %v7241_v52  ;;  %v8910_v13 = vld [vmem:[#allocation2 + $0xa4] ss:$0 sps:$4 sm:$0x11]   ;;  %v10481_v15 = vpop.permute.xlu1 %6373  ;;  %v5454_v17 = vrot.slane %v8909_v10, 1  ;;  %8435 = vmatmul.mubr.msk.bf16.gmra.mrb[4].mxu1 %vm3825_vm7, %v7322_v11 }
 0x2a2   : > { %6588 = vst.msk [vmem:[#allocation3 + $0x28] sm:$0xff] %vm3043_vm10, %v6546_v14  ;;  %v5455_v26 = vrot.slane %v8910_v13, 1  ;;  %v8913_v18 = vld [vmem:[#allocation2 + $0xa4] ss:$0 sps:$4 sm:$0x11]   ;;  %v6349_v42 = vsel %vm1869_vm6, %v6347_v50, %v6348_v41  ;;  %v8917_v9 = vld [vmem:[#allocation2 + $0x9c] sm:$0xff]   ;;  %v6041_v45 = vor.u32 %v6040_v25, %v6036_v29 }
 0x2a3   : > { %5693 = vst.msk [vmem:[#allocation3 + $0x30] sm:$0xff] %vm10921_vm5, %v5652_v43  ;;  %6557 = vrot.lane.b32.xlu1 %v8901_v3, %s9018_s10  ;;  %v10483_v5 = vpop.permute.xlu0 %7267  ;;  %v6029_v22 = vor.u32 %v6028_v8, %v6024_v23  ;;  %v6031_v54 = vshll.u32 %v8913_v18, 16  ;;  %v8915_v40 = vld [vmem:[#allocation2 + $0xb0] ss:$0 sps:$4 sm:$0x11]   ;;  %v6910_v49 = vshll.u32 %v8917_v9, 16 }
 0x2a4   : > { %7277 = vrot.lane.b32.xlu0 %v7242_v39, %s9020_s12  ;;  %v5456_v34 = vsel %vm1869_vm6, %v5454_v17, %v5455_v26  ;;  %v6043_v0 = vshll.u32 %v8915_v40, 16  ;;  %v8918_v16 = vld [vmem:[#allocation2 + $0xa4] ss:$0 sps:$4 sm:$0x11]   ;;  %v8919_v7 = vld [vmem:[#allocation2 + $0xa8] sm:$0xff]   ;;  %v6908_v55 = vshrl.u32 %v8917_v9, 16 }
 0x2a5   : > { %v6033_v36 = vrot.slane %v6031_v54, 1  ;;  %v10492_v38 = vpop.permute.xlu1 %5477  ;;  %v6915_v6 = vshll.u32 %v8918_v16, 16  ;;  %v8916_v61 = vld [vmem:[#allocation2 + $0xa8] sm:$0xff]   ;;  %v6912_v4 = vrot.slane %v6910_v49, 1  ;;  %v6920_v57 = vshrl.u32 %v8919_v7, 16  ;;  %v10510_v10 = vld [vmem:[#allocation2 + $0x9c] sm:$0xff]  }
 0x2a6   : > { %v6045_v47 = vrot.slane %v6043_v0, 1  ;;  %v8920_v63 = vld [vmem:[#allocation2 + $0xb0] ss:$0 sps:$4 sm:$0x11]   ;;  %v6922_v23 = vshll.u32 %v8919_v7, 16  ;;  %v8964_v0 = vld [vmem:[#allocation2 + $0x9c] sm:$0xff]  }
 0x2a7   : > { %6385 = vrot.lane.b32.xlu1 %v6352_v35, %s9019_s11  ;;  %v10489_v30 = vpop.permute.xlu0 %5479  ;;  %v6034_v21 = vsel %vm1435_vm9, %v6029_v22, %v6033_v36  ;;  %v6917_v51 = vrot.slane %v6915_v6, 1  ;;  %v6913_v14 = vor.u32 %v6912_v4, %v6908_v55  ;;  %v4656_v54 = vld [vmem:[#allocation2 + $0xc0] sm:$0xf]  ;;  %v8922_v36 = vld [vmem:[#allocation2 + $0xa4] ss:$0 sps:$4 sm:$0x11]  }
 0x2a8   : > { %6383 = vrot.lane.b32.xlu0 %v6349_v42, %s9019_s11  ;;  %v6046_v59 = vsel %vm1435_vm9, %v6041_v45, %v6045_v47  ;;  %v7323_v33 = vld [vmem:[#allocation3 + $0x20] sm:$0xff]  ;;  %v6924_v50 = vrot.slane %v6922_v23, 1  ;;  %v4649_v16 = vld [vmem:[#allocation2 + $0xb4] sm:$0xf]  ;;  %v5140_v45 = vshrl.u32 %v10510_v10, 16  ;;  %vm10922_vm8 = vcmask 64544  }
 0x2a9   : > { %8438 = vmatprep.mubr.msk.bf16.mxu1 %vm3825_vm7, %v7323_v33  ;;  %vm10923_vm5 = vcmask 97344   ;;  %v5142_v55 = vshll.u32 %v10510_v10, 16  ;;  %v8934_v1 = vld [vmem:[#allocation2 + $0xb0] ss:$0 sps:$4 sm:$0x11]  }
 0x2aa   : > { %v6925_v26 = vor.u32 %v6924_v50, %v6920_v57  ;;  %v10530_v50 = vld [vmem:[#allocation2 + $0xa8] sm:$0xfe]  }
 0x2ab   : > { %5489 = vrot.lane.b32.xlu1 %v5456_v34, %s9015_s7  ;;  %v6927_v34 = vshll.u32 %v8920_v63, 16  ;;  %v5457_v20 = vrot.slane %v10530_v50, 1 }
 0x2ac   : > { %6095 = vrot.lane.b32.xlu0 %v6034_v21, %s9021_s13 }
 0x2ad   : > { %v6929_v7 = vrot.slane %v6927_v34, 1 }
 0x2af   : > { %6097 = vrot.lane.b32.xlu1 %v6046_v59, %s9021_s13 }
 0x2b0   : > { %6559 = vrot.lane.b32.xlu0 %v8916_v61, %s9018_s10  ;;  %v4653_v61 = vld [vmem:[#allocation2 + $0xbc] sm:$0x1] }
 0x2b1   : > { %v8422_v48 = vpop.f32.mrb[28].mxu0  ;;  %v10502_v62 = vpop.permute.xlu0 %7265 }
 0x2b2   : > { %v4033_v46 = vadd.f32 %v10398_v44, %v8422_v48  ;;  %v4024_v56 = vpop.f32.mrb[29].mxu0  ;;  %v4660_v48 = vld [vmem:[#allocation2 + $0xc8] sm:$0x1] }
 0x2b3   : > { %v4025_v60 = vadd.f32 %v10398_v44, %v4024_v56  ;;  %v8423_v37 = vpop.f32.mrb[30].mxu0  ;;  %v10505_v27 = vpop.permute.xlu1 %6085 }
 0x2b4   : > { %vm4069_vm4 = vcmp.gt.f32.partialorder %v4033_v46, 0.0  ;;  %v4101_v52 = vmul.f32 0.01, %v4033_v46  ;;  %v4036_v31 = vadd.f32 %v10398_v44, %v8423_v37  ;;  %v4027_v3 = vpop.f32.mrb[31].mxu0  ;;  %v8965_v37 = vld [vmem:[#allocation2 + $0xa8] sm:$0xff]  }
 0x2b5   : > { %vm4067_vm12 = vcmp.gt.f32.partialorder %v4025_v60, 0.0  ;;  %v4099_v32 = vmul.f32 0.01, %v4025_v60  ;;  %v4028_v28 = vadd.f32 %v10398_v44, %v4027_v3  ;;  %v6918_v44 = vsel %vm1435_vm9, %v6913_v14, %v6917_v51 }
 0x2b6   : > { %v4133_v58 = vsel %vm4069_vm4, %v4033_v46, %v4101_v52  ;;  %vm4070_vm0 = vcmp.gt.f32.partialorder %v4036_v31, 0.0  ;;  %v4102_v43 = vmul.f32 0.01, %v4036_v31  ;;  %6989 = vrot.lane.b32.xlu1 %v6918_v44, %s9022_s14  ;;  %vm10924_vm4 = vcmask 31744  }
 0x2b7   : > { %v8346_v8 = vpack.c.bf16 %v4133_v58, %v4133_v58  ;;  %v4131_v39 = vsel %vm4067_vm12, %v4025_v60, %v4099_v32  ;;  %vm4068_vm11 = vcmp.gt.f32.partialorder %v4028_v28, 0.0  ;;  %v4100_v41 = vmul.f32 0.01, %v4028_v28  ;;  %4804 = vst.msk [vmem:[#allocation3 + $0x68] sm:$0xff] %vm10924_vm4, %v8964_v0  ;;  %v8923_v60 = vld [vmem:[#allocation2 + $0xa8] sm:$0xfe]   ;;  %vm10925_vm12 = vmmov %vm10924_vm4 }
 0x2b8   : > { %v8344_v13 = vpack.c.bf16 %v4131_v39, %v4131_v39  ;;  %v4134_v17 = vsel %vm4070_vm0, %v4036_v31, %v4102_v43  ;;  %v6930_v52 = vsel %vm1435_vm9, %v6925_v26, %v6929_v7  ;;  %v8924_v31 = vld [vmem:[#allocation2 + $0xb0] ss:$0 sps:$4 sm:$0x11]   ;;  %4805 = vst.msk [vmem:[#allocation3 + $0x70] sm:$0xff] %vm10925_vm12, %v8965_v37  ;;  %v5147_v43 = vshll.u32 %v8922_v36, 16  ;;  %vm10932_vm12 = vmmov %vm10922_vm8 }
 0x2b9   : > { %v4487_v18 = vshrl.u32 %v8346_v8, 16  ;;  %v4490_v19 = vshll.u32 %v8346_v8, 16  ;;  %v8347_v42 = vpack.c.bf16 %v4134_v17, %v4134_v17  ;;  %v4132_v22 = vsel %vm4068_vm11, %v4028_v28, %v4100_v41  ;;  %6991 = vrot.lane.b32.xlu0 %v6930_v52, %s9022_s14 }
 0x2ba   : > { %v4470_v40 = vshrl.u32 %v8344_v13, 16  ;;  %v4473_v53 = vshll.u32 %v8344_v13, 16  ;;  %v8345_v29 = vpack.c.bf16 %v4132_v22, %v4132_v22  ;;  %v5144_v28 = vrot.slane %v5142_v55, 1  ;;  %v10538_v13 = vld [vmem:[#allocation2 + $0xb0] ss:$0 sps:$4 sm:$0x11]  }
 0x2bb   : > { %v4489_v9 = vrot.slane %v4487_v18, 7  ;;  %v4495_v11 = vshrl.u32 %v8347_v42, 16  ;;  %v4498_v21 = vshll.u32 %v8347_v42, 16  ;;  %vm10926_vm0 = vcmask 294144   ;;  %v8933_v18 = vld [vmem:[#allocation2 + $0xa8] sm:$0xff]  }
 0x2bc   : > { %v4472_v47 = vrot.slane %v4470_v40, 7  ;;  %v4478_v49 = vshrl.u32 %v8345_v29, 16  ;;  %v4481_v6 = vshll.u32 %v8345_v29, 16  ;;  %v5145_v41 = vor.u32 %v5144_v28, %v5140_v45 }
 0x2bd   : > { %v4492_v46 = vor.u32 %v4490_v19, %v4489_v9  ;;  %v4493_v56 = vrot.slane %v4489_v9, 4  ;;  %v4497_v59 = vrot.slane %v4495_v11, 7  ;;  %v7243_v10 = vrot.slane %v8923_v60, 1 }
 0x2be   : > { %v4475_v4 = vor.u32 %v4473_v53, %v4472_v47  ;;  %v4476_v51 = vrot.slane %v4472_v47, 4  ;;  %v4480_v57 = vrot.slane %v4478_v49, 7  ;;  %v5149_v17 = vrot.slane %v5147_v43, 1 }
 0x2bf   : > { %v10513_v35 = vpop.permute.xlu0 %6371  ;;  %v4500_v23 = vor.u32 %v4498_v21, %v4497_v59  ;;  %v4502_v32 = vrot.slane %v4497_v59, 4  ;;  %v7244_v44 = vrot.slane %v8924_v31, 1  ;;  %v5154_v40 = vshll.u32 %v8933_v18, 16 }
 0x2c0   : > { %v4650_v14 = vsel %vm9158_vm15, %v4475_v4, %v4649_v16  ;;  %v4483_v33 = vor.u32 %v4481_v6, %v4480_v57  ;;  %v4485_v58 = vrot.slane %v4480_v57, 4  ;;  %v5150_v42 = vsel %vm1435_vm9, %v5145_v41, %v5149_v17 }
 0x2c1   : > { %v5192_v25 = vpop.permute.xlu1 %5191  ;;  %4651 = vst [vmem:[#allocation2 + $0xb4] sm:$0xf] %v4650_v14  ;;  %v4501_v8 = vsel %vm9165_vm1, %v4493_v56, %v4500_v23  ;;  %v4661_v39 = vsel %vm9074_vm3, %v4502_v32, %v4660_v48  ;;  %v7245_v22 = vsel %vm1869_vm6, %v7243_v10, %v7244_v44  ;;  %5201 = vrot.lane.b32.xlu1 %v5150_v42, %s9016_s8  ;;  %v5159_v53 = vshll.u32 %v8934_v1, 16 }
 0x2c2   : > { %5231 = vst.msk [vmem:[#allocation3 + $0x40] sm:$0xff] %vm10922_vm8, %v5192_v25  ;;  %4662 = vst [vmem:[#allocation2 + $0xc8] sm:$0x1] %v4661_v39  ;;  %v4484_v12 = vsel %vm9165_vm1, %v4476_v51, %v4483_v33  ;;  %7279 = vrot.lane.b32.xlu0 %v7245_v22, %s9020_s12  ;;  %v5156_v11 = vrot.slane %v5154_v40, 1  ;;  %v5152_v56 = vshrl.u32 %v8933_v18, 16 }
 0x2c3   : > { %5519 = vst.msk [vmem:[#allocation3 + $0x40] sm:$0xff] %vm10923_vm5, %v10489_v30  ;;  %v4657_v30 = vsel %vm9158_vm15, %v4492_v46, %v4656_v54  ;;  %vm10927_vm15 = vcmask 27648   ;;  %v5458_v54 = vrot.slane %v10538_v13, 1  ;;  %vm10930_vm1 = vmmov %vm10926_vm0  ;;  %v5161_v57 = vrot.slane %v5159_v53, 1 }
 0x2c4   : > { %4658 = vst [vmem:[#allocation2 + $0xc0] sm:$0xf] %v4657_v30  ;;  %4659 = vst.msk [vmem:[#allocation2 + $0xc4] sm:$0xf] %vm10927_vm15, %v4501_v8 }
 0x2c5   : > { %v6978_v3 = vpop.permute.xlu1 %6977  ;;  %vm10928_vm11 = vmmov %vm10927_vm15  ;;  %v5459_v51 = vsel %vm1869_vm6, %v5457_v20, %v5458_v54  ;;  %vm10934_vm15 = vcmask 31744  }
 0x2c6   : > { %v6980_v63 = vpop.permute.xlu0 %6979  ;;  %7020 = vst.msk [vmem:[#allocation3 + $0x28] sm:$0xff] %vm3476_vm14, %v6978_v3 }
 0x2c7   : > { %7308 = vst.msk [vmem:[#allocation3 + $0x28] sm:$0xff] %vm10926_vm0, %v10502_v62  ;;  %v4654_v62 = vsel %vm9074_vm3, %v4485_v58, %v4653_v61  ;;  %vm10929_vm3 = vcmask 130144   ;;  %vm10933_vm0 = vmmov %vm10923_vm5 }
 0x2c8   : > { %4652 = vst.msk [vmem:[#allocation2 + $0xb8] sm:$0xf] %vm10928_vm11, %v4484_v12  ;;  %4655 = vst [vmem:[#allocation2 + $0xbc] sm:$0x1] %v4654_v62 }
 0x2c9   : > { %v5190_v26 = vpop.permute.xlu1 %5189  ;;  %vm10931_vm4 = vmmov %vm10929_vm3 }
 0x2ca   : > { %5230 = vst.msk [vmem:[#allocation3 + $0x38] sm:$0xff] %vm10922_vm8, %v5190_v26  ;;  %v6084_v19 = vpop.permute.xlu0 %6083  ;;  %v8948_v26 = vld [vmem:[#allocation2 + $0xc8] ss:$0 sps:$4 sm:$0x11]   ;;  %vm10935_vm11 = vmmov %vm10930_vm1 }
 0x2cb   : > { %5518 = vst.msk [vmem:[#allocation3 + $0x38] sm:$0xff] %vm10923_vm5, %v10492_v38  ;;  %v8947_v44 = vld [vmem:[#allocation2 + $0xc0] sm:$0xff]   ;;  %v6067_v53 = vshll.u32 %v8948_v26, 16  ;;  %vm10936_vm5 = vmmov %vm10933_vm0 }
 0x2cc   : > { %6125 = vst.msk [vmem:[#allocation3 + $0x30] sm:$0xff] %vm2576_vm13, %v6084_v19  ;;  %v8949_v18 = vld [vmem:[#allocation2 + $0xc0] sm:$0xff]   ;;  %v6062_v20 = vshll.u32 %v8947_v44, 16 }
 0x2cd   : > { %5694 = vst.msk [vmem:[#allocation3 + $0x38] sm:$0xff] %vm10929_vm3, %v10465_v24  ;;  %v10564_v38 = vpop.permute.xlu1 %5657 }
 0x2ce   : > { %6413 = vst.msk [vmem:[#allocation3 + $0x30] sm:$0xff] %vm2865_vm2, %v10513_v35  ;;  %v7324_v24 = vld [vmem:[#allocation3 + $0x28] sm:$0xff]  ;;  %v10569_v35 = vpop.permute.xlu0 %6551 }
 0x2cf   : > { %6126 = vst.msk [vmem:[#allocation3 + $0x38] sm:$0xff] %vm2576_vm13, %v10505_v27  ;;  %8439 = vmatmul.mubr.msk.bf16.gmra.mrb[8].mxu1 %vm3825_vm7, %v7324_v24  ;;  %v8925_v27 = vld [vmem:[#allocation2 + $0xb4] sm:$0xff]   ;;  %v8929_v0 = vld [vmem:[#allocation2 + $0xbc] ss:$0 sps:$4 sm:$0x11]  }
 0x2d0   : > { %6589 = vst.msk [vmem:[#allocation3 + $0x30] sm:$0xff] %vm3043_vm10, %v10470_v2  ;;  %v8926_v2 = vld [vmem:[#allocation2 + $0xb4] sm:$0xfe]   ;;  %6561 = vrot.lane.b32.xlu1 %v8925_v27, %s9018_s10  ;;  %v6939_v45 = vshll.u32 %v8929_v0, 16  ;;  %v6946_v27 = vshll.u32 %v8949_v18, 16 }
 0x2d1   : > { %6414 = vst.msk [vmem:[#allocation3 + $0x38] sm:$0xff] %vm2865_vm2, %v10481_v15  ;;  %v6550_v29 = vpop.permute.xlu1 %6549  ;;  %v8927_v15 = vld [vmem:[#allocation2 + $0xbc] ss:$0 sps:$4 sm:$0x11]   ;;  %v8928_v36 = vld [vmem:[#allocation2 + $0xb4] sm:$0xff]   ;;  %v7246_v25 = vrot.slane %v8926_v2, 1 }
 0x2d2   : > { %7021 = vst.msk [vmem:[#allocation3 + $0x30] sm:$0xff] %vm3476_vm14, %v6980_v63  ;;  %v5656_v34 = vpop.permute.xlu0 %5655  ;;  %v7247_v9 = vrot.slane %v8927_v15, 1  ;;  %v6932_v16 = vshrl.u32 %v8928_v36, 16  ;;  %v8936_v47 = vld [vmem:[#allocation2 + $0xb4] sm:$0xff]   ;;  %v6941_v46 = vrot.slane %v6939_v45, 1  ;;  %v5157_v63 = vor.u32 %v5156_v11, %v5152_v56  ;;  %v8946_v11 = vld [vmem:[#allocation2 + $0xc0] sm:$0xff]  }
 0x2d3   : > { %7309 = vst.msk [vmem:[#allocation3 + $0x30] sm:$0xff] %vm10930_vm1, %v10483_v5  ;;  %v6934_v5 = vshll.u32 %v8928_v36, 16  ;;  %v8937_v7 = vld [vmem:[#allocation2 + $0xbc] ss:$0 sps:$4 sm:$0x11]   ;;  %v5166_v59 = vshll.u32 %v8936_v47, 16 }
 0x2d4   : > { %6590 = vst.msk [vmem:[#allocation3 + $0x38] sm:$0xff] %vm3043_vm10, %v6550_v29  ;;  %v7248_v49 = vsel %vm1869_vm6, %v7246_v25, %v7247_v9  ;;  %v8938_v61 = vld [vmem:[#allocation2 + $0xb4] sm:$0xff]   ;;  %v5171_v60 = vshll.u32 %v8937_v7, 16  ;;  %v8939_v37 = vld [vmem:[#allocation2 + $0xbc] ss:$0 sps:$4 sm:$0x11]   ;;  %v5162_v13 = vsel %vm1435_vm9, %v5157_v63, %v5161_v57 }
 0x2d5   : > { %5695 = vst.msk [vmem:[#allocation3 + $0x40] sm:$0xff] %vm10931_vm4, %v5656_v34  ;;  %v10577_v21 = vpop.permute.xlu1 %6377  ;;  %v6936_v6 = vrot.slane %v6934_v5, 1  ;;  %7281 = vrot.lane.b32.xlu0 %v7248_v49, %s9020_s12  ;;  %v5168_v52 = vrot.slane %v5166_v59, 1  ;;  %v6050_v31 = vshll.u32 %v8938_v61, 16  ;;  %v5164_v30 = vshrl.u32 %v8936_v47, 16  ;;  %v8935_v28 = vld [vmem:[#allocation2 + $0xb4] sm:$0xff]   ;;  %vm10937_vm4 = vmmov %vm10929_vm3 }
 0x2d6   : > { %v10579_v48 = vpop.permute.xlu0 %7271  ;;  %v6055_v23 = vshll.u32 %v8939_v37, 16  ;;  %v6048_v14 = vshrl.u32 %v8938_v61, 16  ;;  %v8941_v58 = vld [vmem:[#allocation2 + $0xb4] sm:$0xfe]   ;;  %v5173_v43 = vrot.slane %v5171_v60, 1  ;;  %v6064_v34 = vrot.slane %v6062_v20, 1 }
 0x2d7   : > { %v6937_v55 = vor.u32 %v6936_v6, %v6932_v16  ;;  %v6052_v33 = vrot.slane %v6050_v31, 1  ;;  %v8942_v50 = vld [vmem:[#allocation2 + $0xbc] ss:$0 sps:$4 sm:$0x11]   ;;  %v5169_v39 = vor.u32 %v5168_v52, %v5164_v30  ;;  %v8943_v62 = vld [vmem:[#allocation2 + $0xb4] sm:$0xfe]  }
 0x2d8   : > { %v6057_v41 = vrot.slane %v6055_v23, 1  ;;  %v8944_v10 = vld [vmem:[#allocation2 + $0xbc] ss:$0 sps:$4 sm:$0x11]   ;;  %v5460_v17 = vrot.slane %v8941_v58, 1  ;;  %v5461_v1 = vrot.slane %v8942_v50, 1 }
 0x2d9   : > { %v10583_v4 = vpop.permute.xlu1 %5481  ;;  %v6942_v3 = vsel %vm1435_vm9, %v6937_v55, %v6941_v46  ;;  %5491 = vrot.lane.b32.xlu0 %v5459_v51, %s9015_s7  ;;  %v6053_v12 = vor.u32 %v6052_v33, %v6048_v14  ;;  %v5174_v22 = vsel %vm1435_vm9, %v5169_v39, %v5173_v43  ;;  %v6353_v40 = vrot.slane %v8943_v62, 1  ;;  %v8950_v2 = vld [vmem:[#allocation2 + $0xc8] ss:$0 sps:$4 sm:$0x11]   ;;  %v8966_v15 = vld [vmem:[#allocation2 + $0xb4] sm:$0xff]   ;;  %v8956_v9 = vld [vmem:[#allocation2 + $0xcc] sm:$0xff]  }
 0x2da   : > { %v5484_v32 = vpop.permute.xlu0 %5483  ;;  %6993 = vrot.lane.b32.xlu1 %v6942_v3, %s9022_s14  ;;  %v6354_v24 = vrot.slane %v8944_v10, 1  ;;  %v7325_v29 = vld [vmem:[#allocation3 + $0x30] sm:$0xff]  ;;  %v5462_v36 = vsel %vm1869_vm6, %v5460_v17, %v5461_v1  ;;  %v6948_v0 = vrot.slane %v6946_v27, 1  ;;  %v8945_v5 = vld [vmem:[#allocation2 + $0xc0] sm:$0xff]   ;;  %v6060_v45 = vshrl.u32 %v8947_v44, 16  ;;  %4806 = vst.msk [vmem:[#allocation3 + $0x78] sm:$0xff] %vm10934_vm15, %v8966_v15  ;;  %vm10942_vm15 = vmmov %vm10936_vm5 }
 0x2db   : > { %v6058_v54 = vsel %vm1435_vm9, %v6053_v12, %v6057_v41  ;;  %8442 = vmatprep.mubr.msk.bf16.mxu1 %vm3825_vm7, %v7325_v29  ;;  %v6069_v47 = vrot.slane %v6067_v53, 1  ;;  %v6944_v49 = vshrl.u32 %v8949_v18, 16  ;;  %v6951_v6 = vshll.u32 %v8950_v2, 16  ;;  %v8952_v7 = vld [vmem:[#allocation2 + $0xc8] ss:$0 sps:$4 sm:$0x11]  }
 0x2dc   : > { %v6355_v25 = vsel %vm1869_vm6, %v6353_v40, %v6354_v24  ;;  %v8954_v46 = vld [vmem:[#allocation2 + $0xc8] ss:$0 sps:$4 sm:$0x11]   ;;  %v6065_v56 = vor.u32 %v6064_v34, %v6060_v45  ;;  %v8951_v59 = vld [vmem:[#allocation2 + $0xc0] sm:$0xfe]   ;;  %v6958_v57 = vshll.u32 %v8956_v9, 16 }
 0x2dd   : > { %v10589_v8 = vpop.permute.xlu1 %6089  ;;  %5667 = vrot.lane.b32.xlu0 %v8935_v28, %s9017_s9  ;;  %v6949_v61 = vor.u32 %v6948_v0, %v6944_v49  ;;  %v8953_v55 = vld [vmem:[#allocation2 + $0xc0] sm:$0xfe]   ;;  %v8957_v60 = vld [vmem:[#allocation2 + $0xd4] ss:$0 sps:$4 sm:$0x11]   ;;  %v6953_v51 = vrot.slane %v6951_v6, 1 }
 0x2de   : > { %5203 = vrot.lane.b32.xlu1 %v5162_v13, %s9016_s8  ;;  %v7270_v19 = vpop.permute.xlu0 %7269  ;;  %v6070_v31 = vsel %vm1435_vm9, %v6065_v56, %v6069_v47  ;;  %v6356_v3 = vrot.slane %v8951_v59, 1  ;;  %v6357_v30 = vrot.slane %v8952_v7, 1  ;;  %v7249_v23 = vrot.slane %v8953_v55, 1  ;;  %v8959_v12 = vld [vmem:[#allocation2 + $0xcc] sm:$0xfe]  }
 0x2df   : > { %v6954_v63 = vsel %vm1435_vm9, %v6949_v61, %v6953_v51  ;;  %v6956_v14 = vshrl.u32 %v8956_v9, 16  ;;  %v6960_v33 = vrot.slane %v6958_v57, 1  ;;  %v6963_v58 = vshll.u32 %v8957_v60, 16  ;;  %v8960_v62 = vld [vmem:[#allocation2 + $0xd4] ss:$0 sps:$4 sm:$0x11]  }
 0x2e0   : > { %v6358_v50 = vsel %vm1869_vm6, %v6356_v3, %v6357_v30  ;;  %v7253_v44 = vrot.slane %v8960_v62, 1 }
 0x2e1   : > { %v5196_v42 = vpop.permute.xlu1 %5195  ;;  %6099 = vrot.lane.b32.xlu0 %v6058_v54, %s9021_s13  ;;  %v6961_v10 = vor.u32 %v6960_v33, %v6956_v14  ;;  %v6965_v13 = vrot.slane %v6963_v58, 1 }
 0x2e2   : > { %5233 = vst.msk [vmem:[#allocation3 + $0x50] sm:$0xff] %vm10932_vm12, %v5196_v42  ;;  %5205 = vrot.lane.b32.xlu1 %v5174_v22, %s9016_s8  ;;  %v6376_v16 = vpop.permute.xlu0 %6375  ;;  %vm10939_vm12 = vmmov %vm10933_vm0 }
 0x2e3   : > { %5521 = vst.msk [vmem:[#allocation3 + $0x50] sm:$0xff] %vm10933_vm0, %v5484_v32  ;;  %v7250_v32 = vrot.slane %v8954_v46, 1  ;;  %vm10941_vm0 = vmmov %vm10922_vm8 }
 0x2e5   : > { %6387 = vrot.lane.b32.xlu0 %v6355_v25, %s9019_s11  ;;  %v6982_v37 = vpop.permute.xlu1 %6981  ;;  %v7251_v39 = vsel %vm1869_vm6, %v7249_v23, %v7250_v32 }
 0x2e6   : > { %5493 = vrot.lane.b32.xlu1 %v5462_v36, %s9015_s7  ;;  %7022 = vst.msk [vmem:[#allocation3 + $0x38] sm:$0xff] %vm3476_vm14, %v6982_v37 }
 0x2e7   : > { %7310 = vst.msk [vmem:[#allocation3 + $0x38] sm:$0xff] %vm10935_vm11, %v7270_v19  ;;  %vm10943_vm11 = vmmov %vm10929_vm3 }
 0x2e8   : > { %v6984_v52 = vpop.permute.xlu0 %6983 }
 0x2e9   : > { %6563 = vrot.lane.b32.xlu0 %v8946_v11, %s9018_s10  ;;  %v5194_v28 = vpop.permute.xlu1 %5193 }
 0x2ea   : > { %5669 = vrot.lane.b32.xlu1 %v8945_v5, %s9017_s9  ;;  %5232 = vst.msk [vmem:[#allocation3 + $0x48] sm:$0xff] %vm10922_vm8, %v5194_v28  ;;  %s10695_s9 = scalar_lea.vmem %s10809_s6, %s8282_s25 }
 0x2eb   : > { %5520 = vst.msk [vmem:[#allocation3 + $0x48] sm:$0xff] %vm10936_vm5, %v10583_v4  ;;  %v8955_v4 = vld [vmem:[#allocation2 + $0xcc] sm:$0xff]   ;;  %vm10945_vm5 = vmmov %vm10929_vm3 }
 0x2ec   : > { %v6088_v43 = vpop.permute.xlu0 %6087  ;;  %5696 = vst.msk [vmem:[#allocation3 + $0x48] sm:$0xff] %vm10929_vm3, %v10564_v38  ;;  %vm10946_vm3 = vmmov %vm10930_vm1 }
 0x2ed   : > { %6995 = vrot.lane.b32.xlu0 %v6954_v63, %s9022_s14  ;;  %6127 = vst.msk [vmem:[#allocation3 + $0x40] sm:$0xff] %vm2576_vm13, %v6088_v43  ;;  %6128 = vst.msk [vmem:[#allocation3 + $0x48] sm:$0xff] %vm2576_vm13, %v10589_v8  ;;  %v5662_v41 = vpop.permute.xlu1 %5661  ;;  %v8974_v43 = vld [vmem:[%s9107_s28 + $0x10] sm:$0xff] }
 0x2ee   : > { %6101 = vrot.lane.b32.xlu1 %v6070_v31, %s9021_s13  ;;  %6415 = vst.msk [vmem:[#allocation3 + $0x40] sm:$0xff] %vm2865_vm2, %v6376_v16  ;;  %6416 = vst.msk [vmem:[#allocation3 + $0x48] sm:$0xff] %vm2865_vm2, %v10577_v21  ;;  %v7326_v38 = vld [vmem:[#allocation3 + $0x38] sm:$0xff]  ;;  %v7252_v21 = vrot.slane %v8959_v12, 1  ;;  %v8976_v12 = vld [vmem:[%s9107_s28 + $0x18] sm:$0xff] }
 0x2ef   : > { %6591 = vst.msk [vmem:[#allocation3 + $0x40] sm:$0xff] %vm3043_vm10, %v10569_v35  ;;  %8443 = vmatmul.mubr.msk.bf16.gmra.mrb[12].mxu1 %vm3825_vm7, %v7326_v38  ;;  %v6966_v35 = vsel %vm1435_vm9, %v6961_v10, %v6965_v13  ;;  %vm10938_vm9 = vmmov %vm10922_vm8 }
 0x2f0   : > { %7023 = vst.msk [vmem:[#allocation3 + $0x40] sm:$0xff] %vm3476_vm14, %v6984_v52  ;;  %v6556_v8 = vpop.permute.xlu0 %6555  ;;  %v7254_v19 = vsel %vm1869_vm6, %v7252_v21, %v7253_v44  ;;  %vm10940_vm6 = vmmov %vm10930_vm1 }
 0x2f1   : > { %7283 = vrot.lane.b32.xlu0 %v7251_v39, %s9020_s12  ;;  %7311 = vst.msk [vmem:[#allocation3 + $0x40] sm:$0xff] %vm10930_vm1, %v10579_v48  ;;  %v6554_v17 = vpop.permute.xlu1 %6553  ;;  %vm10944_vm8 = vmmov %vm10930_vm1 }
 0x2f2   : > { %6389 = vrot.lane.b32.xlu1 %v6358_v50, %s9019_s11  ;;  %6592 = vst.msk [vmem:[#allocation3 + $0x48] sm:$0xff] %vm3043_vm10, %v6554_v17  ;;  %vm10947_vm1 = vmmov %vm10941_vm0  ;;  %v8977_v17 = vld [vmem:[%s9107_s28 + $0x8] sm:$0xff] }
 0x2f4   : > { %v5660_v26 = vpop.permute.xlu0 %5659 }
 0x2f5   : > { %5697 = vst.msk [vmem:[#allocation3 + $0x50] sm:$0xff] %vm10937_vm4, %v5660_v26  ;;  %v6382_v18 = vpop.permute.xlu1 %6381  ;;  %vm10948_vm4 = vmmov %vm10946_vm3 }
 0x2f6   : > { %6565 = vrot.lane.b32.xlu1 %v8955_v4, %s9018_s10 }
 0x2f8   : > { %v7276_v42 = vpop.permute.xlu0 %7275  ;;  %v7327_v22 = vld [vmem:[#allocation3 + $0x40] sm:$0xff] }
 0x2f9   : > { %8446 = vmatprep.mubr.msk.bf16.mxu1 %vm3825_vm7, %v7327_v22  ;;  %v5486_v48 = vpop.permute.xlu1 %5485  ;;  %v8978_v22 = vld [vmem:[%s9107_s28 + $0x30] sm:$0xff] }
 0x2fa   : > { %6997 = vrot.lane.b32.xlu1 %v6966_v35, %s9022_s14 }
 0x2fc   : > { %v5488_v1 = vpop.permute.xlu0 %5487 }
 0x2fd   : > { %v6094_v20 = vpop.permute.xlu1 %6093 }
 0x2fe   : > { %7285 = vrot.lane.b32.xlu1 %v7254_v19, %s9020_s12 }
 0x300   : > { %v7274_v54 = vpop.permute.xlu0 %7273 }
 0x301   : > { %v5200_v40 = vpop.permute.xlu1 %5199 }
 0x302   : > { %5235 = vst.msk [vmem:[#allocation3 + $0x60] sm:$0xff] %vm10938_vm9, %v5200_v40  ;;  %vm10949_vm9 = vmmov %vm10939_vm12 }
 0x303   : > { %5523 = vst.msk [vmem:[#allocation3 + $0x60] sm:$0xff] %vm10939_vm12, %v5488_v1  ;;  %vm10950_vm12 = vmmov %vm10945_vm5 }
 0x304   : > { %v6380_v24 = vpop.permute.xlu0 %6379 }
 0x309   : > { %v6986_v27 = vpop.permute.xlu1 %6985 }
 0x30a   : > { %7024 = vst.msk [vmem:[#allocation3 + $0x48] sm:$0xff] %vm3476_vm14, %v6986_v27  ;;  %v6988_v53 = vpop.permute.xlu0 %6987 }
 0x30b   : > { %7312 = vst.msk [vmem:[#allocation3 + $0x48] sm:$0xff] %vm10940_vm6, %v7274_v54  ;;  %vm10951_vm6 = vmmov %vm10946_vm3 }
 0x30d   : > { %v5198_v29 = vpop.permute.xlu1 %5197 }
 0x30e   : > { %5234 = vst.msk [vmem:[#allocation3 + $0x58] sm:$0xff] %vm10941_vm0, %v5198_v29  ;;  %v6092_v2 = vpop.permute.xlu0 %6091  ;;  %v8981_v29 = vld [vmem:[%s9107_s28 + $0x28] sm:$0xff] }
 0x30f   : > { %5522 = vst.msk [vmem:[#allocation3 + $0x58] sm:$0xff] %vm10942_vm15, %v5486_v48  ;;  %vm10952_vm15 = vmmov %vm10949_vm9 }
 0x310   : > { %6129 = vst.msk [vmem:[#allocation3 + $0x50] sm:$0xff] %vm2576_vm13, %v6092_v2 }
 0x311   : > { %5698 = vst.msk [vmem:[#allocation3 + $0x58] sm:$0xff] %vm10943_vm11, %v5662_v41  ;;  %v5666_v34 = vpop.permute.xlu1 %5665  ;;  %vm10953_vm11 = vmmov %vm10945_vm5  ;;  %v8975_v41 = vld [vmem:[%s9107_s28] sm:$0xff] }
 0x312   : > { %6417 = vst.msk [vmem:[#allocation3 + $0x50] sm:$0xff] %vm2865_vm2, %v6380_v24  ;;  %v7328_v15 = vld [vmem:[#allocation3 + $0x48] sm:$0xff]  ;;  %v5664_v36 = vpop.permute.xlu0 %5663  ;;  %v8980_v24 = vld [vmem:[%s9107_s28 + $0x38] sm:$0xff] }
 0x313   : > { %6130 = vst.msk [vmem:[#allocation3 + $0x58] sm:$0xff] %vm2576_vm13, %v6094_v20  ;;  %8447 = vmatmul.mubr.msk.bf16.gmra.mrb[16].mxu1 %vm3825_vm7, %v7328_v15  ;;  %v8979_v20 = vld [vmem:[%s9107_s28 + $0x20] sm:$0xff]  ;;  %v8982_v15 = vld [vmem:[%s9107_s28 + $0x50] sm:$0xff] }
 0x314   : > { %6593 = vst.msk [vmem:[#allocation3 + $0x50] sm:$0xff] %vm3043_vm10, %v6556_v8 }
 0x315   : > { %7025 = vst.msk [vmem:[#allocation3 + $0x50] sm:$0xff] %vm3476_vm14, %v6988_v53  ;;  %v6558_v25 = vpop.permute.xlu1 %6557 }
 0x316   : > { %6418 = vst.msk [vmem:[#allocation3 + $0x58] sm:$0xff] %vm2865_vm2, %v6382_v18  ;;  %v7278_v0 = vpop.permute.xlu0 %7277 }
 0x317   : > { %7313 = vst.msk [vmem:[#allocation3 + $0x50] sm:$0xff] %vm10944_vm8, %v7276_v42  ;;  %vm10954_vm8 = vmmov %vm10941_vm0 }
 0x318   : > { %5699 = vst.msk [vmem:[#allocation3 + $0x60] sm:$0xff] %vm10945_vm5, %v5664_v36  ;;  %vm10955_vm5 = vmmov %vm10949_vm9 }
 0x319   : > { %6594 = vst.msk [vmem:[#allocation3 + $0x58] sm:$0xff] %vm3043_vm10, %v6558_v25  ;;  %v6386_v9 = vpop.permute.xlu1 %6385 }
 0x31a   : > { %v6384_v16 = vpop.permute.xlu0 %6383 }
 0x31d   : > { %v5490_v11 = vpop.permute.xlu1 %5489 }
 0x31e   : > { %v7329_v5 = vld [vmem:[#allocation3 + $0x50] sm:$0xff]  ;;  %v6096_v45 = vpop.permute.xlu0 %6095 }
 0x31f   : > { %8450 = vmatprep.mubr.msk.bf16.mxu1 %vm3825_vm7, %v7329_v5  ;;  %6131 = vst.msk [vmem:[#allocation3 + $0x60] sm:$0xff] %vm2576_vm13, %v6096_v45  ;;  %v8984_v5 = vld [vmem:[%s9107_s28 + $0x58] sm:$0xff] }
 0x320   : > { %6419 = vst.msk [vmem:[#allocation3 + $0x60] sm:$0xff] %vm2865_vm2, %v6384_v16 }
 0x321   : > { %v6098_v47 = vpop.permute.xlu1 %6097 }
 0x322   : > { %v6560_v49 = vpop.permute.xlu0 %6559 }
 0x323   : > { %6595 = vst.msk [vmem:[#allocation3 + $0x60] sm:$0xff] %vm3043_vm10, %v6560_v49 }
 0x328   : > { %v6990_v6 = vpop.permute.xlu1 %6989 }
 0x329   : > { %7026 = vst.msk [vmem:[#allocation3 + $0x58] sm:$0xff] %vm3476_vm14, %v6990_v6 }
 0x32a   : > { %7314 = vst.msk [vmem:[#allocation3 + $0x58] sm:$0xff] %vm10946_vm3, %v7278_v0  ;;  %vm10956_vm3 = vmmov %vm10953_vm11  ;;  %v8983_v0 = vld [vmem:[%s9107_s28 + $0x40] sm:$0xff] }
 0x32b   : > { %v6992_v7 = vpop.permute.xlu0 %6991 }
 0x32c   : > { %7027 = vst.msk [vmem:[#allocation3 + $0x60] sm:$0xff] %vm3476_vm14, %v6992_v7  ;;  %v8986_v7 = vld [vmem:[%s9107_s28 + $0x70] sm:$0xff] }
 0x331   : > { %v7330_v46 = vld [vmem:[#allocation3 + $0x58] sm:$0xff] }
 0x332   : > { %8451 = vmatmul.mubr.msk.bf16.gmra.mrb[20].mxu1 %vm3825_vm7, %v7330_v46 }
 0x333   : > { %v5202_v56 = vpop.permute.xlu1 %5201 }
 0x334   : > { %v7280_v59 = vpop.permute.xlu0 %7279  ;;  %5236 = vst.msk [vmem:[#allocation3 + $0x68] sm:$0xff] %vm10947_vm1, %v5202_v56  ;;  %vm10958_vm1 = vmmov %vm10948_vm4 }
 0x335   : > { %7315 = vst.msk [vmem:[#allocation3 + $0x60] sm:$0xff] %vm10948_vm4, %v7280_v59  ;;  %v8987_v59 = vld [vmem:[%s9107_s28 + $0x60] sm:$0xff] }
 0x336   : > { %5524 = vst.msk [vmem:[#allocation3 + $0x68] sm:$0xff] %vm10949_vm9, %v5490_v11 }
 0x337   : > { %5700 = vst.msk [vmem:[#allocation3 + $0x68] sm:$0xff] %vm10950_vm12, %v5666_v34 }
 0x338   : > { %6132 = vst.msk [vmem:[#allocation3 + $0x68] sm:$0xff] %vm2576_vm13, %v6098_v47  ;;  %v8985_v47 = vld [vmem:[%s9107_s28 + $0x48] sm:$0xff] }
 0x339   : > { %6420 = vst.msk [vmem:[#allocation3 + $0x68] sm:$0xff] %vm2865_vm2, %v6386_v9 }
 0x33c   : > { %v7331_v55 = vld [vmem:[#allocation3 + $0x60] sm:$0xff] }
 0x33d   : > { %8454 = vmatprep.mubr.msk.bf16.mxu1 %vm3825_vm7, %v7331_v55 }
 0x342   : > { %v6562_v61 = vpop.permute.xlu1 %6561 }
 0x343   : > { %6596 = vst.msk [vmem:[#allocation3 + $0x68] sm:$0xff] %vm3043_vm10, %v6562_v61 }
 0x347   : > { %v7282_v60 = vpop.permute.xlu0 %7281 }
 0x34b   : > { %v5492_v51 = vpop.permute.xlu0 %5491 }
 0x34c   : > { %v6994_v37 = vpop.permute.xlu1 %6993 }
 0x34d   : > { %7028 = vst.msk [vmem:[#allocation3 + $0x68] sm:$0xff] %vm3476_vm14, %v6994_v37 }
 0x34e   : > { %7316 = vst.msk [vmem:[#allocation3 + $0x68] sm:$0xff] %vm10951_vm6, %v7282_v60  ;;  %v8988_v60 = vld [vmem:[%s9107_s28 + $0x78] sm:$0xff] }
 0x34f   : > { %v5668_v52 = vpop.permute.xlu0 %5667 }
 0x350   : > { %v5204_v57 = vpop.permute.xlu1 %5203 }
 0x351   : > { %5237 = vst.msk [vmem:[#allocation3 + $0x70] sm:$0xff] %vm10941_vm0, %v5204_v57  ;;  %v8989_v57 = vld [vmem:[%s9107_s28 + $0x68] sm:$0xff] }
 0x352   : > { %5525 = vst.msk [vmem:[#allocation3 + $0x70] sm:$0xff] %vm10952_vm15, %v5492_v51 }
 0x353   : > { %5701 = vst.msk [vmem:[#allocation3 + $0x70] sm:$0xff] %vm10953_vm11, %v5668_v52  ;;  %v6100_v3 = vpop.permute.xlu0 %6099 }
 0x354   : > { %v5206_v31 = vpop.permute.xlu1 %5205  ;;  %6133 = vst.msk [vmem:[#allocation3 + $0x70] sm:$0xff] %vm2576_vm13, %v6100_v3  ;;  %v8990_v3 = vld [vmem:[%s9107_s28 + $0x90] sm:$0xff] }
 0x355   : > { %5238 = vst.msk [vmem:[#allocation3 + $0x78] sm:$0xff] %vm10954_vm8, %v5206_v31  ;;  %v7332_v63 = vld [vmem:[#allocation3 + $0x68] sm:$0xff]  ;;  %v8432_v58 = vpop.f32.mrb[0].mxu1 }
 0x356   : > { %8455 = vmatmul.mubr.msk.bf16.gmra.mrb[24].mxu1 %vm3825_vm7, %v7332_v63  ;;  %v7569_v50 = vadd.f32 %v8974_v43, %v8432_v58  ;;  %v7440_v39 = vpop.f32.mrb[1].mxu1  ;;  %v8993_v43 = vld [vmem:[%s9107_s28 + $0x88] sm:$0xff] }
 0x357   : > { %v6388_v23 = vpop.permute.xlu0 %6387  ;;  %v7567_v4 = vadd.f32 %v8975_v41, %v7440_v39  ;;  %v8433_v38 = vpop.f32.mrb[2].mxu1  ;;  %v8994_v41 = vld [vmem:[%s9107_s28 + $0xb0] sm:$0xff] }
 0x358   : > { %v5494_v30 = vpop.permute.xlu1 %5493  ;;  %6421 = vst.msk [vmem:[#allocation3 + $0x70] sm:$0xff] %vm2865_vm2, %v6388_v23  ;;  %v7570_v62 = vadd.f32 %v8976_v12, %v8433_v38  ;;  %v7443_v8 = vpop.f32.mrb[3].mxu1  ;;  %v8991_v23 = vld [vmem:[%s9107_s28 + $0x80] sm:$0xff] }
 0x359   : > { %5526 = vst.msk [vmem:[#allocation3 + $0x78] sm:$0xff] %vm10955_vm5, %v5494_v30  ;;  %v7568_v35 = vadd.f32 %v8977_v17, %v7443_v8 }
 0x35b   : > { %v6564_v28 = vpop.permute.xlu0 %6563 }
 0x35c   : > { %v5670_v32 = vpop.permute.xlu1 %5669  ;;  %6597 = vst.msk [vmem:[#allocation3 + $0x70] sm:$0xff] %vm3043_vm10, %v6564_v28 }
 0x35d   : > { %5702 = vst.msk [vmem:[#allocation3 + $0x78] sm:$0xff] %vm10956_vm3, %v5670_v32 }
 0x35f   : > { %v6996_v33 = vpop.permute.xlu0 %6995 }
 0x360   : > { %v6102_v14 = vpop.permute.xlu1 %6101  ;;  %7029 = vst.msk [vmem:[#allocation3 + $0x70] sm:$0xff] %vm3476_vm14, %v6996_v33 }
 0x361   : > { %6134 = vst.msk [vmem:[#allocation3 + $0x78] sm:$0xff] %vm2576_vm13, %v6102_v14  ;;  %vm10957_vm13 = vcmask 31744   ;;  %v8992_v14 = vld [vmem:[%s9107_s28 + $0x98] sm:$0xff] }
 0x362   : > { %7601 = vst.msk [vmem:[%s10695_s9 + $0x10] sm:$0xff] %vm10957_vm13, %v7569_v50  ;;  %vm10959_vm4 = vmmov %vm10957_vm13 }
 0x363   : > { %v7284_v13 = vpop.permute.xlu0 %7283  ;;  %7599 = vst.msk [vmem:[%s10695_s9] sm:$0xff] %vm10959_vm4, %v7567_v4  ;;  %vm10960_vm9 = vmmov %vm10959_vm4 }
 0x364   : > { %v6390_v10 = vpop.permute.xlu1 %6389  ;;  %7317 = vst.msk [vmem:[#allocation3 + $0x70] sm:$0xff] %vm10958_vm1, %v7284_v13  ;;  %vm10961_vm12 = vmmov %vm10959_vm4 }
 0x365   : > { %6422 = vst.msk [vmem:[#allocation3 + $0x78] sm:$0xff] %vm2865_vm2, %v6390_v10  ;;  %vm10962_vm2 = vmmov %vm10958_vm1  ;;  %v8995_v10 = vld [vmem:[%s9107_s28 + $0xa0] sm:$0xff] }
 0x366   : > { %7602 = vst.msk [vmem:[%s10695_s9 + $0x18] sm:$0xff] %vm10960_vm9, %v7570_v62  ;;  %vm10966_vm6 = vmmov %vm10959_vm4  ;;  %v8996_v62 = vld [vmem:[%s9107_s28 + $0xb8] sm:$0xff] }
 0x367   : > { %7600 = vst.msk [vmem:[%s10695_s9 + $0x8] sm:$0xff] %vm10961_vm12, %v7568_v35  ;;  %vm10967_vm0 = vmmov %vm10959_vm4  ;;  %v8997_v35 = vld [vmem:[%s9107_s28 + $0xa8] sm:$0xff] }
 0x368   : > { %v6566_v21 = vpop.permute.xlu1 %6565  ;;  %vm10968_vm15 = vmmov %vm10967_vm0 }
 0x369   : > { %6598 = vst.msk [vmem:[#allocation3 + $0x78] sm:$0xff] %vm3043_vm10, %v6566_v21  ;;  %vm10963_vm10 = vmmov %vm10959_vm4 }
 0x36a   : > { %vm10969_vm11 = vmmov %vm10967_vm0 }
 0x36b   : > { %v7333_v26 = vld [vmem:[#allocation3 + $0x70] sm:$0xff]  ;;  %vm10970_vm8 = vmmov %vm10967_vm0 }
 0x36c   : > { %v6998_v44 = vpop.permute.xlu1 %6997  ;;  %8458 = vmatprep.mubr.msk.bf16.mxu1 %vm3825_vm7, %v7333_v26  ;;  %vm10971_vm5 = vmmov %vm10967_vm0  ;;  %v8998_v26 = vld [vmem:[%s9107_s28 + $0xd0] sm:$0xff] }
 0x36d   : > { %7030 = vst.msk [vmem:[#allocation3 + $0x78] sm:$0xff] %vm3476_vm14, %v6998_v44  ;;  %vm10964_vm14 = vmmov %vm10959_vm4 }
 0x36e   : > { %vm10972_vm3 = vmmov %vm10967_vm0 }
 0x36f   : > { %vm10973_vm13 = vmmov %vm10967_vm0 }
 0x370   : > { %v7286_v18 = vpop.permute.xlu1 %7285  ;;  %vm10974_vm1 = vmmov %vm10967_vm0 }
 0x371   : > { %7318 = vst.msk [vmem:[#allocation3 + $0x78] sm:$0xff] %vm10962_vm2, %v7286_v18  ;;  %vm10976_vm9 = vmmov %vm10967_vm0 }
 0x372   : > { %vm10977_vm12 = vmmov %vm10967_vm0 }
 0x373   : > { %vm10978_vm2 = vmmov %vm10967_vm0 }
 0x374   : > { %v8436_v42 = vpop.f32.mrb[4].mxu1 }
 0x375   : > { %v7573_v48 = vadd.f32 %v8978_v22, %v8436_v42  ;;  %v7456_v1 = vpop.f32.mrb[5].mxu1  ;;  %v8999_v42 = vld [vmem:[%s9107_s28 + $0xc0] sm:$0xff] }
 0x376   : > { %v7571_v54 = vadd.f32 %v8979_v20, %v7456_v1  ;;  %v8437_v40 = vpop.f32.mrb[6].mxu1  ;;  %v9000_v1 = vld [vmem:[%s9107_s28 + $0xd8] sm:$0xff] }
 0x377   : > { %7605 = vst.msk [vmem:[%s10695_s9 + $0x30] sm:$0xff] %vm10963_vm10, %v7573_v48  ;;  %v7574_v27 = vadd.f32 %v8980_v24, %v8437_v40  ;;  %v7459_v53 = vpop.f32.mrb[7].mxu1  ;;  %vm10979_vm10 = vmmov %vm10967_vm0  ;;  %v9001_v40 = vld [vmem:[%s9107_s28 + $0xc8] sm:$0xff] }
 0x378   : > { %v7334_v19 = vld [vmem:[#allocation3 + $0x78] sm:$0xff]  ;;  %7603 = vst.msk [vmem:[%s10695_s9 + $0x20] sm:$0xff] %vm10964_vm14, %v7571_v54  ;;  %v7572_v2 = vadd.f32 %v8981_v29, %v7459_v53  ;;  %vm10980_vm14 = vmmov %vm10967_vm0 }
 0x379   : > { %8459 = vmatmul.mubr.msk.bf16.gmra.mrb[28].mxu1 %vm3825_vm7, %v7334_v19  ;;  %vm10965_vm7 = vmmov %vm10959_vm4  ;;  %v9002_v53 = vld [vmem:[%s9107_s28 + $0xf0] sm:$0xff] }
 0x37a   : > { %7606 = vst.msk [vmem:[%s10695_s9 + $0x38] sm:$0xff] %vm10965_vm7, %v7574_v27  ;;  %vm10975_vm4 = vmmov %vm10967_vm0 }
 0x37b   : > { %7604 = vst.msk [vmem:[%s10695_s9 + $0x28] sm:$0xff] %vm10966_vm6, %v7572_v2  ;;  %vm10981_vm7 = vmmov %vm10967_vm0 }
 0x37c   : > { %vm10982_vm6 = vmmov %vm10967_vm0 }
 0x3a2   : > { %v8440_v34 = vpop.f32.mrb[8].mxu1 }
 0x3a3   : > { %v7577_v36 = vadd.f32 %v8982_v15, %v8440_v34  ;;  %v7472_v25 = vpop.f32.mrb[9].mxu1  ;;  %v9003_v34 = vld [vmem:[%s9107_s28 + $0xe0] sm:$0xff] }
 0x3a4   : > { %v7575_v9 = vadd.f32 %v8983_v0, %v7472_v25  ;;  %v8441_v16 = vpop.f32.mrb[10].mxu1  ;;  %v9004_v25 = vld [vmem:[%s9107_s28 + $0xf8] sm:$0xff] }
 0x3a5   : > { %7609 = vst.msk [vmem:[%s10695_s9 + $0x50] sm:$0xff] %vm10967_vm0, %v7577_v36  ;;  %v7578_v11 = vadd.f32 %v8984_v5, %v8441_v16  ;;  %v7475_v45 = vpop.f32.mrb[11].mxu1  ;;  %v9005_v16 = vld [vmem:[%s9107_s28 + $0xe8] sm:$0xff] }
 0x3a6   : > { %7607 = vst.msk [vmem:[%s10695_s9 + $0x40] sm:$0xff] %vm10968_vm15, %v7575_v9  ;;  %v7576_v49 = vadd.f32 %v8985_v47, %v7475_v45  ;;  %vm10983_vm15 = vmmov %vm10967_vm0 }
 0x3a7   : > { %7610 = vst.msk [vmem:[%s10695_s9 + $0x58] sm:$0xff] %vm10969_vm11, %v7578_v11  ;;  %vm10984_vm11 = vmmov %vm10967_vm0 }
 0x3a8   : > { %7608 = vst.msk [vmem:[%s10695_s9 + $0x48] sm:$0xff] %vm10970_vm8, %v7576_v49  ;;  %vm10985_vm8 = vmmov %vm10967_vm0 }
 0x3c2   : > { %v8444_v6 = vpop.f32.mrb[12].mxu1 }
 0x3c3   : > { %v7581_v46 = vadd.f32 %v8986_v7, %v8444_v6  ;;  %v7488_v56 = vpop.f32.mrb[13].mxu1 }
 0x3c4   : > { %v7579_v61 = vadd.f32 %v8987_v59, %v7488_v56  ;;  %v8445_v55 = vpop.f32.mrb[14].mxu1 }
 0x3c5   : > { %7613 = vst.msk [vmem:[%s10695_s9 + $0x70] sm:$0xff] %vm10971_vm5, %v7581_v46  ;;  %v7582_v37 = vadd.f32 %v8988_v60, %v8445_v55  ;;  %v7491_v51 = vpop.f32.mrb[15].mxu1  ;;  %vm10986_vm5 = vmmov %vm10967_vm0 }
 0x3c6   : > { %7611 = vst.msk [vmem:[%s10695_s9 + $0x60] sm:$0xff] %vm10972_vm3, %v7579_v61  ;;  %v7580_v52 = vadd.f32 %v8989_v57, %v7491_v51  ;;  %vm10987_vm3 = vmmov %vm10967_vm0 }
 0x3c7   : > { %7614 = vst.msk [vmem:[%s10695_s9 + $0x78] sm:$0xff] %vm10973_vm13, %v7582_v37  ;;  %vm10988_vm13 = vmmov %vm10967_vm0 }
 0x3c8   : > { %7612 = vst.msk [vmem:[%s10695_s9 + $0x68] sm:$0xff] %vm10974_vm1, %v7580_v52  ;;  %vm10989_vm1 = vmmov %vm10967_vm0 }
 0x3e6   : > { %v8448_v31 = vpop.f32.mrb[16].mxu1 }
 0x3e7   : > { %v7585_v63 = vadd.f32 %v8990_v3, %v8448_v31  ;;  %v7504_v30 = vpop.f32.mrb[17].mxu1 }
 0x3e8   : > { %v7583_v32 = vadd.f32 %v8991_v23, %v7504_v30  ;;  %v8449_v28 = vpop.f32.mrb[18].mxu1 }
 0x3e9   : > { %7617 = vst.msk [vmem:[%s10695_s9 + $0x90] sm:$0xff] %vm10975_vm4, %v7585_v63  ;;  %v7586_v33 = vadd.f32 %v8992_v14, %v8449_v28  ;;  %v7507_v58 = vpop.f32.mrb[19].mxu1 }
 0x3ea   : > { %7615 = vst.msk [vmem:[%s10695_s9 + $0x80] sm:$0xff] %vm10976_vm9, %v7583_v32  ;;  %v7584_v50 = vadd.f32 %v8993_v43, %v7507_v58 }
 0x3eb   : > { %7618 = vst.msk [vmem:[%s10695_s9 + $0x98] sm:$0xff] %vm10977_vm12, %v7586_v33 }
 0x3ec   : > { %7616 = vst.msk [vmem:[%s10695_s9 + $0x88] sm:$0xff] %vm10978_vm2, %v7584_v50 }
 0x405   : > { %v8452_v39 = vpop.f32.mrb[20].mxu1 }
 0x406   : > { %v7589_v4 = vadd.f32 %v8994_v41, %v8452_v39  ;;  %v7520_v38 = vpop.f32.mrb[21].mxu1 }
 0x407   : > { %v7587_v13 = vadd.f32 %v8995_v10, %v7520_v38  ;;  %v8453_v12 = vpop.f32.mrb[22].mxu1 }
 0x408   : > { %7621 = vst.msk [vmem:[%s10695_s9 + $0xb0] sm:$0xff] %vm10979_vm10, %v7589_v4  ;;  %v7590_v8 = vadd.f32 %v8996_v62, %v8453_v12  ;;  %v7523_v17 = vpop.f32.mrb[23].mxu1 }
 0x409   : > { %7619 = vst.msk [vmem:[%s10695_s9 + $0xa0] sm:$0xff] %vm10980_vm14, %v7587_v13  ;;  %v7588_v21 = vadd.f32 %v8997_v35, %v7523_v17 }
 0x40a   : > { %7622 = vst.msk [vmem:[%s10695_s9 + $0xb8] sm:$0xff] %vm10981_vm7, %v7590_v8 }
 0x40b   : > { %7620 = vst.msk [vmem:[%s10695_s9 + $0xa8] sm:$0xff] %vm10982_vm6, %v7588_v21 }
 0x429   : > { %v8456_v44 = vpop.f32.mrb[24].mxu1 }
 0x42a   : > { %v7593_v18 = vadd.f32 %v8998_v26, %v8456_v44  ;;  %v7536_v19 = vpop.f32.mrb[25].mxu1 }
 0x42b   : > { %v7591_v22 = vadd.f32 %v8999_v42, %v7536_v19  ;;  %v8457_v48 = vpop.f32.mrb[26].mxu1 }
 0x42c   : > { %7625 = vst.msk [vmem:[%s10695_s9 + $0xd0] sm:$0xff] %vm10967_vm0, %v7593_v18  ;;  %v7594_v20 = vadd.f32 %v9000_v1, %v8457_v48  ;;  %v7539_v54 = vpop.f32.mrb[27].mxu1 }
 0x42d   : > { %7623 = vst.msk [vmem:[%s10695_s9 + $0xc0] sm:$0xff] %vm10983_vm15, %v7591_v22  ;;  %v7592_v24 = vadd.f32 %v9001_v40, %v7539_v54 }
 0x42e   : > { %7626 = vst.msk [vmem:[%s10695_s9 + $0xd8] sm:$0xff] %vm10984_vm11, %v7594_v20 }
 0x42f   : > { %7624 = vst.msk [vmem:[%s10695_s9 + $0xc8] sm:$0xff] %vm10985_vm8, %v7592_v24 }
 0x44c   : > { %v8460_v27 = vpop.f32.mrb[28].mxu1 }
 0x44d   : > { %v7597_v29 = vadd.f32 %v9002_v53, %v8460_v27  ;;  %v7552_v2 = vpop.f32.mrb[29].mxu1 }
 0x44e   : > { %v7595_v15 = vadd.f32 %v9003_v34, %v7552_v2  ;;  %v8461_v36 = vpop.f32.mrb[30].mxu1 }
 0x44f   : > { %7629 = vst.msk [vmem:[%s10695_s9 + $0xf0] sm:$0xff] %vm10986_vm5, %v7597_v29  ;;  %v7598_v0 = vadd.f32 %v9004_v25, %v8461_v36  ;;  %v7555_v9 = vpop.f32.mrb[31].mxu1 }
 0x450   : > { %7627 = vst.msk [vmem:[%s10695_s9 + $0xe0] sm:$0xff] %vm10987_vm3, %v7595_v15  ;;  %v7596_v5 = vadd.f32 %v9005_v16, %v7555_v9 }
 0x451   : > { %7630 = vst.msk [vmem:[%s10695_s9 + $0xf8] sm:$0xff] %vm10988_vm13, %v7598_v0 }
 0x452   : > { %7628 = vst.msk [vmem:[%s10695_s9 + $0xe8] sm:$0xff] %vm10989_vm1, %v7596_v5 }
 0x453 PF: > { %s16_s21 = sadd.s32 1, %s9012_s21  }
 0x454   : > { %p13_p4 = scmp.ge.s32.totalorder %s16_s21, 4  }
 0x456   :  { %15 = sbr.rel (!%p13_p4) target bundleno = 1 (0x1), region = 77 }

</bundles_post_ra>
